<compile_context>
chip_gen: v7x
topology: tpu7x:2x2x1
jax: 0.10.0
libtpu: 0.0.40
codegen_flags: <defaults>
</compile_context>

<pallas_src>
import functools

import jax
import jax.numpy as jnp
from jax.experimental import pallas as pl
from jax.experimental.pallas import tpu as pltpu

LN_EPS = 1e-5


def _layer_norm(x, gamma, beta):
    mu = jnp.mean(x, axis=-1, keepdims=True)
    var = jnp.mean((x - mu) ** 2, axis=-1, keepdims=True)
    return (x - mu) * jax.lax.rsqrt(var + LN_EPS) * gamma + beta


def _attention_core(q, k, v, mask, num_heads):
    """q, k, v: (S, D) f32 projections (1/sqrt(dh) already folded into q). mask: (S,S) or None."""
    S, D = q.shape
    dh = D // num_heads
    qh = q.reshape(S, num_heads, dh).transpose(1, 0, 2)   # (H, S, dh)
    kh = k.reshape(S, num_heads, dh).transpose(1, 0, 2)
    vh = v.reshape(S, num_heads, dh).transpose(1, 0, 2)

    # head-batched score matmul on the MXU (bf16 operands, f32 accumulation)
    scores = jnp.einsum("hqd,hkd->hqk",
                        qh.astype(jnp.bfloat16), kh.astype(jnp.bfloat16),
                        preferred_element_type=jnp.float32)        # (H, S, S)
    if mask is not None:
        scores = scores + mask[None, :, :]

    scores = scores - jnp.max(scores, axis=-1, keepdims=True)
    p = jnp.exp(scores)
    p = p * pl.reciprocal(jnp.sum(p, axis=-1, keepdims=True), approx=True)

    ctx = jnp.einsum("hqk,hkd->hqd",
                     p.astype(jnp.bfloat16), vh.astype(jnp.bfloat16),
                     preferred_element_type=jnp.float32)           # (H, S, dh)
    return ctx.transpose(1, 0, 2).reshape(S, D)                    # (S, D)


def decoder_layer_kernel(*refs, num_heads, has_self_mask, has_ctx_mask):
    i = 0
    self_mask = None
    ctx_mask = None
    if has_self_mask:
        self_mask = refs[i][0]      # (S, S) additive
        i += 1
    if has_ctx_mask:
        ctx_mask = refs[i][0]
        i += 1
    (dec_ref, enc_ref,
     wqkv_ref, bqkv_ref, wo_ref, bo_ref, ln1g_ref, ln1b_ref,
     w1_ref, b1_ref, w2_ref, b2_ref, ln2g_ref, ln2b_ref,
     o_ref) = refs[i:]

    dec = dec_ref[0]                # (S, D) f32
    enc = enc_ref[0]
    D = dec.shape[-1]

    bqkv = bqkv_ref[0]              # (3D,) f32
    bo = bo_ref[0]
    ln1g = ln1g_ref[0]
    ln1b = ln1b_ref[0]
    wo = wo_ref[...]                # (D, D) bf16

    # ---------------- stage 1: masked self-attention over dec ----------------
    qkv = jnp.dot(dec.astype(jnp.bfloat16), wqkv_ref[...],
                  preferred_element_type=jnp.float32) + bqkv       # (S, 3D) fused QKV
    ctx = _attention_core(qkv[:, :D], qkv[:, D:2 * D], qkv[:, 2 * D:],
                          self_mask, num_heads)
    out = jnp.dot(ctx.astype(jnp.bfloat16), wo,
                  preferred_element_type=jnp.float32) + bo
    d1 = _layer_norm(dec + out, ln1g, ln1b)

    # ------- stage 2: cross-attention (same weights): q from d1, k/v from enc -------
    q2 = jnp.dot(d1.astype(jnp.bfloat16), wqkv_ref[:, :D],
                 preferred_element_type=jnp.float32) + bqkv[:D]
    kv2 = jnp.dot(enc.astype(jnp.bfloat16), wqkv_ref[:, D:],
                  preferred_element_type=jnp.float32) + bqkv[D:]
    ctx2 = _attention_core(q2, kv2[:, :D], kv2[:, D:], ctx_mask, num_heads)
    out2 = jnp.dot(ctx2.astype(jnp.bfloat16), wo,
                   preferred_element_type=jnp.float32) + bo
    d2 = _layer_norm(d1 + out2, ln1g, ln1b)

    # ---------------- stage 3: position-wise feed-forward ----------------
    h = jnp.dot(d2.astype(jnp.bfloat16), w1_ref[...],
                preferred_element_type=jnp.float32) + b1_ref[0]
    h = jnp.maximum(h, 0.0)
    y = jnp.dot(h.astype(jnp.bfloat16), w2_ref[...],
                preferred_element_type=jnp.float32) + b2_ref[0]
    o_ref[0] = _layer_norm(d2 + y, ln2g_ref[0], ln2b_ref[0])


def decoder_layer(dec_inputs, enc_outputs, self_attn_mask, context_attn_mask,
                  params, num_heads):
    """Fused DecoderLayer forward. Masks are additive float masks of shape (B, S, S) or None."""
    B, S, D = dec_inputs.shape
    F = params["w1"].shape[-1]
    has_self = self_attn_mask is not None
    has_ctx = context_attn_mask is not None

    act_spec = pl.BlockSpec((1, S, D), lambda b: (b, 0, 0))
    mask_spec = pl.BlockSpec((1, S, S), lambda b: (b, 0, 0))

    def const_spec(shape):
        return pl.BlockSpec(shape, lambda b: (0, 0))

    inputs, in_specs = [], []
    if has_self:
        inputs.append(self_attn_mask)
        in_specs.append(mask_spec)
    if has_ctx:
        inputs.append(context_attn_mask)
        in_specs.append(mask_spec)
    inputs += [dec_inputs, enc_outputs,
               params["w_qkv"], params["b_qkv"], params["wo"], params["bo"],
               params["ln1_g"], params["ln1_b"],
               params["w1"], params["b1"], params["w2"], params["b2"],
               params["ln2_g"], params["ln2_b"]]
    in_specs += [act_spec, act_spec,
                 const_spec((D, 3 * D)), const_spec((1, 3 * D)),
                 const_spec((D, D)), const_spec((1, D)),
                 const_spec((1, D)), const_spec((1, D)),
                 const_spec((D, F)), const_spec((1, F)),
                 const_spec((F, D)), const_spec((1, D)),
                 const_spec((1, D)), const_spec((1, D))]

    kernel = functools.partial(decoder_layer_kernel, num_heads=num_heads,
                               has_self_mask=has_self, has_ctx_mask=has_ctx)
    return pl.pallas_call(
        kernel,
        out_shape=jax.ShapeDtypeStruct((B, S, D), dec_inputs.dtype),
        grid_spec=pltpu.PrefetchScalarGridSpec(
            num_scalar_prefetch=0, grid=(B,),
            in_specs=in_specs,
            out_specs=act_spec),
        compiler_params=pltpu.CompilerParams(dimension_semantics=("parallel",)),
    )(*inputs)


# ---------------------------------------------------------------------------
# Parameter packing: fused QKV weight (scale folded into Q columns), bf16 weights.
# ---------------------------------------------------------------------------
def pack_params(raw, num_heads):
    D = raw["wq"].shape[0]
    scale = float(D // num_heads) ** -0.5
    w_qkv = jnp.concatenate([raw["wq"] * scale, raw["wk"], raw["wv"]], axis=1)  # (D, 3D)
    b_qkv = jnp.concatenate([raw["bq"] * scale, raw["bk"], raw["bv"]], axis=1)  # (1, 3D)
    return {
        "w_qkv": w_qkv.astype(jnp.bfloat16),
        "b_qkv": b_qkv,
        "wo": raw["wo"].astype(jnp.bfloat16),
        "bo": raw["bo"],
        "ln1_g": raw["ln_g"], "ln1_b": raw["ln_b"],
        "w1": raw["w1"].astype(jnp.bfloat16), "b1": raw["b1"],
        "w2": raw["w2"].astype(jnp.bfloat16), "b2": raw["b2"],
        "ln2_g": raw["ln2_g"], "ln2_b": raw["ln2_b"],
    }


# ---------------------------------------------------------------------------
# Pure-JAX f32 reference (module semantics) for a silent correctness check.
# ---------------------------------------------------------------------------
def _ref_mha(key, value, query, mask, raw, num_heads):
    B, S, D = query.shape
    dh = D // num_heads
    q = query @ raw["wq"] + raw["bq"]
    k = key @ raw["wk"] + raw["bk"]
    v = value @ raw["wv"] + raw["bv"]
    q = q.reshape(B, S, num_heads, dh).transpose(0, 2, 1, 3)
    k = k.reshape(B, S, num_heads, dh).transpose(0, 2, 1, 3)
    v = v.reshape(B, S, num_heads, dh).transpose(0, 2, 1, 3)
    scores = jnp.einsum("bhqd,bhkd->bhqk", q, k) * (dh ** -0.5)
    if mask is not None:
        scores = scores + mask[:, None, :, :]
    p = jax.nn.softmax(scores, axis=-1)
    ctx = jnp.einsum("bhqk,bhkd->bhqd", p, v).transpose(0, 2, 1, 3).reshape(B, S, D)
    out = ctx @ raw["wo"] + raw["bo"]
    return _layer_norm(query + out, raw["ln_g"], raw["ln_b"])


def _ref_decoder(dec, enc, sm, cm, raw, num_heads):
    d = _ref_mha(dec, dec, dec, sm, raw, num_heads)
    d = _ref_mha(enc, enc, d, cm, raw, num_heads)
    h = jnp.maximum(d @ raw["w1"] + raw["b1"], 0.0)
    y = h @ raw["w2"] + raw["b2"]
    return _layer_norm(d + y, raw["ln2_g"], raw["ln2_b"])


def init_raw_params(key, model_dim, ffn_dim):
    ks = jax.random.split(key, 6)
    s = 0.05
    return {
        "wq": jax.random.normal(ks[0], (model_dim, model_dim), jnp.float32) * s,
        "wk": jax.random.normal(ks[1], (model_dim, model_dim), jnp.float32) * s,
        "wv": jax.random.normal(ks[2], (model_dim, model_dim), jnp.float32) * s,
        "wo": jax.random.normal(ks[3], (model_dim, model_dim), jnp.float32) * s,
        "bq": jnp.full((1, model_dim), 0.01, jnp.float32),
        "bk": jnp.full((1, model_dim), -0.01, jnp.float32),
        "bv": jnp.full((1, model_dim), 0.02, jnp.float32),
        "bo": jnp.zeros((1, model_dim), jnp.float32),
        "ln_g": jnp.ones((1, model_dim), jnp.float32),
        "ln_b": jnp.zeros((1, model_dim), jnp.float32),
        "w1": jax.random.normal(ks[4], (model_dim, ffn_dim), jnp.float32) * s,
        "b1": jnp.full((1, ffn_dim), 0.01, jnp.float32),
        "w2": jax.random.normal(ks[5], (ffn_dim, model_dim), jnp.float32) * s,
        "b2": jnp.zeros((1, model_dim), jnp.float32),
        "ln2_g": jnp.ones((1, model_dim), jnp.float32),
        "ln2_b": jnp.zeros((1, model_dim), jnp.float32),
    }


if __name__ == "__main__":
    # Small shapes consistent with the module (model_dim multiple of 128 for lane-dense stores).
    B, S, D, H, F = 2, 16, 128, 8, 256
    root = jax.random.PRNGKey(0)
    k_dec, k_enc, k_par = jax.random.split(root, 3)
    dec_inputs = jax.random.normal(k_dec, (B, S, D), jnp.float32)
    enc_outputs = jax.random.normal(k_enc, (B, S, D), jnp.float32)
    raw = init_raw_params(k_par, D, F)
    params = pack_params(raw, H)

    # Causal additive self-attention mask; context mask is None (as in the docstring).
    causal = jnp.where(jnp.tril(jnp.ones((S, S), jnp.bool_)), 0.0, -1e9).astype(jnp.float32)
    self_attn_mask = jnp.broadcast_to(causal, (B, S, S))
    context_attn_mask = None

    out = decoder_layer(dec_inputs, enc_outputs, self_attn_mask, context_attn_mask,
                        params, num_heads=H)
    out = jax.block_until_ready(out)

    ref = _ref_decoder(dec_inputs, enc_outputs, self_attn_mask, context_attn_mask, raw, H)
    assert out.shape == (B, S, D)
    err = float(jnp.max(jnp.abs(out - ref)))
    # bf16 MXU matmuls + approx softmax reciprocal vs. an all-f32 reference.
    assert jnp.allclose(out, ref, atol=5e-2, rtol=5e-2), f"max abs err = {err}"
    print("KERNEL_OK")
</pallas_src>

<mosaic_0001>
module attributes {stable_mosaic.version = 11 : i64} {
  func.func @decoder_layer_kernel(%arg0: i32, %arg1: memref<1x16x16xf32, #tpu.memory_space<vmem>>, %arg2: memref<1x16x128xf32, #tpu.memory_space<vmem>>, %arg3: memref<1x16x128xf32, #tpu.memory_space<vmem>>, %arg4: memref<128x384xbf16, #tpu.memory_space<vmem>>, %arg5: memref<1x384xf32, #tpu.memory_space<vmem>>, %arg6: memref<128x128xbf16, #tpu.memory_space<vmem>>, %arg7: memref<1x128xf32, #tpu.memory_space<vmem>>, %arg8: memref<1x128xf32, #tpu.memory_space<vmem>>, %arg9: memref<1x128xf32, #tpu.memory_space<vmem>>, %arg10: memref<128x256xbf16, #tpu.memory_space<vmem>>, %arg11: memref<1x256xf32, #tpu.memory_space<vmem>>, %arg12: memref<256x128xbf16, #tpu.memory_space<vmem>>, %arg13: memref<1x128xf32, #tpu.memory_space<vmem>>, %arg14: memref<1x128xf32, #tpu.memory_space<vmem>>, %arg15: memref<1x128xf32, #tpu.memory_space<vmem>>, %arg16: memref<1x16x128xf32, #tpu.memory_space<vmem>>) attributes {dimension_semantics = [#tpu.dimension_semantics<parallel>], iteration_bounds = array<i64: 2>, scalar_prefetch = 0 : i64, scratch_operands = 0 : i64, tpu.core_type = #tpu.core_type<tc>, window_params = [{transform_indices = @transform_0, window_bounds = array<i64: 1, 16, 16>}, {transform_indices = @transform_1, window_bounds = array<i64: 1, 16, 128>}, {transform_indices = @transform_2, window_bounds = array<i64: 1, 16, 128>}, {pipeline_mode = #tpu.pipeline_mode<synchronous>, transform_indices = @transform_3, window_bounds = array<i64: 128, 384>}, {pipeline_mode = #tpu.pipeline_mode<synchronous>, transform_indices = @transform_4, window_bounds = array<i64: 1, 384>}, {pipeline_mode = #tpu.pipeline_mode<synchronous>, transform_indices = @transform_5, window_bounds = array<i64: 128, 128>}, {pipeline_mode = #tpu.pipeline_mode<synchronous>, transform_indices = @transform_6, window_bounds = array<i64: 1, 128>}, {pipeline_mode = #tpu.pipeline_mode<synchronous>, transform_indices = @transform_7, window_bounds = array<i64: 1, 128>}, {pipeline_mode = #tpu.pipeline_mode<synchronous>, transform_indices = @transform_8, window_bounds = array<i64: 1, 128>}, {pipeline_mode = #tpu.pipeline_mode<synchronous>, transform_indices = @transform_9, window_bounds = array<i64: 128, 256>}, {pipeline_mode = #tpu.pipeline_mode<synchronous>, transform_indices = @transform_10, window_bounds = array<i64: 1, 256>}, {pipeline_mode = #tpu.pipeline_mode<synchronous>, transform_indices = @transform_11, window_bounds = array<i64: 256, 128>}, {pipeline_mode = #tpu.pipeline_mode<synchronous>, transform_indices = @transform_12, window_bounds = array<i64: 1, 128>}, {pipeline_mode = #tpu.pipeline_mode<synchronous>, transform_indices = @transform_13, window_bounds = array<i64: 1, 128>}, {pipeline_mode = #tpu.pipeline_mode<synchronous>, transform_indices = @transform_14, window_bounds = array<i64: 1, 128>}, {transform_indices = @transform_15, window_bounds = array<i64: 1, 16, 128>}]} {
    %c0 = arith.constant 0 : index
    %c0_0 = arith.constant 0 : index
    %c0_1 = arith.constant 0 : index
    %0 = vector.load %arg1[%c0, %c0_0, %c0_1] : memref<1x16x16xf32, #tpu.memory_space<vmem>>, vector<1x16x16xf32>
    %1 = vector.shape_cast %0 : vector<1x16x16xf32> to vector<16x16xf32>
    %c0_2 = arith.constant 0 : index
    %c0_3 = arith.constant 0 : index
    %c0_4 = arith.constant 0 : index
    %2 = vector.load %arg2[%c0_2, %c0_3, %c0_4] : memref<1x16x128xf32, #tpu.memory_space<vmem>>, vector<1x16x128xf32>
    %3 = vector.shape_cast %2 : vector<1x16x128xf32> to vector<16x128xf32>
    %c0_5 = arith.constant 0 : index
    %c0_6 = arith.constant 0 : index
    %c0_7 = arith.constant 0 : index
    %4 = vector.load %arg3[%c0_5, %c0_6, %c0_7] : memref<1x16x128xf32, #tpu.memory_space<vmem>>, vector<1x16x128xf32>
    %5 = vector.shape_cast %4 : vector<1x16x128xf32> to vector<16x128xf32>
    %c0_8 = arith.constant 0 : index
    %c0_9 = arith.constant 0 : index
    %6 = vector.load %arg5[%c0_8, %c0_9] : memref<1x384xf32, #tpu.memory_space<vmem>>, vector<1x384xf32>
    %7 = vector.shape_cast %6 : vector<1x384xf32> to vector<384xf32>
    %c0_10 = arith.constant 0 : index
    %c0_11 = arith.constant 0 : index
    %8 = vector.load %arg7[%c0_10, %c0_11] : memref<1x128xf32, #tpu.memory_space<vmem>>, vector<1x128xf32>
    %9 = vector.shape_cast %8 : vector<1x128xf32> to vector<128xf32>
    %c0_12 = arith.constant 0 : index
    %c0_13 = arith.constant 0 : index
    %10 = vector.load %arg8[%c0_12, %c0_13] : memref<1x128xf32, #tpu.memory_space<vmem>>, vector<1x128xf32>
    %11 = vector.shape_cast %10 : vector<1x128xf32> to vector<128xf32>
    %c0_14 = arith.constant 0 : index
    %c0_15 = arith.constant 0 : index
    %12 = vector.load %arg9[%c0_14, %c0_15] : memref<1x128xf32, #tpu.memory_space<vmem>>, vector<1x128xf32>
    %13 = vector.shape_cast %12 : vector<1x128xf32> to vector<128xf32>
    %c0_16 = arith.constant 0 : index
    %c0_17 = arith.constant 0 : index
    %14 = vector.load %arg6[%c0_16, %c0_17] : memref<128x128xbf16, #tpu.memory_space<vmem>>, vector<128x128xbf16>
    %15 = arith.truncf %3 : vector<16x128xf32> to vector<16x128xbf16>
    %c0_18 = arith.constant 0 : index
    %c0_19 = arith.constant 0 : index
    %16 = vector.load %arg4[%c0_18, %c0_19] : memref<128x384xbf16, #tpu.memory_space<vmem>>, vector<128x384xbf16>
    %cst = arith.constant dense<0.000000e+00> : vector<16x384xf32>
    %17 = tpu.matmul %15, %16, %cst {dimension_numbers = #tpu.dot_dimension_numbers<[1], [0], [0], [1], [0, 0, 1, 1], [], []>} : vector<16x128xbf16>, vector<128x384xbf16>, vector<16x384xf32> -> vector<16x384xf32>
    %18 = vector.shape_cast %7 : vector<384xf32> to vector<1x384xf32>
    %19 = vector.broadcast %18 : vector<1x384xf32> to vector<16x384xf32>
    %20 = arith.addf %17, %19 : vector<16x384xf32>
    %21 = vector.extract_strided_slice %20 {offsets = [0, 0], sizes = [16, 128], strides = [1, 1]} : vector<16x384xf32> to vector<16x128xf32>
    %22 = vector.extract_strided_slice %20 {offsets = [0, 128], sizes = [16, 128], strides = [1, 1]} : vector<16x384xf32> to vector<16x128xf32>
    %23 = vector.extract_strided_slice %20 {offsets = [0, 256], sizes = [16, 128], strides = [1, 1]} : vector<16x384xf32> to vector<16x128xf32>
    %24 = vector.shape_cast %21 : vector<16x128xf32> to vector<16x8x16xf32>
    %25 = tpu.transpose %24, [1, 0, 2] : vector<16x8x16xf32> -> vector<8x16x16xf32>
    %26 = vector.shape_cast %22 : vector<16x128xf32> to vector<16x8x16xf32>
    %27 = tpu.transpose %26, [1, 0, 2] : vector<16x8x16xf32> -> vector<8x16x16xf32>
    %28 = vector.shape_cast %23 : vector<16x128xf32> to vector<16x8x16xf32>
    %29 = tpu.transpose %28, [1, 0, 2] : vector<16x8x16xf32> -> vector<8x16x16xf32>
    %30 = arith.truncf %25 : vector<8x16x16xf32> to vector<8x16x16xbf16>
    %31 = arith.truncf %27 : vector<8x16x16xf32> to vector<8x16x16xbf16>
    "tpu.trace_start"() <{level = 10 : i32, message = "hqd,hkd->hqk"}> : () -> ()
    %cst_20 = arith.constant dense<0.000000e+00> : vector<8x16x16xf32>
    %32 = tpu.matmul %30, %31, %cst_20 {dimension_numbers = #tpu.dot_dimension_numbers<[2], [2], [1], [1], [0, 0, 0, 1, 1, 1], [0], [0]>} : vector<8x16x16xbf16>, vector<8x16x16xbf16>, vector<8x16x16xf32> -> vector<8x16x16xf32>
    "tpu.trace_stop"() : () -> ()
    %33 = vector.shape_cast %1 : vector<16x16xf32> to vector<1x16x16xf32>
    %34 = vector.broadcast %33 : vector<1x16x16xf32> to vector<8x16x16xf32>
    %35 = arith.addf %32, %34 : vector<8x16x16xf32>
    %cst_21 = arith.constant dense<0xFF800000> : vector<8x16xf32>
    %36 = vector.multi_reduction <maximumf>, %35, %cst_21 [2] : vector<8x16x16xf32> to vector<8x16xf32>
    %37 = vector.shape_cast %36 : vector<8x16xf32> to vector<8x16x1xf32>
    %38 = vector.broadcast %37 : vector<8x16x1xf32> to vector<8x16x16xf32>
    %39 = arith.subf %35, %38 : vector<8x16x16xf32>
    %40 = math.exp %39 : vector<8x16x16xf32>
    %cst_22 = arith.constant dense<0.000000e+00> : vector<8x16xf32>
    %41 = vector.multi_reduction <add>, %40, %cst_22 [2] : vector<8x16x16xf32> to vector<8x16xf32>
    %42 = vector.shape_cast %41 : vector<8x16xf32> to vector<8x16x1xf32>
    %43 = tpu.reciprocal %42 {approx = true} : vector<8x16x1xf32> -> vector<8x16x1xf32>
    %44 = vector.broadcast %43 : vector<8x16x1xf32> to vector<8x16x16xf32>
    %45 = arith.mulf %40, %44 : vector<8x16x16xf32>
    %46 = arith.truncf %45 : vector<8x16x16xf32> to vector<8x16x16xbf16>
    %47 = arith.truncf %29 : vector<8x16x16xf32> to vector<8x16x16xbf16>
    "tpu.trace_start"() <{level = 10 : i32, message = "hqk,hkd->hqd"}> : () -> ()
    %cst_23 = arith.constant dense<0.000000e+00> : vector<8x16x16xf32>
    %48 = tpu.matmul %46, %47, %cst_23 {dimension_numbers = #tpu.dot_dimension_numbers<[2], [1], [1], [2], [0, 0, 0, 1, 1, 2], [0], [0]>} : vector<8x16x16xbf16>, vector<8x16x16xbf16>, vector<8x16x16xf32> -> vector<8x16x16xf32>
    "tpu.trace_stop"() : () -> ()
    %49 = tpu.transpose %48, [1, 0, 2] : vector<8x16x16xf32> -> vector<16x8x16xf32>
    %50 = vector.shape_cast %49 : vector<16x8x16xf32> to vector<16x128xf32>
    %51 = arith.truncf %50 : vector<16x128xf32> to vector<16x128xbf16>
    %cst_24 = arith.constant dense<0.000000e+00> : vector<16x128xf32>
    %52 = tpu.matmul %51, %14, %cst_24 {dimension_numbers = #tpu.dot_dimension_numbers<[1], [0], [0], [1], [0, 0, 1, 1], [], []>} : vector<16x128xbf16>, vector<128x128xbf16>, vector<16x128xf32> -> vector<16x128xf32>
    %53 = vector.shape_cast %9 : vector<128xf32> to vector<1x128xf32>
    %54 = vector.broadcast %53 : vector<1x128xf32> to vector<16x128xf32>
    %55 = arith.addf %52, %54 : vector<16x128xf32>
    %56 = arith.addf %3, %55 : vector<16x128xf32>
    %cst_25 = arith.constant dense<0.000000e+00> : vector<16xf32>
    %57 = vector.multi_reduction <add>, %56, %cst_25 [1] : vector<16x128xf32> to vector<16xf32>
    %58 = vector.shape_cast %57 : vector<16xf32> to vector<16x1xf32>
    %cst_26 = arith.constant 1.280000e+02 : f32
    %59 = vector.broadcast %cst_26 : f32 to vector<16x1xf32>
    %60 = arith.divf %58, %59 : vector<16x1xf32>
    %61 = vector.broadcast %60 : vector<16x1xf32> to vector<16x128xf32>
    %62 = arith.subf %56, %61 : vector<16x128xf32>
    %63 = arith.mulf %62, %62 : vector<16x128xf32>
    %cst_27 = arith.constant dense<0.000000e+00> : vector<16xf32>
    %64 = vector.multi_reduction <add>, %63, %cst_27 [1] : vector<16x128xf32> to vector<16xf32>
    %65 = vector.shape_cast %64 : vector<16xf32> to vector<16x1xf32>
    %cst_28 = arith.constant 1.280000e+02 : f32
    %66 = vector.broadcast %cst_28 : f32 to vector<16x1xf32>
    %67 = arith.divf %65, %66 : vector<16x1xf32>
    %68 = vector.broadcast %60 : vector<16x1xf32> to vector<16x128xf32>
    %69 = arith.subf %56, %68 : vector<16x128xf32>
    %cst_29 = arith.constant 9.99999974E-6 : f32
    %70 = vector.broadcast %cst_29 : f32 to vector<16x1xf32>
    %71 = arith.addf %67, %70 : vector<16x1xf32>
    %72 = math.rsqrt %71 : vector<16x1xf32>
    %73 = vector.broadcast %72 : vector<16x1xf32> to vector<16x128xf32>
    %74 = arith.mulf %69, %73 : vector<16x128xf32>
    %75 = vector.shape_cast %11 : vector<128xf32> to vector<1x128xf32>
    %76 = vector.broadcast %75 : vector<1x128xf32> to vector<16x128xf32>
    %77 = arith.mulf %74, %76 : vector<16x128xf32>
    %78 = vector.shape_cast %13 : vector<128xf32> to vector<1x128xf32>
    %79 = vector.broadcast %78 : vector<1x128xf32> to vector<16x128xf32>
    %80 = arith.addf %77, %79 : vector<16x128xf32>
    %81 = arith.truncf %80 : vector<16x128xf32> to vector<16x128xbf16>
    %c0_30 = arith.constant 0 : index
    %c0_31 = arith.constant 0 : index
    %82 = vector.load %arg4[%c0_30, %c0_31] : memref<128x384xbf16, #tpu.memory_space<vmem>>, vector<128x128xbf16>
    %cst_32 = arith.constant dense<0.000000e+00> : vector<16x128xf32>
    %83 = tpu.matmul %81, %82, %cst_32 {dimension_numbers = #tpu.dot_dimension_numbers<[1], [0], [0], [1], [0, 0, 1, 1], [], []>} : vector<16x128xbf16>, vector<128x128xbf16>, vector<16x128xf32> -> vector<16x128xf32>
    %84 = vector.extract_strided_slice %7 {offsets = [0], sizes = [128], strides = [1]} : vector<384xf32> to vector<128xf32>
    %85 = vector.shape_cast %84 : vector<128xf32> to vector<1x128xf32>
    %86 = vector.broadcast %85 : vector<1x128xf32> to vector<16x128xf32>
    %87 = arith.addf %83, %86 : vector<16x128xf32>
    %88 = arith.truncf %5 : vector<16x128xf32> to vector<16x128xbf16>
    %c0_33 = arith.constant 0 : index
    %c128 = arith.constant 128 : index
    %89 = vector.load %arg4[%c0_33, %c128] : memref<128x384xbf16, #tpu.memory_space<vmem>>, vector<128x256xbf16>
    %cst_34 = arith.constant dense<0.000000e+00> : vector<16x256xf32>
    %90 = tpu.matmul %88, %89, %cst_34 {dimension_numbers = #tpu.dot_dimension_numbers<[1], [0], [0], [1], [0, 0, 1, 1], [], []>} : vector<16x128xbf16>, vector<128x256xbf16>, vector<16x256xf32> -> vector<16x256xf32>
    %91 = vector.extract_strided_slice %7 {offsets = [128], sizes = [256], strides = [1]} : vector<384xf32> to vector<256xf32>
    %92 = vector.shape_cast %91 : vector<256xf32> to vector<1x256xf32>
    %93 = vector.broadcast %92 : vector<1x256xf32> to vector<16x256xf32>
    %94 = arith.addf %90, %93 : vector<16x256xf32>
    %95 = vector.extract_strided_slice %94 {offsets = [0, 0], sizes = [16, 128], strides = [1, 1]} : vector<16x256xf32> to vector<16x128xf32>
    %96 = vector.extract_strided_slice %94 {offsets = [0, 128], sizes = [16, 128], strides = [1, 1]} : vector<16x256xf32> to vector<16x128xf32>
    %97 = vector.shape_cast %87 : vector<16x128xf32> to vector<16x8x16xf32>
    %98 = tpu.transpose %97, [1, 0, 2] : vector<16x8x16xf32> -> vector<8x16x16xf32>
    %99 = vector.shape_cast %95 : vector<16x128xf32> to vector<16x8x16xf32>
    %100 = tpu.transpose %99, [1, 0, 2] : vector<16x8x16xf32> -> vector<8x16x16xf32>
    %101 = vector.shape_cast %96 : vector<16x128xf32> to vector<16x8x16xf32>
    %102 = tpu.transpose %101, [1, 0, 2] : vector<16x8x16xf32> -> vector<8x16x16xf32>
    %103 = arith.truncf %98 : vector<8x16x16xf32> to vector<8x16x16xbf16>
    %104 = arith.truncf %100 : vector<8x16x16xf32> to vector<8x16x16xbf16>
    "tpu.trace_start"() <{level = 10 : i32, message = "hqd,hkd->hqk"}> : () -> ()
    %cst_35 = arith.constant dense<0.000000e+00> : vector<8x16x16xf32>
    %105 = tpu.matmul %103, %104, %cst_35 {dimension_numbers = #tpu.dot_dimension_numbers<[2], [2], [1], [1], [0, 0, 0, 1, 1, 1], [0], [0]>} : vector<8x16x16xbf16>, vector<8x16x16xbf16>, vector<8x16x16xf32> -> vector<8x16x16xf32>
    "tpu.trace_stop"() : () -> ()
    %cst_36 = arith.constant dense<0xFF800000> : vector<8x16xf32>
    %106 = vector.multi_reduction <maximumf>, %105, %cst_36 [2] : vector<8x16x16xf32> to vector<8x16xf32>
    %107 = vector.shape_cast %106 : vector<8x16xf32> to vector<8x16x1xf32>
    %108 = vector.broadcast %107 : vector<8x16x1xf32> to vector<8x16x16xf32>
    %109 = arith.subf %105, %108 : vector<8x16x16xf32>
    %110 = math.exp %109 : vector<8x16x16xf32>
    %cst_37 = arith.constant dense<0.000000e+00> : vector<8x16xf32>
    %111 = vector.multi_reduction <add>, %110, %cst_37 [2] : vector<8x16x16xf32> to vector<8x16xf32>
    %112 = vector.shape_cast %111 : vector<8x16xf32> to vector<8x16x1xf32>
    %113 = tpu.reciprocal %112 {approx = true} : vector<8x16x1xf32> -> vector<8x16x1xf32>
    %114 = vector.broadcast %113 : vector<8x16x1xf32> to vector<8x16x16xf32>
    %115 = arith.mulf %110, %114 : vector<8x16x16xf32>
    %116 = arith.truncf %115 : vector<8x16x16xf32> to vector<8x16x16xbf16>
    %117 = arith.truncf %102 : vector<8x16x16xf32> to vector<8x16x16xbf16>
    "tpu.trace_start"() <{level = 10 : i32, message = "hqk,hkd->hqd"}> : () -> ()
    %cst_38 = arith.constant dense<0.000000e+00> : vector<8x16x16xf32>
    %118 = tpu.matmul %116, %117, %cst_38 {dimension_numbers = #tpu.dot_dimension_numbers<[2], [1], [1], [2], [0, 0, 0, 1, 1, 2], [0], [0]>} : vector<8x16x16xbf16>, vector<8x16x16xbf16>, vector<8x16x16xf32> -> vector<8x16x16xf32>
    "tpu.trace_stop"() : () -> ()
    %119 = tpu.transpose %118, [1, 0, 2] : vector<8x16x16xf32> -> vector<16x8x16xf32>
    %120 = vector.shape_cast %119 : vector<16x8x16xf32> to vector<16x128xf32>
    %121 = arith.truncf %120 : vector<16x128xf32> to vector<16x128xbf16>
    %cst_39 = arith.constant dense<0.000000e+00> : vector<16x128xf32>
    %122 = tpu.matmul %121, %14, %cst_39 {dimension_numbers = #tpu.dot_dimension_numbers<[1], [0], [0], [1], [0, 0, 1, 1], [], []>} : vector<16x128xbf16>, vector<128x128xbf16>, vector<16x128xf32> -> vector<16x128xf32>
    %123 = vector.shape_cast %9 : vector<128xf32> to vector<1x128xf32>
    %124 = vector.broadcast %123 : vector<1x128xf32> to vector<16x128xf32>
    %125 = arith.addf %122, %124 : vector<16x128xf32>
    %126 = arith.addf %80, %125 : vector<16x128xf32>
    %cst_40 = arith.constant dense<0.000000e+00> : vector<16xf32>
    %127 = vector.multi_reduction <add>, %126, %cst_40 [1] : vector<16x128xf32> to vector<16xf32>
    %128 = vector.shape_cast %127 : vector<16xf32> to vector<16x1xf32>
    %cst_41 = arith.constant 1.280000e+02 : f32
    %129 = vector.broadcast %cst_41 : f32 to vector<16x1xf32>
    %130 = arith.divf %128, %129 : vector<16x1xf32>
    %131 = vector.broadcast %130 : vector<16x1xf32> to vector<16x128xf32>
    %132 = arith.subf %126, %131 : vector<16x128xf32>
    %133 = arith.mulf %132, %132 : vector<16x128xf32>
    %cst_42 = arith.constant dense<0.000000e+00> : vector<16xf32>
    %134 = vector.multi_reduction <add>, %133, %cst_42 [1] : vector<16x128xf32> to vector<16xf32>
    %135 = vector.shape_cast %134 : vector<16xf32> to vector<16x1xf32>
    %cst_43 = arith.constant 1.280000e+02 : f32
    %136 = vector.broadcast %cst_43 : f32 to vector<16x1xf32>
    %137 = arith.divf %135, %136 : vector<16x1xf32>
    %138 = vector.broadcast %130 : vector<16x1xf32> to vector<16x128xf32>
    %139 = arith.subf %126, %138 : vector<16x128xf32>
    %cst_44 = arith.constant 9.99999974E-6 : f32
    %140 = vector.broadcast %cst_44 : f32 to vector<16x1xf32>
    %141 = arith.addf %137, %140 : vector<16x1xf32>
    %142 = math.rsqrt %141 : vector<16x1xf32>
    %143 = vector.broadcast %142 : vector<16x1xf32> to vector<16x128xf32>
    %144 = arith.mulf %139, %143 : vector<16x128xf32>
    %145 = vector.shape_cast %11 : vector<128xf32> to vector<1x128xf32>
    %146 = vector.broadcast %145 : vector<1x128xf32> to vector<16x128xf32>
    %147 = arith.mulf %144, %146 : vector<16x128xf32>
    %148 = vector.shape_cast %13 : vector<128xf32> to vector<1x128xf32>
    %149 = vector.broadcast %148 : vector<1x128xf32> to vector<16x128xf32>
    %150 = arith.addf %147, %149 : vector<16x128xf32>
    %151 = arith.truncf %150 : vector<16x128xf32> to vector<16x128xbf16>
    %c0_45 = arith.constant 0 : index
    %c0_46 = arith.constant 0 : index
    %152 = vector.load %arg10[%c0_45, %c0_46] : memref<128x256xbf16, #tpu.memory_space<vmem>>, vector<128x256xbf16>
    %cst_47 = arith.constant dense<0.000000e+00> : vector<16x256xf32>
    %153 = tpu.matmul %151, %152, %cst_47 {dimension_numbers = #tpu.dot_dimension_numbers<[1], [0], [0], [1], [0, 0, 1, 1], [], []>} : vector<16x128xbf16>, vector<128x256xbf16>, vector<16x256xf32> -> vector<16x256xf32>
    %c0_48 = arith.constant 0 : index
    %c0_49 = arith.constant 0 : index
    %154 = vector.load %arg11[%c0_48, %c0_49] : memref<1x256xf32, #tpu.memory_space<vmem>>, vector<1x256xf32>
    %155 = vector.shape_cast %154 : vector<1x256xf32> to vector<256xf32>
    %156 = vector.shape_cast %155 : vector<256xf32> to vector<1x256xf32>
    %157 = vector.broadcast %156 : vector<1x256xf32> to vector<16x256xf32>
    %158 = arith.addf %153, %157 : vector<16x256xf32>
    %cst_50 = arith.constant 0.000000e+00 : f32
    %159 = vector.broadcast %cst_50 : f32 to vector<16x256xf32>
    %160 = arith.maximumf %158, %159 : vector<16x256xf32>
    %161 = arith.truncf %160 : vector<16x256xf32> to vector<16x256xbf16>
    %c0_51 = arith.constant 0 : index
    %c0_52 = arith.constant 0 : index
    %162 = vector.load %arg12[%c0_51, %c0_52] : memref<256x128xbf16, #tpu.memory_space<vmem>>, vector<256x128xbf16>
    %cst_53 = arith.constant dense<0.000000e+00> : vector<16x128xf32>
    %163 = tpu.matmul %161, %162, %cst_53 {dimension_numbers = #tpu.dot_dimension_numbers<[1], [0], [0], [1], [0, 0, 1, 1], [], []>} : vector<16x256xbf16>, vector<256x128xbf16>, vector<16x128xf32> -> vector<16x128xf32>
    %c0_54 = arith.constant 0 : index
    %c0_55 = arith.constant 0 : index
    %164 = vector.load %arg13[%c0_54, %c0_55] : memref<1x128xf32, #tpu.memory_space<vmem>>, vector<1x128xf32>
    %165 = vector.shape_cast %164 : vector<1x128xf32> to vector<128xf32>
    %166 = vector.shape_cast %165 : vector<128xf32> to vector<1x128xf32>
    %167 = vector.broadcast %166 : vector<1x128xf32> to vector<16x128xf32>
    %168 = arith.addf %163, %167 : vector<16x128xf32>
    %169 = arith.addf %150, %168 : vector<16x128xf32>
    %c0_56 = arith.constant 0 : index
    %c0_57 = arith.constant 0 : index
    %170 = vector.load %arg14[%c0_56, %c0_57] : memref<1x128xf32, #tpu.memory_space<vmem>>, vector<1x128xf32>
    %171 = vector.shape_cast %170 : vector<1x128xf32> to vector<128xf32>
    %c0_58 = arith.constant 0 : index
    %c0_59 = arith.constant 0 : index
    %172 = vector.load %arg15[%c0_58, %c0_59] : memref<1x128xf32, #tpu.memory_space<vmem>>, vector<1x128xf32>
    %173 = vector.shape_cast %172 : vector<1x128xf32> to vector<128xf32>
    %cst_60 = arith.constant dense<0.000000e+00> : vector<16xf32>
    %174 = vector.multi_reduction <add>, %169, %cst_60 [1] : vector<16x128xf32> to vector<16xf32>
    %175 = vector.shape_cast %174 : vector<16xf32> to vector<16x1xf32>
    %cst_61 = arith.constant 1.280000e+02 : f32
    %176 = vector.broadcast %cst_61 : f32 to vector<16x1xf32>
    %177 = arith.divf %175, %176 : vector<16x1xf32>
    %178 = vector.broadcast %177 : vector<16x1xf32> to vector<16x128xf32>
    %179 = arith.subf %169, %178 : vector<16x128xf32>
    %180 = arith.mulf %179, %179 : vector<16x128xf32>
    %cst_62 = arith.constant dense<0.000000e+00> : vector<16xf32>
    %181 = vector.multi_reduction <add>, %180, %cst_62 [1] : vector<16x128xf32> to vector<16xf32>
    %182 = vector.shape_cast %181 : vector<16xf32> to vector<16x1xf32>
    %cst_63 = arith.constant 1.280000e+02 : f32
    %183 = vector.broadcast %cst_63 : f32 to vector<16x1xf32>
    %184 = arith.divf %182, %183 : vector<16x1xf32>
    %185 = vector.broadcast %177 : vector<16x1xf32> to vector<16x128xf32>
    %186 = arith.subf %169, %185 : vector<16x128xf32>
    %cst_64 = arith.constant 9.99999974E-6 : f32
    %187 = vector.broadcast %cst_64 : f32 to vector<16x1xf32>
    %188 = arith.addf %184, %187 : vector<16x1xf32>
    %189 = math.rsqrt %188 : vector<16x1xf32>
    %190 = vector.broadcast %189 : vector<16x1xf32> to vector<16x128xf32>
    %191 = arith.mulf %186, %190 : vector<16x128xf32>
    %192 = vector.shape_cast %171 : vector<128xf32> to vector<1x128xf32>
    %193 = vector.broadcast %192 : vector<1x128xf32> to vector<16x128xf32>
    %194 = arith.mulf %191, %193 : vector<16x128xf32>
    %195 = vector.shape_cast %173 : vector<128xf32> to vector<1x128xf32>
    %196 = vector.broadcast %195 : vector<1x128xf32> to vector<16x128xf32>
    %197 = arith.addf %194, %196 : vector<16x128xf32>
    %c0_65 = arith.constant 0 : index
    %c0_66 = arith.constant 0 : index
    %c0_67 = arith.constant 0 : index
    %198 = vector.load %arg16[%c0_65, %c0_66, %c0_67] : memref<1x16x128xf32, #tpu.memory_space<vmem>>, vector<1x16x128xf32>
    %199 = vector.shape_cast %198 : vector<1x16x128xf32> to vector<16x128xf32>
    %200 = vector.shape_cast %197 : vector<16x128xf32> to vector<1x16x128xf32>
    tpu.vector_store %arg16[%c0_65, %c0_66, %c0_67], %200 {strides = array<i32>} : memref<1x16x128xf32, #tpu.memory_space<vmem>>, vector<1x16x128xf32>,
    return
  }
  func.func @transform_0(%arg0: i32) -> (i32, i32, i32) {
    %c0_i32 = arith.constant 0 : i32
    %c0_i32_0 = arith.constant 0 : i32
    %c0_i32_1 = arith.constant 0 : i32
    return %arg0, %c0_i32, %c0_i32_0 : i32, i32, i32
  }
  func.func @transform_1(%arg0: i32) -> (i32, i32, i32) {
    %c0_i32 = arith.constant 0 : i32
    %c0_i32_0 = arith.constant 0 : i32
    %c0_i32_1 = arith.constant 0 : i32
    return %arg0, %c0_i32, %c0_i32_0 : i32, i32, i32
  }
  func.func @transform_2(%arg0: i32) -> (i32, i32, i32) {
    %c0_i32 = arith.constant 0 : i32
    %c0_i32_0 = arith.constant 0 : i32
    %c0_i32_1 = arith.constant 0 : i32
    return %arg0, %c0_i32, %c0_i32_0 : i32, i32, i32
  }
  func.func @transform_3(%arg0: i32) -> (i32, i32) {
    %c0_i32 = arith.constant 0 : i32
    %c0_i32_0 = arith.constant 0 : i32
    %c0_i32_1 = arith.constant 0 : i32
    return %c0_i32, %c0_i32_0 : i32, i32
  }
  func.func @transform_4(%arg0: i32) -> (i32, i32) {
    %c0_i32 = arith.constant 0 : i32
    %c0_i32_0 = arith.constant 0 : i32
    %c0_i32_1 = arith.constant 0 : i32
    return %c0_i32, %c0_i32_0 : i32, i32
  }
  func.func @transform_5(%arg0: i32) -> (i32, i32) {
    %c0_i32 = arith.constant 0 : i32
    %c0_i32_0 = arith.constant 0 : i32
    %c0_i32_1 = arith.constant 0 : i32
    return %c0_i32, %c0_i32_0 : i32, i32
  }
  func.func @transform_6(%arg0: i32) -> (i32, i32) {
    %c0_i32 = arith.constant 0 : i32
    %c0_i32_0 = arith.constant 0 : i32
    %c0_i32_1 = arith.constant 0 : i32
    return %c0_i32, %c0_i32_0 : i32, i32
  }
  func.func @transform_7(%arg0: i32) -> (i32, i32) {
    %c0_i32 = arith.constant 0 : i32
    %c0_i32_0 = arith.constant 0 : i32
    %c0_i32_1 = arith.constant 0 : i32
    return %c0_i32, %c0_i32_0 : i32, i32
  }
  func.func @transform_8(%arg0: i32) -> (i32, i32) {
    %c0_i32 = arith.constant 0 : i32
    %c0_i32_0 = arith.constant 0 : i32
    %c0_i32_1 = arith.constant 0 : i32
    return %c0_i32, %c0_i32_0 : i32, i32
  }
  func.func @transform_9(%arg0: i32) -> (i32, i32) {
    %c0_i32 = arith.constant 0 : i32
    %c0_i32_0 = arith.constant 0 : i32
    %c0_i32_1 = arith.constant 0 : i32
    return %c0_i32, %c0_i32_0 : i32, i32
  }
  func.func @transform_10(%arg0: i32) -> (i32, i32) {
    %c0_i32 = arith.constant 0 : i32
    %c0_i32_0 = arith.constant 0 : i32
    %c0_i32_1 = arith.constant 0 : i32
    return %c0_i32, %c0_i32_0 : i32, i32
  }
  func.func @transform_11(%arg0: i32) -> (i32, i32) {
    %c0_i32 = arith.constant 0 : i32
    %c0_i32_0 = arith.constant 0 : i32
    %c0_i32_1 = arith.constant 0 : i32
    return %c0_i32, %c0_i32_0 : i32, i32
  }
  func.func @transform_12(%arg0: i32) -> (i32, i32) {
    %c0_i32 = arith.constant 0 : i32
    %c0_i32_0 = arith.constant 0 : i32
    %c0_i32_1 = arith.constant 0 : i32
    return %c0_i32, %c0_i32_0 : i32, i32
  }
  func.func @transform_13(%arg0: i32) -> (i32, i32) {
    %c0_i32 = arith.constant 0 : i32
    %c0_i32_0 = arith.constant 0 : i32
    %c0_i32_1 = arith.constant 0 : i32
    return %c0_i32, %c0_i32_0 : i32, i32
  }
  func.func @transform_14(%arg0: i32) -> (i32, i32) {
    %c0_i32 = arith.constant 0 : i32
    %c0_i32_0 = arith.constant 0 : i32
    %c0_i32_1 = arith.constant 0 : i32
    return %c0_i32, %c0_i32_0 : i32, i32
  }
  func.func @transform_15(%arg0: i32) -> (i32, i32, i32) {
    %c0_i32 = arith.constant 0 : i32
    %c0_i32_0 = arith.constant 0 : i32
    %c0_i32_1 = arith.constant 0 : i32
    return %arg0, %c0_i32, %c0_i32_0 : i32, i32, i32
  }
}

</mosaic_0001>

<bundles_post_ra>
// kernel: tpu_custom_call.1
= control target key start
LH: loop header
LB: loop body
LE: loop exit
PB: predicated region body
PF: predicated region fallthrough
CT: control target
= control target key end

     0   :  { %s12330_s0 = inlined_call_operand.hbm [shape: f32[2,16,16], index: 0, kind: input, shape index: {}]   ;;  %s12331_s1 = inlined_call_operand.hbm [shape: f32[2,16,128], index: 1, kind: input, shape index: {}]   ;;  %s12332_s2 = inlined_call_operand.hbm [shape: f32[2,16,128], index: 2, kind: input, shape index: {}]   ;;  %s12333_s3 = inlined_call_operand.hbm [shape: bf16[128,384], index: 3, kind: input, shape index: {}]   ;;  %s12334_s4 = inlined_call_operand.vmem [shape: f32[1,384], index: 4, kind: input, shape index: {}]   ;;  %s12335_s5 = inlined_call_operand.hbm [shape: bf16[128,128], index: 5, kind: input, shape index: {}]   ;;  %s12336_s6 = inlined_call_operand.vmem [shape: f32[1,128], index: 6, kind: input, shape index: {}]   ;;  %s12337_s7 = inlined_call_operand.vmem [shape: f32[1,128], index: 7, kind: input, shape index: {}]   ;;  %s12338_s8 = inlined_call_operand.vmem [shape: f32[1,128], index: 8, kind: input, shape index: {}]   ;;  %s12339_s9 = inlined_call_operand.hbm [shape: bf16[128,256], index: 9, kind: input, shape index: {}]   ;;  %s12340_s10 = inlined_call_operand.vmem [shape: f32[1,256], index: 10, kind: input, shape index: {}]   ;;  %s12341_s11 = inlined_call_operand.hbm [shape: bf16[256,128], index: 11, kind: input, shape index: {}]   ;;  %s12342_s12 = inlined_call_operand.vmem [shape: f32[1,128], index: 12, kind: input, shape index: {}]   ;;  %s12343_s13 = inlined_call_operand.vmem [shape: f32[1,128], index: 13, kind: input, shape index: {}]   ;;  %s12344_s14 = inlined_call_operand.vmem [shape: f32[1,128], index: 14, kind: input, shape index: {}]   ;;  %s12345_s15 = inlined_call_operand.hbm [shape: f32[2,16,128], index: 15, kind: output, shape index: {}]  }
   0x1   :  { %12377 = sst [smem:[#allocation27_spill]] %s12331_s1 }
   0x2   :  { %12378 = sst [smem:[#allocation28_spill]] %s12333_s3 }
   0x3   :  { %12379 = sst [smem:[#allocation29_spill]] %s12334_s4 }
   0x4   :  { %12380 = sst [smem:[#allocation30_spill]] %s12336_s6 }
   0x5   :  { %12381 = sst [smem:[#allocation31_spill]] %s12337_s7 }
   0x6   :  { %12382 = sst [smem:[#allocation32_spill]] %s12338_s8 }
   0x7   :  { %12383 = sst [smem:[#allocation33_spill]] %s12339_s9 }
   0x8   :  { %12384 = sst [smem:[#allocation34_spill]] %s12340_s10 }
   0x9   :  { %12385 = sst [smem:[#allocation35_spill]] %s12342_s12 }
   0xa   :  { %12386 = sst [smem:[#allocation36_spill]] %s12343_s13 }
   0xb   :  { %12387 = sst [smem:[#allocation37_spill]] %s12344_s14 }
   0xc   :  { %12388 = sst [smem:[#allocation38_spill]] %s12345_s15 }
   0xd   :  { %20 = vsyncpa [#allocation3], 0 }
   0xe   :  { %22 = vsyncpa [#allocation3 + $0x1], 0 }
   0xf   :  { %23 = vsyncpa [#allocation6], 0 }
  0x10   :  { %25 = vsyncpa [#allocation6 + $0x1], 0 }
  0x11   :  { %26 = vsyncpa [#allocation9], 0 }
  0x12   :  { %27 = vsyncpa [#allocation12], 0 }
  0x13   :  { %28 = vsyncpa [#allocation4], 0 }
  0x14   :  { %30 = vsyncpa [#allocation4 + $0x1], 0  ;;  %s10106_s18 = smov 0   ;;  %s10108_s19 = smov 0  }
  0x15   :  { %s10110_s20 = smov 0   ;;  %s10112_s21 = smov 0  }
  0x16 LB: > { %12389 = sst [smem:[#allocation20_spill]] %s9984_s18  ;;  %s10127_s22 = sadd.s32 4294967295, %s9996_s21   ;;  %s9996_s21 = sphi %s10112_s21, %s12438_s21   ;;  %s9992_s20 = sphi %s10110_s20, %s12442_s20   ;;  %s9988_s19 = sphi %s10108_s19, %s12441_s19   ;;  %s9984_s18 = sphi %s10106_s18, %s12440_s18  }
  0x17   : > { %12390 = sst [smem:[#allocation21_spill]] %s9996_s21  ;;  %s8581_s23 = sadd.s32 4294967294, %s9996_s21  }
  0x18   : > { %12391 = sst [smem:[#allocation22_spill]] %s10127_s22  ;;  %p56_p0 = scmp.ne.s32.totalorder %s9988_s19, %s9984_s18 }
  0x19   : > { %p12349_p1 = scmp.eq.s32.totalorder %s10127_s22, 0  ;;  %p390_p3 = scmp.eq.s32.totalorder %s8581_s23, 1 }
  0x1a   : > { %p8582_p5 = scmp.ge.s32.totalorder %s9996_s21, 1  ;;  %p397_p7 = scmp.lt.s32.totalorder %s9996_s21, 3 }
  0x1b   : > { %p10136_p4 = por %p12349_p1, %p56_p0  ;;  %p10141_p6 = por %p390_p3, %p56_p0 }
  0x1c   : > { %p10146_p8 = pnand %p8582_p5, %p397_p7  ;;  %s9998_s27 = smov [#allocation8]  }
  0x1d   : > { %s12392_s24 = scalar_select %p10136_p4, 1, 0 }
  0x1e   : > { %s12393_s25 = scalar_select %p10141_p6, 1, 0 }
  0x1f   : > { %s12395_s26 = scalar_select %p10146_p8, 1, 0 }
  0x20   : > { %12394 = sst [smem:[#allocation23_spill]] %s12393_s25  ;;  %s409_s28 = sshll.u32 %s9998_s27, 4  ;;  %s10150_s28 = int_to_ptr.vmem [resolvable:$true] %s409_s28 }
  0x21   : > { %p9287_p9 = pneg %p10146_p8  ;;  %s9999_s30 = smov [#allocation11]  }
  0x22   : > { %s447_s16 = sshll.u32 %s9999_s30, 4  ;;  %s12397_s3 = sld [smem:[#allocation28_spill]]  ;;  %s10161_s16 = int_to_ptr.vmem [resolvable:$true] %s447_s16 }
  0x23   : > { %p10157_p11 = pnand %p9287_p9, %p12349_p1 }
  0x25   : > { %s12396_s29 = scalar_select %p10157_p11, 1, 0 }
  0x26   : > { %p10171_p13 = pneg %p10157_p11 }
  0x28   : > { %s9716_s25 = scalar_lea.hbm %s12397_s3, 3072 }
  0x29   : > { %p9717_p12 = scmp.ne.s32.totalorder %s12397_s3, %s9716_s25  ;;  %p9723_p5 = scmp.lt.u32.totalorder %s9716_s25, %s12397_s3 }
  0x2a   : > { %s12398_s15 = scalar_select %p10171_p13, 1, 0 }
  0x2b   : > { %p9719_p0 = pnand %p10171_p13, %p9717_p12 }
  0x2d   : > { %p9720_p3 = pneg %p9719_p0 }
  0x2f   : > { %p9725_p7 = pnand %p9723_p5, %p9720_p3 }
  0x31   : > { %9728 = shalt.err (!%p9725_p7)
}
  0x32   : > { %s9729_s18 = scalar_lea.vmem %s10150_s28, 3072  ;;  %p9737_p2 = scmp.lt.s32.totalorder %s10150_s28, %s10150_s28 }
  0x33   : > { %p9730_p9 = scmp.ne.s32.totalorder %s10150_s28, %s9729_s18  ;;  %p9738_p6 = scmp.lt.s32.totalorder %s9729_s18, %s9729_s18 }
  0x35   : > { %p9732_p10 = pnand %p9730_p9, %p10171_p13  ;;  %p9739_p12 = por %p9738_p6, %p9737_p2 }
  0x37   : > { %p9733_p1 = pneg %p9732_p10 }
  0x39   : > { %p9740_p0 = pnand %p9739_p12, %p9733_p1 }
  0x3b   : > { %9743 = shalt.err (!%p9740_p0)
}
  0x3c   : > { %s10000_s17 = smov 192   ;;  %s10001_s14 = smov 12  }
  0x3d   : > { %9290 = dma.hbm_to_vmem [thread:$0]  (!%p10157_p11), %s12397_s3, 3072, %s10150_s28, [#allocation9], %s10000_s17, %s10000_s17, %s10001_s14  }
  0x3e   : > { %s12399_s9 = sld [smem:[#allocation33_spill]] }
  0x44   : > { %s9744_s13 = scalar_lea.hbm %s12399_s9, 2048 }
  0x45   : > { %p9745_p2 = scmp.ne.s32.totalorder %s12399_s9, %s9744_s13  ;;  %p9751_p10 = scmp.lt.u32.totalorder %s9744_s13, %s12399_s9 }
  0x47   : > { %p9747_p1 = pnand %p9745_p2, %p10171_p13 }
  0x49   : > { %p9748_p6 = pneg %p9747_p1 }
  0x4b   : > { %p9753_p3 = pnand %p9751_p10, %p9748_p6 }
  0x4d   : > { %9756 = shalt.err (!%p9753_p3)
}
  0x4e   : > { %s9757_s28 = scalar_lea.vmem %s10161_s16, 2048  ;;  %p9765_p12 = scmp.lt.s32.totalorder %s10161_s16, %s10161_s16 }
  0x4f   : > { %p9758_p5 = scmp.ne.s32.totalorder %s10161_s16, %s9757_s28  ;;  %p9766_p0 = scmp.lt.s32.totalorder %s9757_s28, %s9757_s28 }
  0x51   : > { %p9760_p7 = pnand %p9758_p5, %p10171_p13  ;;  %p9767_p2 = por %p9766_p0, %p9765_p12 }
  0x53   : > { %p9761_p9 = pneg %p9760_p7 }
  0x55   : > { %p9768_p1 = pnand %p9767_p2, %p9761_p9 }
  0x57   : > { %9771 = shalt.err (!%p9768_p1)
}
  0x58   : > { %s12352_s10 = smov 128   ;;  %s12354_s8 = smov 8  }
  0x59   : > { %9296 = dma.hbm_to_vmem [thread:$0]  (!%p10157_p11), %s12399_s9, 2048, %s10161_s16, [#allocation12], %s12352_s10, %s12352_s10, %s12354_s8  }
  0x5a   : > { %s10219_s17 = sadd.s32 1, %s9996_s21   ;;  %s43_s25 = sadd.s32 1, %s9992_s20 }
  0x5b   : > { %12400 = sst [smem:[#allocation24_spill]] %s10219_s17  ;;  %s40_s14 = ssub.s32 %s9996_s21, %s10219_s17 }
  0x5c   : > { %p41_p6 = scmp.eq.s32.totalorder %s40_s14, 0  ;;  %p50_p10 = scmp.ne.s32.totalorder %s9992_s20, %s9988_s19 }
  0x5d   : > { %p51_p3 = scmp.eq.s32.totalorder %s9996_s21, 0  ;;  %p12402_p7 = scmp.eq.s32.totalorder %s10127_s22, 1 }
  0x5e   : > { %s10228_s23 = scalar_select %p41_p6, %s9992_s20, %s43_s25  }
  0x5f   : > { %p52_p5 = por %p51_p3, %p50_p10  ;;  %p10232_p9 = por %p12402_p7, %p50_p10 }
  0x60   : > { %12401 = sst [smem:[#allocation25_spill]] %s10228_s23  ;;  %p9318_p12 = scmp.lt.s32.totalorder %s9996_s21, 2 }
  0x61   : > { %s12403_s27 = scalar_select %p10232_p9, 1, 0 }
  0x62   : > { %s12351_s30 = sand.u32 1, %s9992_s20   ;;  %s10243_s18 = sshll.u32 %s9996_s21, 8 }
  0x63   : > { %12404 = sst [smem:[#allocation26_spill]] %s12403_s27  ;;  %s10240_s16 = sshll.u32 %s12351_s30, 4 }
  0x64   : > { %p10245_p0 = pnand %p9318_p12, %p52_p5  ;;  %s507_s12 = sand.u32 1, %s9996_s21  }
  0x65   : > { %s12406_s1 = sld [smem:[#allocation27_spill]]  ;;  %s511_s30 = scalar_lea.vmem [#allocation5], %s10240_s16 }
  0x66   : > { %s12405_s28 = scalar_select %p10245_p0, 1, 0 }
  0x67   : > { %s518_s10 = sshll.u32 %s511_s30, 4  ;;  %s10004_s8 = smov [#allocation10]   ;;  %s10257_s10 = int_to_ptr.vmem [resolvable:$true] %s518_s10 }
  0x68   : > { %s10259_s3 = sshll.u32 %s10004_s8, 4  ;;  %s10261_s9 = scalar_lea.sflag [#allocation6], %s507_s12  ;;  %s426_s3 = int_to_ptr.vmem [resolvable:$true] %s10259_s3 }
  0x69   : > { %p10267_p1 = pneg %p10245_p0 }
  0x6b   : > { %s10254_s25 = scalar_lea.hbm %s12406_s1, %s10243_s18  ;;  %s9777_s17 = scalar_lea.hbm %s12406_s1, 512 }
  0x6c   : > { %s9772_s23 = scalar_lea.hbm %s10254_s25, 256  ;;  %p9778_p3 = scmp.lt.u32.totalorder %s10254_s25, %s12406_s1 }
  0x6d   : > { %p9773_p2 = scmp.ne.s32.totalorder %s10254_s25, %s9772_s23  ;;  %p9779_p5 = scmp.lt.u32.totalorder %s9777_s17, %s9772_s23 }
  0x6e   : > { %s12407_s13 = scalar_select %p10267_p1, 1, 0 }
  0x6f   : > { %p9775_p6 = pnand %p10267_p1, %p9773_p2  ;;  %p9780_p7 = por %p9779_p5, %p9778_p3 }
  0x70   : > { %p9781_p12 = scmp.lt.u32.totalorder %s9772_s23, %s10254_s25 }
  0x71   : > { %p9776_p10 = pneg %p9775_p6 }
  0x72   : > { %p9782_p9 = por %p9781_p12, %p9780_p7 }
  0x74   : > { %p9783_p4 = pnand %p9782_p9, %p9776_p10 }
  0x76   : > { %9786 = shalt.err (!%p9783_p4)
}
  0x77   : > { %s9787_s12 = scalar_lea.vmem %s10257_s10, 256  ;;  %s10005_s14 = smov [#allocation5]  }
  0x78   : > { %p9788_p2 = scmp.ne.s32.totalorder %s10257_s10, %s9787_s12  ;;  %s9792_s30 = sshll.u32 %s10005_s14, 4  ;;  %s9793_s30 = int_to_ptr.vmem [resolvable:$false] %s9792_s30 }
  0x79   : > { %s9794_s21 = scalar_lea.vmem %s9793_s30, 512  ;;  %p9795_p11 = scmp.lt.s32.totalorder %s10257_s10, %s9793_s30 }
  0x7a   : > { %p9790_p6 = pnand %p9788_p2, %p10267_p1  ;;  %p9796_p13 = scmp.lt.s32.totalorder %s9794_s21, %s9787_s12 }
  0x7c   : > { %p9791_p8 = pneg %p9790_p6  ;;  %p9797_p3 = por %p9796_p13, %p9795_p11 }
  0x7e   : > { %p9798_p5 = pnand %p9797_p3, %p9791_p8 }
  0x80   : > { %9801 = shalt.err (!%p9798_p5)
}
  0x81   : > { %s12408_s17 = smov 8   ;;  %s12409_s23 = smov 128  }
  0x82   : > { %9306 = dma.hbm_to_vmem [thread:$0]  (!%p10245_p0), %s10254_s25, 256, %s10257_s10, %s10261_s9, %s12409_s23, %s12409_s23, %s12408_s17  }
  0x83   : > { %s9802_s30 = scalar_lea.hbm %s12335_s5, 1024  ;;  %p12410_p8 = scmp.ne.s32.totalorder %s12398_s15, 0 }
  0x84   : > { %p9803_p4 = scmp.ne.s32.totalorder %s12335_s5, %s9802_s30  ;;  %p9809_p9 = scmp.lt.u32.totalorder %s9802_s30, %s12335_s5 }
  0x86   : > { %p9805_p11 = pnand %p9803_p4, %p12410_p8 }
  0x88   : > { %p9806_p13 = pneg %p9805_p11 }
  0x8a   : > { %p9811_p10 = pnand %p9809_p9, %p9806_p13 }
  0x8c   : > { %9814 = shalt.err (!%p9811_p10)
}
  0x8d   : > { %s9815_s7 = scalar_lea.vmem %s426_s3, 1024  ;;  %p9823_p6 = scmp.lt.s32.totalorder %s426_s3, %s426_s3 }
  0x8e   : > { %p9816_p7 = scmp.ne.s32.totalorder %s426_s3, %s9815_s7  ;;  %p9824_p3 = scmp.lt.s32.totalorder %s9815_s7, %s9815_s7 }
  0x90   : > { %p9818_p12 = pnand %p9816_p7, %p12410_p8  ;;  %p9825_p5 = por %p9824_p3, %p9823_p6 }
  0x92   : > { %p9819_p2 = pneg %p9818_p12 }
  0x94   : > { %p9826_p0 = pnand %p9825_p5, %p9819_p2 }
  0x96   : > { %9829 = shalt.err (!%p9826_p0)
}
  0x97   : > { %s10006_s10 = smov 64   ;;  %s10007_s25 = smov 4  }
  0x98   : > { %p12411_p4 = scmp.ne.s32.totalorder %s12396_s29, 0  ;;  %s10008_s8 = smov [#allocation13]  }
  0x99   : > { %s463_s14 = sshll.u32 %s10008_s8, 4  ;;  %s9830_s21 = scalar_lea.hbm %s12341_s11, 2048  ;;  %s464_s14 = int_to_ptr.vmem [resolvable:$true] %s463_s14 }
  0x9a   : > { %9293 = dma.hbm_to_vmem [thread:$0]  (!%p12411_p4), %s12335_s5, 1024, %s426_s3, [#allocation9], %s10006_s10, %s10006_s10, %s10007_s25  }
  0x9b   : > { %p9831_p0 = scmp.ne.s32.totalorder %s12341_s11, %s9830_s21  ;;  %p9837_p9 = scmp.lt.u32.totalorder %s9830_s21, %s12341_s11 }
  0x9d   : > { %p9833_p11 = pnand %p9831_p0, %p12410_p8 }
  0x9f   : > { %p9834_p13 = pneg %p9833_p11 }
  0xa1   : > { %p9839_p10 = pnand %p9837_p9, %p9834_p13 }
  0xa3   : > { %9842 = shalt.err (!%p9839_p10)
}
  0xa4   : > { %s9843_s3 = scalar_lea.vmem %s464_s14, 2048  ;;  %p9851_p6 = scmp.lt.s32.totalorder %s464_s14, %s464_s14 }
  0xa5   : > { %p9844_p7 = scmp.ne.s32.totalorder %s464_s14, %s9843_s3  ;;  %p9852_p3 = scmp.lt.s32.totalorder %s9843_s3, %s9843_s3 }
  0xa7   : > { %p9846_p12 = pnand %p9844_p7, %p12410_p8  ;;  %p9853_p5 = por %p9852_p3, %p9851_p6 }
  0xa9   : > { %p9847_p2 = pneg %p9846_p12 }
  0xab   : > { %p9854_p1 = pnand %p9853_p5, %p9847_p2 }
  0xad   : > { %9857 = shalt.err (!%p9854_p1)
}
  0xae   : > { %9299 = dma.hbm_to_vmem [thread:$0]  (!%p12411_p4), %s12341_s11, 2048, %s464_s14, [#allocation12], %s10006_s10, %s10006_s10, %s10007_s25  }
  0xaf   : > { %s10335_s15 = scalar_lea.hbm %s12330_s0, %s10243_s18  ;;  %s490_s27 = scalar_lea.vmem [#allocation2], %s10240_s16 }
  0xb0   : > { %s497_s8 = sshll.u32 %s490_s27, 4  ;;  %s12412_s29 = sand.u32 1, %s9992_s20   ;;  %s10338_s8 = int_to_ptr.vmem [resolvable:$true] %s497_s8 }
  0xb1   : > { %s10342_s30 = scalar_lea.sflag [#allocation3], %s12412_s29  ;;  %s9858_s12 = scalar_lea.hbm %s10335_s15, 256 }
  0xb2   : > { %p9859_p1 = scmp.ne.s32.totalorder %s10335_s15, %s9858_s12  ;;  %p12413_p8 = scmp.ne.s32.totalorder %s12407_s13, 0 }
  0xb3   : > { %s9863_s14 = scalar_lea.hbm %s12330_s0, 512  ;;  %p9864_p11 = scmp.lt.u32.totalorder %s10335_s15, %s12330_s0 }
  0xb4   : > { %p9861_p4 = pnand %p9859_p1, %p12413_p8  ;;  %p9865_p13 = scmp.lt.u32.totalorder %s9863_s14, %s9858_s12 }
  0xb5   : > { %p9867_p10 = scmp.lt.u32.totalorder %s9858_s12, %s10335_s15 }
  0xb6   : > { %p9862_p0 = pneg %p9861_p4  ;;  %p9866_p9 = por %p9865_p13, %p9864_p11 }
  0xb8   : > { %p9868_p7 = por %p9867_p10, %p9866_p9 }
  0xba   : > { %p9869_p12 = pnand %p9868_p7, %p9862_p0 }
  0xbc   : > { %9872 = shalt.err (!%p9869_p12)
}
  0xbd   : > { %s9873_s3 = scalar_lea.vmem %s10338_s8, 256  ;;  %s10009_s6 = smov [#allocation2]  }
  0xbe   : > { %p9874_p2 = scmp.ne.s32.totalorder %s10338_s8, %s9873_s3  ;;  %s9878_s1 = sshll.u32 %s10009_s6, 4  ;;  %s9879_s1 = int_to_ptr.vmem [resolvable:$false] %s9878_s1 }
  0xbf   : > { %s9880_s4 = scalar_lea.vmem %s9879_s1, 512  ;;  %p9881_p5 = scmp.lt.s32.totalorder %s10338_s8, %s9879_s1 }
  0xc0   : > { %p9876_p6 = pnand %p9874_p2, %p12413_p8  ;;  %p9882_p1 = scmp.lt.s32.totalorder %s9880_s4, %s9873_s3 }
  0xc2   : > { %p9877_p3 = pneg %p9876_p6  ;;  %p9883_p4 = por %p9882_p1, %p9881_p5 }
  0xc4   : > { %p9884_p11 = pnand %p9883_p4, %p9877_p3 }
  0xc6   : > { %9887 = shalt.err (!%p9884_p11)
}
  0xc7   : > { %p12414_p0 = scmp.ne.s32.totalorder %s12405_s28, 0  ;;  %s10373_s29 = scalar_lea.hbm %s12332_s2, %s10243_s18 }
  0xc8   : > { %s532_s12 = scalar_lea.vmem [#allocation7], %s10240_s16  ;;  %s9888_s25 = scalar_lea.hbm %s10373_s29, 256 }
  0xc9   : > { %9303 = dma.hbm_to_vmem [thread:$0]  (!%p12414_p0), %s10335_s15, 256, %s10338_s8, %s10342_s30, %s12409_s23, %s12409_s23, %s12408_s17  }
  0xca   : > { %s539_s10 = sshll.u32 %s532_s12, 4  ;;  %p9889_p13 = scmp.ne.s32.totalorder %s10373_s29, %s9888_s25  ;;  %s10376_s10 = int_to_ptr.vmem [resolvable:$true] %s539_s10 }
  0xcb   : > { %s9893_s8 = scalar_lea.hbm %s12332_s2, 512  ;;  %p9894_p7 = scmp.lt.u32.totalorder %s10373_s29, %s12332_s2 }
  0xcc   : > { %p9891_p9 = pnand %p9889_p13, %p12413_p8  ;;  %p9895_p12 = scmp.lt.u32.totalorder %s9893_s8, %s9888_s25 }
  0xcd   : > { %p9897_p6 = scmp.lt.u32.totalorder %s9888_s25, %s10373_s29 }
  0xce   : > { %p9892_p10 = pneg %p9891_p9  ;;  %p9896_p2 = por %p9895_p12, %p9894_p7 }
  0xd0   : > { %p9898_p3 = por %p9897_p6, %p9896_p2 }
  0xd2   : > { %p9899_p5 = pnand %p9898_p3, %p9892_p10 }
  0xd4   : > { %9902 = shalt.err (!%p9899_p5)
}
  0xd5   : > { %s9903_s16 = scalar_lea.vmem %s10376_s10, 256  ;;  %s10010_s21 = smov [#allocation7]  }
  0xd6   : > { %p9904_p1 = scmp.ne.s32.totalorder %s10376_s10, %s9903_s16  ;;  %s9908_s7 = sshll.u32 %s10010_s21, 4  ;;  %s9909_s7 = int_to_ptr.vmem [resolvable:$false] %s9908_s7 }
  0xd7   : > { %s9910_s3 = scalar_lea.vmem %s9909_s7, 512  ;;  %p9911_p13 = scmp.lt.s32.totalorder %s10376_s10, %s9909_s7 }
  0xd8   : > { %p9906_p4 = pnand %p9904_p1, %p12413_p8  ;;  %p9912_p9 = scmp.lt.s32.totalorder %s9910_s3, %s9903_s16 }
  0xda   : > { %p9907_p11 = pneg %p9906_p4  ;;  %p9913_p7 = por %p9912_p9, %p9911_p13 }
  0xdc   : > { %p9914_p12 = pnand %p9913_p7, %p9907_p11 }
  0xde   : > { %9917 = shalt.err (!%p9914_p12)
}
  0xdf   : > { %9309 = dma.hbm_to_vmem [thread:$0]  (!%p12414_p0), %s10373_s29, 256, %s10376_s10, %s10261_s9, %s12409_s23, %s12409_s23, %s12408_s17  }
  0xe0   : > { %p12415_p8 = scmp.ne.s32.totalorder %s12395_s26, 0 }
  0xe1   : > { %s10406_s13 = sand.u32 (!%p12415_p8), 1, %s9988_s19   ;;  %p12416_p10 = scmp.ne.s32.totalorder (!%p12415_p8), %s12392_s24, 0 }
  0xe2   : > { %551 = sbr.rel (%p12415_p8) target bundleno = 4882 (0x1312), region = 80  ;;  %s10409_s6 = sshll.u32 (!%p12415_p8), %s10406_s13, 4 }
  0xe3   : > { %s554_s28 = scalar_lea.sflag (!%p12415_p8), [#allocation3], %s10406_s13  ;;  %s557_s1 = scalar_lea.vmem (!%p12415_p8), [#allocation2], %s10409_s6 }
  0xe9   : > { %9963 = dma.done.wait (%p12416_p10), %s554_s28, 256  }
  0xea   : > { %9965 = vsyncadd (%p12416_p10), %s554_s28, 4294967040  ;;  %s12417_s9 = sld [smem:[#allocation22_spill]]  ;;  %s10419_s23 = scalar_lea.vmem [#allocation5], %s10409_s6 }
  0xf0   : > { %s562_s26 = sand.u32 1, %s12417_s9  }
  0xf1   : > { %s563_s17 = scalar_lea.sflag [#allocation6], %s562_s26 }
  0xf2   : > { %9967 = dma.done.wait (%p12416_p10), %s563_s17, 512  }
  0xf3   : > { %9969 = vsyncadd (%p12416_p10), %s563_s17, 4294966784  ;;  %s575_s4 = scalar_lea.vmem [#allocation7], %s10409_s6  ;;  %p12418_p0 = scmp.eq.s32.totalorder %s12417_s9, 0 }
  0xf5   : > { %9971 = dma.done.wait (%p12418_p0), [#allocation9], 4096   ;;  %p12419_p2 = pmov %p12418_p0 }
  0xf6   : > { %p12420_p6 = pmov %p12418_p0 }
  0xf7   : > { %9973 = vsyncadd (%p12419_p2), [#allocation9], 4294963200 }
  0xf8   : > { %9975 = dma.done.wait (%p12420_p6), [#allocation12], 4096   ;;  %p12421_p3 = pmov %p12418_p0 }
  0xf9   : > { %v10011_v0 = vmov 0   ;;  %v10012_v1 = vmov 0.0   ;;  %v9450_v2 = vld [vmem:[#allocation8 + $0x4] ss:$12 sps:$4 sm:$0xff]   ;;  %v9452_v3 = vld [vmem:[#allocation8] ss:$12 sps:$4 sm:$0xff]   ;;  %v709_v29 = vlaneseq }
  0xfa   : > { %9977 = vsyncadd (%p12421_p3), [#allocation12], 4294963200  ;;  %884 = vmatprep.mubr.bf16.mxu0 %v10011_v0  ;;  %8991 = vmatprep.subr.bf16.mxu1 %v10012_v1  ;;  %v9453_v4 = vld [vmem:[#allocation8 + $0x1c] ss:$12 sps:$4 sm:$0xff]   ;;  %v9455_v5 = vld [vmem:[#allocation8 + $0x18] ss:$12 sps:$4 sm:$0xff]  }
  0xfb   : > { %852 = vmatprep.subr.bf16.mxu0 %v9450_v2  ;;  %v9456_v6 = vld [vmem:[#allocation8 + $0x34] ss:$12 sps:$4 sm:$0xff]   ;;  %v9458_v7 = vld [vmem:[#allocation8 + $0x30] ss:$12 sps:$4 sm:$0xff]   ;;  %v9459_v8 = vld [vmem:[#allocation8 + $0x4c] ss:$12 sps:$4 sm:$0xff]  }
  0xfc   : > { %853 = vmatpush1.bf16.msra.mxu0 %v9452_v3  ;;  %v9461_v9 = vld [vmem:[#allocation8 + $0x48] ss:$12 sps:$4 sm:$0xff]   ;;  %v9462_v10 = vld [vmem:[#allocation8 + $0x64] ss:$12 sps:$4 sm:$0xff]   ;;  %v9475_v12 = vld [vmem:[#allocation8 + $0x20] ss:$12 sps:$4 sm:$0xff]  }
  0xfd   : > { %854 = vmatprep.subr.bf16.mxu0 %v9453_v4  ;;  %v9474_v11 = vld [vmem:[#allocation8 + $0x8] ss:$12 sps:$4 sm:$0xff]   ;;  %v9464_v13 = vld [vmem:[#allocation8 + $0x60] ss:$12 sps:$4 sm:$0xff]   ;;  %v9476_v15 = vld [vmem:[#allocation8 + $0x38] ss:$12 sps:$4 sm:$0xff]  }
  0xfe   : > { %8992 = vmatpush3.bf16.msra.mxu1 %v9474_v11  ;;  %v9465_v14 = vld [vmem:[#allocation8 + $0x7c] ss:$12 sps:$4 sm:$0xff]   ;;  %v9467_v16 = vld [vmem:[#allocation8 + $0x78] ss:$12 sps:$4 sm:$0xff]   ;;  %v9468_v17 = vld [vmem:[#allocation8 + $0x94] ss:$12 sps:$4 sm:$0xff]  }
  0xff   : > { %8993 = vmatprep.subr.bf16.mxu1 %v10012_v1  ;;  %v9477_v18 = vld [vmem:[#allocation8 + $0x50] ss:$12 sps:$4 sm:$0xff]   ;;  %v9471_v20 = vld [vmem:[#allocation8 + $0xac] ss:$12 sps:$4 sm:$0xff]   ;;  %v9478_v21 = vld [vmem:[#allocation8 + $0x68] ss:$12 sps:$4 sm:$0xff]  }
 0x100   : > { %855 = vmatpush1.bf16.msra.mxu0 %v9455_v5  ;;  %v9470_v19 = vld [vmem:[#allocation8 + $0x90] ss:$12 sps:$4 sm:$0xff]   ;;  %v9473_v22 = vld [vmem:[#allocation8 + $0xa8] ss:$12 sps:$4 sm:$0xff]   ;;  %v9479_v26 = vld [vmem:[#allocation8 + $0x80] ss:$12 sps:$4 sm:$0xff]  }
 0x101   : > { %856 = vmatprep.subr.bf16.mxu0 %v9456_v6  ;;  %v651_v23 = vld [vmem:[%s10419_s23] sm:$0xff]  ;;  %v652_v24 = vld [vmem:[%s10419_s23 + $0x8] sm:$0xff]  ;;  %vm10013_vm0 = vmmov 0   ;;  %v10453_v30 = vshrl.u32 %v709_v29, 7  ;;  %s12422_s27 = sld [smem:[#allocation29_spill]]  ;;  %s10014_s29 = smov 112  }
 0x102   : > { %8994 = vmatpush3.bf16.msra.mxu1 %v9475_v12  ;;  %v675_v25 = vpack.c.bf16 %v652_v24, %v651_v23  ;;  %v9480_v27 = vld [vmem:[#allocation8 + $0x98] ss:$12 sps:$4 sm:$0xff]   ;;  %v9481_v28 = vld [vmem:[#allocation8 + $0xb0] ss:$12 sps:$4 sm:$0xff]   ;;  %9007 = vmatprep.mubr.msk.bf16.mxu1 %vm10013_vm0, %v10012_v1  ;;  %s10015_s12 = smov 96   ;;  %s10016_s10 = smov 80  }
 0x103   : > { %8995 = vmatprep.subr.bf16.mxu1 %v10012_v1  ;;  %v10456_v31 = vsub.s32 0, %v10453_v30  ;;  %v10462_v33 = vsub.s32 1, %v10453_v30  ;;  %s10017_s25 = smov 64   ;;  %s10018_s14 = smov 48   ;;  %v719_v44 = vsub.s32 2, %v10453_v30  ;;  %vm2716_vm1 = vcmask 130048  }
 0x104   : > { %857 = vmatpush1.bf16.msra.mxu0 %v9458_v7  ;;  %s10019_s15 = smov 32   ;;  %s10020_s8 = smov 16   ;;  %v10021_v52 = vmov 1983009808   ;;  %v10022_v57 = vmov 1934713408  }
 0x105   : > { %858 = vmatprep.subr.bf16.mxu0 %v9459_v8  ;;  %v983_v53 = vunpack.c.l.s4 %v10021_v52  ;;  %v1047_v58 = vunpack.c.l.s4 %v10022_v57  ;;  %vm4239_vm2 = vcmask 261120   ;;  %vm4242_vm3 = vcmask 392192   ;;  %s12423_s16 = sld [smem:[#allocation30_spill]]  ;;  %s12427_s18 = sld [smem:[#allocation35_spill]] }
 0x106   : > { %8996 = vmatpush3.bf16.msra.mxu1 %v9476_v15  ;;  %vm4245_vm4 = vcmask 523264   ;;  %vm4248_vm5 = vcmask 654336   ;;  %vm4251_vm6 = vcmask 785408   ;;  %vm4254_vm7 = vcmask 916480   ;;  %s12428_s3 = sld [smem:[#allocation36_spill]]  ;;  %s12429_s17 = sld [smem:[#allocation37_spill]] }
 0x107   : > { %8997 = vmatprep.subr.bf16.mxu1 %v10012_v1  ;;  %v655_v32 = vld [vmem:[%s12422_s27] sm:$0x7]  ;;  %v984_v56 = vunpack.c.0.s8 %v983_v53  ;;  %v1048_v2 = vunpack.c.0.s8 %v1047_v58  ;;  %s8868_s24 = sshll.u32 %s12417_s9, 8  ;;  %s647_s22 = scalar_lea.vmem [#allocation14], %s10409_s6 }
 0x108   : > { %859 = vmatpush1.bf16.msra.mxu0 %v9461_v9  ;;  %v10465_v34 = vrot.slane %v655_v32, %v10456_v31  ;;  %v716_v35 = vrot.slane %v655_v32, %v10462_v33  ;;  %v720_v45 = vrot.slane %v655_v32, %v719_v44  ;;  %s10023_s6 = smov [#allocation14]  }
 0x109   : > { %860 = vmatprep.subr.bf16.mxu0 %v9462_v10  ;;  %v10564_v61 = vsub.s32 %v984_v56, %v10453_v30  ;;  %v10573_v11 = vsub.s32 %v1048_v2, %v10453_v30  ;;  %s9922_s9 = sshll.u32 %s10023_s6, 4  ;;  %s9923_s9 = int_to_ptr.vmem [resolvable:$false] %s9922_s9 }
 0x10a   : > { %8998 = vmatpush3.bf16.msra.mxu1 %v9477_v18  ;;  %s9924_s30 = scalar_lea.vmem %s9923_s9, 512 }
 0x10b   : > { %8999 = vmatprep.subr.bf16.mxu1 %v10012_v1 }
 0x10c   : > { %861 = vmatpush1.bf16.msra.mxu0 %v9464_v13 }
 0x10d   : > { %862 = vmatprep.subr.bf16.mxu0 %v9465_v14 }
 0x10e   : > { %9000 = vmatpush3.bf16.msra.mxu1 %v9478_v21 }
 0x10f   : > { %9001 = vmatprep.subr.bf16.mxu1 %v10012_v1 }
 0x110   : > { %863 = vmatpush1.bf16.msra.mxu0 %v9467_v16 }
 0x111   : > { %864 = vmatprep.subr.bf16.mxu0 %v9468_v17 }
 0x112   : > { %9002 = vmatpush3.bf16.msra.mxu1 %v9479_v26 }
 0x113   : > { %9003 = vmatprep.subr.bf16.mxu1 %v10012_v1 }
 0x114   : > { %865 = vmatpush1.bf16.msra.mxu0 %v9470_v19 }
 0x115   : > { %866 = vmatprep.subr.bf16.mxu0 %v9471_v20 }
 0x116   : > { %9004 = vmatpush3.bf16.msra.mxu1 %v9480_v27 }
 0x117   : > { %9005 = vmatprep.subr.bf16.mxu1 %v10012_v1 }
 0x118   : > { %867 = vmatpush1.bf16.msra.mxu0 %v9473_v22 }
 0x119   : > { %9035 = vmatprep.subr.bf16.mxu0 %v10012_v1 }
 0x11a   : > { %9006 = vmatpush3.bf16.msra.mxu1 %v9481_v28 }
 0x11b   : > { %885 = vmatmul.mubr.bf16.vlgmr.msra.gmra.mrb[0].mxu0 %v675_v25  ;;  %9011 = vmatprep.subr.bf16.mxu1 %v10012_v1 }
 0x11c   : > { %9037 = vmatprep.mubr.msk.bf16.mxu0 %vm10013_vm0, %v10012_v1 }
 0x11d   : > { %9008 = vmatmul.mubr.bf16.vlgmr.msra.gmra.mrb[0].mxu1 %v675_v25 }
 0x11e   : > { %9013 = vmatprep.mubr.msk.bf16.mxu1 %vm10013_vm0, %v10012_v1 }
 0x1ee   : > { %v886_v36 = vpop.f32.mrb[0].mxu0 }
 0x1ef   : > { %v10469_v37 = vadd.f32 %v886_v36, %v10465_v34  ;;  %v888_v38 = vpop.f32.mrb[1].mxu0 }
 0x1f0   : > { %v10471_v39 = vadd.f32 %v888_v38, %v716_v35  ;;  %v890_v40 = vpop.f32.mrb[2].mxu0  ;;  %v929_v46 = vpop.f32.mrb[0].mxu1 }
 0x1f1   : > { %v892_v41 = vpop.f32.mrb[3].mxu0  ;;  %938 = vrot.lane.b32.xlu0 %v10469_v37, %s10014_s29  ;;  %v10478_v42 = vadd.f32 %v890_v40, %v10465_v34  ;;  %v10535_v47 = vadd.f32 %v929_v46, %v720_v45  ;;  %v9009_v48 = vpop.f32.mrb[1].mxu1 }
 0x1f2   : > { %1532 = vrot.lane.b32.xlu1 %v10471_v39, %s10015_s12  ;;  %v10484_v43 = vadd.f32 %v892_v41, %v716_v35  ;;  %v932_v49 = vpop.f32.mrb[2].mxu1 }
 0x1f3   : > { %v10539_v50 = vadd.f32 %v932_v49, %v720_v45  ;;  %v9010_v51 = vpop.f32.mrb[3].mxu1 }
 0x1f5   : > { %1526 = vrot.lane.b32.xlu0 %v10471_v39, %s10014_s29 }
 0x1f6   : > { %940 = vrot.lane.b32.xlu1 %v10478_v42, %s10014_s29 }
 0x1f9   : > { %1538 = vrot.lane.b32.xlu0 %v10471_v39, %s10016_s10 }
 0x1fa   : > { %1534 = vrot.lane.b32.xlu1 %v10484_v43, %s10015_s12 }
 0x1fd   : > { %1528 = vrot.lane.b32.xlu0 %v10484_v43, %s10014_s29 }
 0x1fe   : > { %1540 = vrot.lane.b32.xlu1 %v10484_v43, %s10016_s10 }
 0x201   : > { %944 = vrot.lane.b32.xlu0 %v10469_v37, %s10015_s12 }
 0x202   : > { %946 = vrot.lane.b32.xlu1 %v10478_v42, %s10015_s12 }
 0x205   : > { %950 = vrot.lane.b32.xlu0 %v10469_v37, %s10016_s10 }
 0x206   : > { %952 = vrot.lane.b32.xlu1 %v10478_v42, %s10016_s10 }
 0x209   : > { %1544 = vrot.lane.b32.xlu0 %v10471_v39, %s10017_s25 }
 0x20a   : > { %958 = vrot.lane.b32.xlu1 %v10478_v42, %s10017_s25 }
 0x20d   : > { %1550 = vrot.lane.b32.xlu0 %v10471_v39, %s10018_s14 }
 0x20e   : > { %964 = vrot.lane.b32.xlu1 %v10478_v42, %s10018_s14 }
 0x211   : > { %1556 = vrot.lane.b32.xlu0 %v10471_v39, %s10019_s15 }
 0x212   : > { %1546 = vrot.lane.b32.xlu1 %v10484_v43, %s10017_s25 }
 0x215   : > { %1562 = vrot.lane.b32.xlu0 %v10471_v39, %s10020_s8 }
 0x216   : > { %1552 = vrot.lane.b32.xlu1 %v10484_v43, %s10018_s14 }
 0x219   : > { %956 = vrot.lane.b32.xlu0 %v10469_v37, %s10017_s25 }
 0x21a   : > { %1558 = vrot.lane.b32.xlu1 %v10484_v43, %s10019_s15 }
 0x21d   : > { %962 = vrot.lane.b32.xlu0 %v10469_v37, %s10018_s14 }
 0x21e   : > { %1564 = vrot.lane.b32.xlu1 %v10484_v43, %s10020_s8 }
 0x221   : > { %968 = vrot.lane.b32.xlu0 %v10469_v37, %s10019_s15 }
 0x222   : > { %970 = vrot.lane.b32.xlu1 %v10478_v42, %s10019_s15 }
 0x225   : > { %974 = vrot.lane.b32.xlu0 %v10469_v37, %s10020_s8 }
 0x226   : > { %976 = vrot.lane.b32.xlu1 %v10478_v42, %s10020_s8 }
 0x229   : > { %2116 = vrot.lane.b32.xlu0 %v10539_v50, %s10014_s29 }
 0x22a   : > { %2114 = vrot.lane.b32.xlu1 %v10535_v47, %s10014_s29 }
 0x22d   : > { %2126 = vrot.lane.b32.xlu0 %v10535_v47, %s10016_s10 }
 0x22e   : > { %2120 = vrot.lane.b32.xlu1 %v10535_v47, %s10015_s12 }
 0x231   : > { %2134 = vrot.lane.b32.xlu0 %v10539_v50, %s10017_s25 }
 0x232   : > { %2122 = vrot.lane.b32.xlu1 %v10539_v50, %s10015_s12 }
 0x236   : > { %2128 = vrot.lane.b32.xlu1 %v10539_v50, %s10016_s10 }
 0x23a   : > { %2132 = vrot.lane.b32.xlu1 %v10535_v47, %s10017_s25 }
 0x23e   : > { %2138 = vrot.lane.b32.xlu1 %v10535_v47, %s10018_s14 }
 0x242   : > { %2140 = vrot.lane.b32.xlu1 %v10539_v50, %s10018_s14 }
 0x263   : > { %v10555_v54 = vpop.permute.xlu0 %938 }
 0x264   : > { %v1533_v55 = vpop.permute.xlu1 %1532 }
 0x265   : > { %v1568_v62 = vcombine.low %v10471_v39, %v1533_v55  ;;  %v1569_v63 = vcombine.high %v10471_v39, %v1533_v55 }
 0x267   : > { %v1527_v59 = vpop.permute.xlu0 %1526  ;;  %v1576_v7 = vrot.slane %v1568_v62, %v10564_v61  ;;  %v1583_v8 = vrot.slane %v1569_v63, %v10564_v61 }
 0x268   : > { %v10561_v60 = vpop.permute.xlu1 %940 }
 0x26b   : > { %v1539_v3 = vpop.permute.xlu0 %1538 }
 0x26c   : > { %v1584_v4 = vcombine.low %v1527_v59, %v1539_v3  ;;  %v1585_v5 = vcombine.high %v1527_v59, %v1539_v3  ;;  %v1535_v6 = vpop.permute.xlu1 %1534 }
 0x26d   : > { %v1704_v12 = vcombine.low %v10484_v43, %v1535_v6  ;;  %v1705_v13 = vcombine.high %v10484_v43, %v1535_v6 }
 0x26e   : > { %v1592_v9 = vrot.slane %v1584_v4, %v10564_v61  ;;  %v1599_v10 = vrot.slane %v1585_v5, %v10564_v61 }
 0x26f   : > { %v1529_v14 = vpop.permute.xlu0 %1528  ;;  %v1712_v22 = vrot.slane %v1704_v12, %v10564_v61  ;;  %v1719_v23 = vrot.slane %v1705_v13, %v10564_v61 }
 0x270   : > { %v1632_v15 = vcombine.low %v1576_v7, %v1592_v9  ;;  %v1633_v16 = vcombine.high %v1576_v7, %v1592_v9  ;;  %v1648_v17 = vcombine.low %v1583_v8, %v1599_v10  ;;  %v1649_v18 = vcombine.high %v1583_v8, %v1599_v10  ;;  %v1541_v19 = vpop.permute.xlu1 %1540 }
 0x271   : > { %v1720_v20 = vcombine.low %v1529_v14, %v1541_v19  ;;  %v1721_v21 = vcombine.high %v1529_v14, %v1541_v19 }
 0x272   : > { %v1640_v27 = vrot.slane %v1632_v15, %v10573_v11  ;;  %v1647_v28 = vrot.slane %v1633_v16, %v10573_v11  ;;  %v1656_v29 = vrot.slane %v1648_v17, %v10573_v11  ;;  %v1663_v30 = vrot.slane %v1649_v18, %v10573_v11 }
 0x273   : > { %v1728_v24 = vrot.slane %v1720_v20, %v10564_v61  ;;  %v1735_v25 = vrot.slane %v1721_v21, %v10564_v61  ;;  %v945_v26 = vpop.permute.xlu0 %944 }
 0x274   : > { %v947_v32 = vpop.permute.xlu1 %946  ;;  %v980_v40 = vcombine.low %v10469_v37, %v945_v26  ;;  %v981_v41 = vcombine.high %v10469_v37, %v945_v26  ;;  %v8646_v52 = vcombine.low %v1640_v27, %v1647_v28  ;;  %v8648_v53 = vcombine.high %v1640_v27, %v1647_v28 }
 0x275   : > { %v1768_v35 = vcombine.low %v1712_v22, %v1728_v24  ;;  %v1769_v36 = vcombine.high %v1712_v22, %v1728_v24  ;;  %v1784_v38 = vcombine.low %v1719_v23, %v1735_v25  ;;  %v1785_v39 = vcombine.high %v1719_v23, %v1735_v25 }
 0x276   : > { %v1116_v43 = vcombine.low %v10478_v42, %v947_v32  ;;  %v1117_v44 = vcombine.high %v10478_v42, %v947_v32  ;;  %v8650_v37 = vcombine.low %v1656_v29, %v1663_v30  ;;  %v8652_v55 = vcombine.high %v1656_v29, %v1663_v30 }
 0x277   : > { %v10590_v45 = vrot.slane %v1768_v35, %v10573_v11  ;;  %v10593_v46 = vrot.slane %v1769_v36, %v10573_v11  ;;  %v10596_v48 = vrot.slane %v1784_v38, %v10573_v11  ;;  %v10599_v49 = vrot.slane %v1785_v39, %v10573_v11  ;;  %v951_v51 = vpop.permute.xlu0 %950 }
 0x278   : > { %v953_v56 = vpop.permute.xlu1 %952  ;;  %v988_v42 = vrot.slane %v980_v40, %v10564_v61  ;;  %v995_v57 = vrot.slane %v981_v41, %v10564_v61  ;;  %v1124_v58 = vrot.slane %v1116_v43, %v10564_v61  ;;  %v1131_v59 = vrot.slane %v1117_v44, %v10564_v61 }
 0x279   : > { %v996_v62 = vcombine.low %v10555_v54, %v951_v51  ;;  %v997_v63 = vcombine.high %v10555_v54, %v951_v51  ;;  %v1132_v2 = vcombine.low %v10561_v60, %v953_v56  ;;  %v1133_v3 = vcombine.high %v10561_v60, %v953_v56 }
 0x27a   : > { %v8654_v4 = vcombine.low %v10590_v45, %v10593_v46  ;;  %v8656_v5 = vcombine.high %v10590_v45, %v10593_v46  ;;  %v8658_v6 = vcombine.low %v10596_v48, %v10599_v49  ;;  %v8660_v7 = vcombine.high %v10596_v48, %v10599_v49 }
 0x27b   : > { %v10617_v8 = vpop.permute.xlu0 %1544  ;;  %v1004_v54 = vrot.slane %v996_v62, %v10564_v61  ;;  %v1011_v9 = vrot.slane %v997_v63, %v10564_v61  ;;  %v1140_v60 = vrot.slane %v1132_v2, %v10564_v61  ;;  %v1147_v10 = vrot.slane %v1133_v3, %v10564_v61 }
 0x27c   : > { %v10623_v12 = vpop.permute.xlu1 %958  ;;  %v10626_v13 = vrot.slane %v8646_v52, %v10564_v61  ;;  %v10629_v14 = vrot.slane %v8648_v53, %v10564_v61  ;;  %v10632_v15 = vrot.slane %v8650_v37, %v10564_v61  ;;  %v10635_v16 = vrot.slane %v8652_v55, %v10564_v61 }
 0x27d   : > { %v1044_v17 = vcombine.low %v988_v42, %v1004_v54  ;;  %v1045_v18 = vcombine.high %v988_v42, %v1004_v54  ;;  %v1060_v19 = vcombine.low %v995_v57, %v1011_v9  ;;  %v1061_v20 = vcombine.high %v995_v57, %v1011_v9 }
 0x27e   : > { %v1180_v21 = vcombine.low %v1124_v58, %v1140_v60  ;;  %v1181_v22 = vcombine.high %v1124_v58, %v1140_v60  ;;  %v1196_v23 = vcombine.low %v1131_v59, %v1147_v10  ;;  %v1197_v24 = vcombine.high %v1131_v59, %v1147_v10 }
 0x27f   : > { %v1551_v25 = vpop.permute.xlu0 %1550  ;;  %v1052_v26 = vrot.slane %v1044_v17, %v10573_v11  ;;  %v1059_v27 = vrot.slane %v1045_v18, %v10573_v11  ;;  %v1068_v28 = vrot.slane %v1060_v19, %v10573_v11  ;;  %v1075_v29 = vrot.slane %v1061_v20, %v10573_v11 }
 0x280   : > { %v10641_v30 = vpop.permute.xlu1 %964  ;;  %v1188_v32 = vrot.slane %v1180_v21, %v10573_v11  ;;  %v1195_v35 = vrot.slane %v1181_v22, %v10573_v11  ;;  %v1204_v36 = vrot.slane %v1196_v23, %v10573_v11  ;;  %v1211_v38 = vrot.slane %v1197_v24, %v10573_v11 }
 0x281   : > { %v8630_v39 = vcombine.low %v1052_v26, %v1059_v27  ;;  %v8632_v40 = vcombine.high %v1052_v26, %v1059_v27  ;;  %v8634_v41 = vcombine.low %v1068_v28, %v1075_v29  ;;  %v8636_v43 = vcombine.high %v1068_v28, %v1075_v29 }
 0x282   : > { %v8638_v44 = vcombine.low %v1188_v32, %v1195_v35  ;;  %v8640_v45 = vcombine.high %v1188_v32, %v1195_v35  ;;  %v8642_v46 = vcombine.low %v1204_v36, %v1211_v38  ;;  %v8644_v48 = vcombine.high %v1204_v36, %v1211_v38 }
 0x283   : > { %v1557_v49 = vpop.permute.xlu0 %1556  ;;  %v10648_v51 = vrot.slane %v8630_v39, %v10564_v61  ;;  %v10651_v52 = vrot.slane %v8632_v40, %v10564_v61  ;;  %v10654_v53 = vrot.slane %v8634_v41, %v10564_v61  ;;  %v10657_v37 = vrot.slane %v8636_v43, %v10564_v61 }
 0x284   : > { %v10659_v55 = vpop.permute.xlu1 %1546  ;;  %v10662_v56 = vrot.slane %v8638_v44, %v10564_v61  ;;  %v10665_v42 = vrot.slane %v8640_v45, %v10564_v61  ;;  %v10668_v57 = vrot.slane %v8654_v4, %v10564_v61  ;;  %v10671_v58 = vrot.slane %v8656_v5, %v10564_v61 }
 0x285   : > { %v10674_v59 = vrot.slane %v8642_v46, %v10564_v61  ;;  %v10677_v62 = vrot.slane %v8644_v48, %v10564_v61  ;;  %v1904_v63 = vcombine.low %v10626_v13, %v10629_v14  ;;  %v1936_v2 = vcombine.low %v10632_v15, %v10635_v16 }
 0x286   : > { %v1316_v3 = vcombine.low %v10648_v51, %v10651_v52  ;;  %v1348_v5 = vcombine.low %v10654_v53, %v10657_v37  ;;  %v1452_v54 = vcombine.low %v10662_v56, %v10665_v42  ;;  %v1600_v9 = vcombine.low %v10617_v8, %v1557_v49 }
 0x287   : > { %v1563_v4 = vpop.permute.xlu0 %1562  ;;  %v1601_v60 = vcombine.high %v10617_v8, %v1557_v49  ;;  %v10692_v17 = vrot.slane %v8658_v6, %v10564_v61  ;;  %v10695_v18 = vrot.slane %v8660_v7, %v10564_v61  ;;  %v2040_v19 = vcombine.low %v10668_v57, %v10671_v58 }
 0x288   : > { %v1553_v10 = vpop.permute.xlu1 %1552  ;;  %v1616_v20 = vcombine.low %v1551_v25, %v1563_v4  ;;  %v1484_v21 = vcombine.low %v10674_v59, %v10677_v62  ;;  %v1912_v22 = vrot.slane %v1904_v63, %v10573_v11  ;;  %v1944_v23 = vrot.slane %v1936_v2, %v10573_v11 }
 0x289   : > { %v1617_v24 = vcombine.high %v1551_v25, %v1563_v4  ;;  %v1608_v8 = vrot.slane %v1600_v9, %v10564_v61  ;;  %v2048_v6 = vrot.slane %v2040_v19, %v10573_v11  ;;  %v2072_v7 = vcombine.low %v10692_v17, %v10695_v18 }
 0x28a   : > { %v1624_v26 = vrot.slane %v1616_v20, %v10564_v61  ;;  %v1615_v28 = vrot.slane %v1601_v60, %v10564_v61  ;;  %v1324_v35 = vrot.slane %v1316_v3, %v10573_v11  ;;  %v1356_v39 = vrot.slane %v1348_v5, %v10573_v11 }
 0x28b   : > { %v10708_v27 = vpop.permute.xlu0 %956  ;;  %v1631_v29 = vrot.slane %v1617_v24, %v10564_v61  ;;  %v2080_v25 = vrot.slane %v2072_v7, %v10573_v11  ;;  %v1317_v40 = vcombine.high %v10648_v51, %v10651_v52  ;;  %v1349_v41 = vcombine.high %v10654_v53, %v10657_v37 }
 0x28c   : > { %v1559_v32 = vpop.permute.xlu1 %1558  ;;  %v1664_v36 = vcombine.low %v1608_v8, %v1624_v26  ;;  %v1665_v38 = vcombine.high %v1608_v8, %v1624_v26  ;;  %v1968_v45 = vcombine.low %v1912_v22, %v1944_v23  ;;  %v1460_v48 = vrot.slane %v1452_v54, %v10573_v11 }
 0x28d   : > { %v1680_v43 = vcombine.low %v1615_v28, %v1631_v29  ;;  %v1681_v44 = vcombine.high %v1615_v28, %v1631_v29  ;;  %v2104_v46 = vcombine.low %v2048_v6, %v2080_v25  ;;  %v1492_v49 = vrot.slane %v1484_v21, %v10573_v11 }
 0x28e   : > { %v1453_v2 = vcombine.high %v10662_v56, %v10665_v42  ;;  %v1485_v3 = vcombine.high %v10674_v59, %v10677_v62  ;;  %v1736_v4 = vcombine.low %v10659_v55, %v1559_v32  ;;  %v1737_v5 = vcombine.high %v10659_v55, %v1559_v32 }
 0x28f   : > { %v10721_v63 = vpop.permute.xlu0 %962  ;;  %v2708_v60 = vpack.c.bf16 %v2104_v46, %v1968_v45  ;;  %v10730_v19 = vrot.slane %v1664_v36, %v10573_v11  ;;  %v10733_v54 = vrot.slane %v1665_v38, %v10573_v11  ;;  %v1380_v20 = vcombine.low %v1324_v35, %v1356_v39 }
 0x290   : > { %v1565_v9 = vpop.permute.xlu1 %1564  ;;  %v10736_v21 = vrot.slane %v1680_v43, %v10573_v11  ;;  %v10739_v24 = vrot.slane %v1681_v44, %v10573_v11  ;;  %v1969_v8 = vcombine.high %v1912_v22, %v1944_v23  ;;  %v2105_v7 = vcombine.high %v2048_v6, %v2080_v25 }
 0x291   : > { %v2721_v26 = vsel %vm2716_vm1, %v2708_v60, 0  ;;  %v1516_v55 = vcombine.low %v1460_v48, %v1492_v49  ;;  %v1752_v28 = vcombine.low %v1553_v10, %v1565_v9  ;;  %v1753_v29 = vcombine.high %v1553_v10, %v1565_v9 }
 0x292   : > { %9012 = vmatpush3.bf16.xpose.msra.mxu1 %v2721_v26  ;;  %v1744_v36 = vrot.slane %v1736_v4, %v10564_v61  ;;  %v2709_v38 = vpack.c.bf16 %v2105_v7, %v1969_v8  ;;  %v1381_v43 = vcombine.high %v1324_v35, %v1356_v39  ;;  %v1517_v6 = vcombine.high %v1460_v48, %v1492_v49 }
 0x293   : > { %v969_v32 = vpop.permute.xlu0 %968  ;;  %9017 = vmatprep.subr.bf16.mxu1 %v10012_v1  ;;  %v1760_v44 = vrot.slane %v1752_v28, %v10564_v61  ;;  %v10747_v22 = vrot.slane %v1753_v29, %v10564_v61  ;;  %v8647_v10 = vcombine.low %v10730_v19, %v10733_v54  ;;  %v8649_v25 = vcombine.high %v10730_v19, %v10733_v54 }
 0x294   : > { %v1012_v45 = vcombine.low %v10708_v27, %v969_v32  ;;  %v971_v46 = vpop.permute.xlu1 %970  ;;  %v1013_v23 = vcombine.high %v10708_v27, %v969_v32  ;;  %v8651_v4 = vcombine.low %v10736_v21, %v10739_v24  ;;  %v10757_v35 = vrot.slane %v1737_v5, %v10564_v61 }
 0x295   : > { %v2700_v39 = vpack.c.bf16 %v1516_v55, %v1380_v20  ;;  %v1800_v9 = vcombine.low %v1744_v36, %v1760_v44  ;;  %v1148_v60 = vcombine.low %v10623_v12, %v971_v46  ;;  %v1149_v8 = vcombine.high %v10623_v12, %v971_v46 }
 0x296   : > { %v2768_v27 = vsel %vm2716_vm1, %v2709_v38, 0  ;;  %v1801_v48 = vcombine.high %v1744_v36, %v1760_v44  ;;  %v1905_v49 = vcombine.high %v10626_v13, %v10629_v14  ;;  %v1937_v7 = vcombine.high %v10632_v15, %v10635_v16 }
 0x297   : > { %v1816_v26 = vcombine.low %v10757_v35, %v10747_v22  ;;  %v1020_v5 = vrot.slane %v1012_v45, %v10564_v61  ;;  %v1027_v20 = vrot.slane %v1013_v23, %v10564_v61  ;;  %v2701_v55 = vpack.c.bf16 %v1517_v6, %v1381_v43  ;;  %v975_v15 = vpop.permute.xlu0 %974 }
 0x298   : > { %v10771_v28 = vrot.slane %v1905_v49, %v10573_v11  ;;  %v10774_v12 = vrot.slane %v1937_v7, %v10573_v11  ;;  %v2041_v13 = vcombine.high %v10668_v57, %v10671_v58  ;;  %v2073_v14 = vcombine.high %v10692_v17, %v10695_v18  ;;  %v977_v16 = vpop.permute.xlu1 %976 }
 0x299   : > { %9014 = vmatmul.mubr.msk.bf16.vlgmr.msra.gmra.mrb[4].mxu1 %vm2716_vm1, %v2700_v39  ;;  %v10782_v29 = vrot.slane %v1800_v9, %v10573_v11  ;;  %v1817_v32 = vcombine.high %v10757_v35, %v10747_v22  ;;  %v1156_v36 = vrot.slane %v1148_v60, %v10564_v61  ;;  %v1163_v38 = vrot.slane %v1149_v8, %v10564_v61 }
 0x29a   : > { %9018 = vmatpush3.bf16.xpose.msra.mxu1 %v2768_v27  ;;  %v10789_v57 = vrot.slane %v1801_v48, %v10573_v11  ;;  %9019 = vmatprep.mubr.msk.bf16.mxu1 %vm10013_vm0, %v10012_v1  ;;  %v10794_v58 = vrot.slane %v2041_v13, %v10573_v11  ;;  %v10797_v17 = vrot.slane %v2073_v14, %v10573_v11 }
 0x29b   : > { %9023 = vmatprep.subr.bf16.mxu1 %v10012_v1  ;;  %v1028_v18 = vcombine.low %v10721_v63, %v975_v15  ;;  %v1029_v45 = vcombine.high %v10721_v63, %v975_v15  ;;  %v1164_v46 = vcombine.low %v10641_v30, %v977_v16  ;;  %v1165_v43 = vcombine.high %v10641_v30, %v977_v16 }
 0x29c   : > { %v10805_v44 = vrot.slane %v1816_v26, %v10573_v11  ;;  %v1970_v22 = vcombine.low %v10771_v28, %v10774_v12  ;;  %v2106_v23 = vcombine.low %v10794_v58, %v10797_v17  ;;  %v10815_v6 = vrot.slane %v1317_v40, %v10573_v11 }
 0x29d   : > { %v1036_v63 = vrot.slane %v1028_v18, %v10564_v61  ;;  %v1043_v35 = vrot.slane %v1029_v45, %v10564_v61  ;;  %v1172_v30 = vrot.slane %v1164_v46, %v10564_v61  ;;  %v1179_v39 = vrot.slane %v1165_v43, %v10564_v61 }
 0x29e   : > { %v2710_v9 = vpack.c.bf16 %v2106_v23, %v1970_v22  ;;  %v10825_v60 = vrot.slane %v1349_v41, %v10573_v11  ;;  %v10831_v51 = vrot.slane %v1453_v2, %v10573_v11  ;;  %v10837_v52 = vrot.slane %v1485_v3, %v10573_v11 }
 0x29f   : > { %v1076_v40 = vcombine.low %v1020_v5, %v1036_v63  ;;  %v1077_v8 = vcombine.high %v1020_v5, %v1036_v63  ;;  %v1092_v27 = vcombine.low %v1027_v20, %v1043_v35  ;;  %v1093_v48 = vcombine.high %v1027_v20, %v1043_v35 }
 0x2a0   : > { %v2815_v53 = vsel %vm2716_vm1, %v2710_v9, 0  ;;  %v1212_v37 = vcombine.low %v1156_v36, %v1172_v30  ;;  %v1213_v41 = vcombine.high %v1156_v36, %v1172_v30  ;;  %v1228_v49 = vcombine.low %v1163_v38, %v1179_v39 }
 0x2a1   : > { %9020 = vmatmul.mubr.msk.bf16.vlgmr.msra.gmra.mrb[8].mxu1 %vm2716_vm1, %v2701_v55  ;;  %v1084_v56 = vrot.slane %v1076_v40, %v10573_v11  ;;  %v1091_v42 = vrot.slane %v1077_v8, %v10573_v11  ;;  %v1100_v2 = vrot.slane %v1092_v27, %v10573_v11  ;;  %v1107_v59 = vrot.slane %v1093_v48, %v10573_v11 }
 0x2a2   : > { %9024 = vmatpush3.bf16.xpose.msra.mxu1 %v2815_v53  ;;  %v1220_v62 = vrot.slane %v1212_v37, %v10573_v11  ;;  %v1227_v3 = vrot.slane %v1213_v41, %v10573_v11  ;;  %v1229_v7 = vcombine.high %v1163_v38, %v1179_v39  ;;  %v1236_v26 = vrot.slane %v1228_v49, %v10573_v11 }
 0x2a3   : > { %v1831_v5 = vrot.slane %v1817_v32, %v10573_v11  ;;  %v8631_v20 = vcombine.low %v1084_v56, %v1091_v42  ;;  %v8633_v55 = vcombine.high %v1084_v56, %v1091_v42  ;;  %v8635_v13 = vcombine.low %v1100_v2, %v1107_v59  ;;  %9025 = vmatprep.mubr.msk.bf16.mxu1 %vm10013_vm0, %v10012_v1 }
 0x2a4   : > { %v8637_v14 = vcombine.high %v1100_v2, %v1107_v59  ;;  %v1243_v15 = vrot.slane %v1229_v7, %v10573_v11  ;;  %v8639_v16 = vcombine.low %v1220_v62, %v1227_v3  ;;  %v8641_v36 = vcombine.high %v1220_v62, %v1227_v3  ;;  %9029 = vmatprep.subr.bf16.mxu1 %v10012_v1 }
 0x2a5   : > { %v10854_v18 = vrot.slane %v8631_v20, %v10564_v61  ;;  %v10857_v38 = vrot.slane %v8633_v55, %v10564_v61  ;;  %v1382_v32 = vcombine.low %v10815_v6, %v10825_v60  ;;  %v1518_v45 = vcombine.low %v10831_v51, %v10837_v52 }
 0x2a6   : > { %v8653_v46 = vcombine.high %v10736_v21, %v10739_v24  ;;  %v8655_v43 = vcombine.low %v10782_v29, %v10789_v57  ;;  %v8643_v22 = vcombine.low %v1236_v26, %v1243_v15  ;;  %v8645_v23 = vcombine.high %v1236_v26, %v1243_v15 }
 0x2a7   : > { %v8657_v63 = vcombine.high %v10782_v29, %v10789_v57  ;;  %v8659_v35 = vcombine.low %v10805_v44, %v1831_v5  ;;  %v8661_v30 = vcombine.high %v10805_v44, %v1831_v5  ;;  %v1971_v39 = vcombine.high %v10771_v28, %v10774_v12 }
 0x2a8   : > { %v10874_v9 = vrot.slane %v8635_v13, %v10564_v61  ;;  %v10877_v40 = vrot.slane %v8637_v14, %v10564_v61  ;;  %v10880_v8 = vrot.slane %v8639_v16, %v10564_v61  ;;  %v10883_v27 = vrot.slane %v8641_v36, %v10564_v61 }
 0x2a9   : > { %v1332_v29 = vcombine.low %v10854_v18, %v10857_v38  ;;  %v10888_v57 = vrot.slane %v8643_v22, %v10564_v61  ;;  %v2702_v44 = vpack.c.bf16 %v1518_v45, %v1382_v32  ;;  %v2107_v28 = vcombine.high %v10794_v58, %v10797_v17 }
 0x2aa   : > { %v10893_v12 = vrot.slane %v8645_v23, %v10564_v61  ;;  %v1383_v48 = vcombine.high %v10815_v6, %v10825_v60  ;;  %v1855_v53 = vrot.slane %v8647_v10, %v10564_v61  ;;  %v1871_v37 = vrot.slane %v8649_v25, %v10564_v61 }
 0x2ab   : > { %9026 = vmatmul.mubr.msk.bf16.vlgmr.msra.gmra.mrb[12].mxu1 %vm2716_vm1, %v2702_v44  ;;  %v2711_v41 = vpack.c.bf16 %v2107_v28, %v1971_v39  ;;  %v1519_v58 = vcombine.high %v10831_v51, %v10837_v52  ;;  %v1887_v17 = vrot.slane %v8651_v4, %v10564_v61  ;;  %v1903_v6 = vrot.slane %v8653_v46, %v10564_v61 }
 0x2ac   : > { %9031 = vmatprep.mubr.msk.bf16.mxu1 %vm10013_vm0, %v10012_v1  ;;  %v1920_v10 = vcombine.low %v1855_v53, %v1871_v37  ;;  %v1991_v19 = vrot.slane %v8655_v43, %v10564_v61  ;;  %v2007_v54 = vrot.slane %v8657_v63, %v10564_v61  ;;  %v2023_v25 = vrot.slane %v8659_v35, %v10564_v61 }
 0x2ad   : > { %v1364_v60 = vcombine.low %v10874_v9, %v10877_v40  ;;  %v2862_v51 = vsel %vm2716_vm1, %v2711_v41, 0  ;;  %v1952_v52 = vcombine.low %v1887_v17, %v1903_v6  ;;  %v2039_v21 = vrot.slane %v8661_v30, %v10564_v61 }
 0x2ae   : > { %v1468_v24 = vcombine.low %v10880_v8, %v10883_v27  ;;  %v1500_v4 = vcombine.low %v10888_v57, %v10893_v12  ;;  %9030 = vmatpush3.bf16.xpose.msra.mxu1 %v2862_v51  ;;  %v1928_v49 = vrot.slane %v1920_v10, %v10573_v11  ;;  %v2056_v56 = vcombine.low %v1991_v19, %v2007_v54 }
 0x2af   : > { %9041 = vmatprep.subr.bf16.mxu1 %v10012_v1  ;;  %v1960_v42 = vrot.slane %v1952_v52, %v10573_v11  ;;  %v2088_v2 = vcombine.low %v2023_v25, %v2039_v21  ;;  %v2703_v59 = vpack.c.bf16 %v1519_v58, %v1383_v48  ;;  %v1921_v3 = vcombine.high %v1855_v53, %v1871_v37 }
 0x2b0   : > { %v2064_v62 = vrot.slane %v2056_v56, %v10573_v11  ;;  %v1340_v26 = vrot.slane %v1332_v29, %v10573_v11  ;;  %v1372_v5 = vrot.slane %v1364_v60, %v10573_v11  ;;  %v1953_v20 = vcombine.high %v1887_v17, %v1903_v6 }
 0x2b1   : > { %v2096_v7 = vrot.slane %v2088_v2, %v10573_v11  ;;  %v1972_v55 = vcombine.low %v1928_v49, %v1960_v42  ;;  %v1476_v13 = vrot.slane %v1468_v24, %v10573_v11  ;;  %v1508_v14 = vrot.slane %v1500_v4, %v10573_v11  ;;  %v2115_v24 = vpop.permute.xlu1 %2114 }
 0x2b2   : > { %v2057_v15 = vcombine.high %v1991_v19, %v2007_v54  ;;  %v1973_v36 = vcombine.high %v1928_v49, %v1960_v42  ;;  %v2089_v45 = vcombine.high %v2023_v25, %v2039_v21  ;;  %v1935_v46 = vrot.slane %v1921_v3, %v10573_v11  ;;  %v2117_v42 = vpop.permute.xlu0 %2116 }
 0x2b3   : > { %v2108_v16 = vcombine.low %v2064_v62, %v2096_v7  ;;  %v2109_v32 = vcombine.high %v2064_v62, %v2096_v7  ;;  %v1967_v63 = vrot.slane %v1953_v20, %v10573_v11  ;;  %v1384_v30 = vcombine.low %v1340_v26, %v1372_v5 }
 0x2b4   : > { %v2071_v43 = vrot.slane %v2057_v15, %v10573_v11  ;;  %v2103_v35 = vrot.slane %v2089_v45, %v10573_v11  ;;  %v1520_v39 = vcombine.low %v1476_v13, %v1508_v14  ;;  %v1385_v29 = vcombine.high %v1340_v26, %v1372_v5 }
 0x2b5   : > { %9032 = vmatmul.mubr.msk.bf16.vlgmr.msra.gmra.mrb[16].mxu1 %vm2716_vm1, %v2703_v59  ;;  %v2712_v22 = vpack.c.bf16 %v2108_v16, %v1972_v55  ;;  %v2713_v23 = vpack.c.bf16 %v2109_v32, %v1973_v36  ;;  %v1521_v44 = vcombine.high %v1476_v13, %v1508_v14  ;;  %v1333_v41 = vcombine.high %v10854_v18, %v10857_v38  ;;  %v2121_v56 = vpop.permute.xlu1 %2120 }
 0x2b6   : > { %9043 = vmatprep.mubr.msk.bf16.mxu1 %vm10013_vm0, %v10012_v1  ;;  %v2110_v53 = vcombine.low %v2071_v43, %v2103_v35  ;;  %v2111_v37 = vcombine.high %v2071_v43, %v2103_v35  ;;  %v1365_v58 = vcombine.high %v10874_v9, %v10877_v40  ;;  %v1469_v17 = vcombine.high %v10880_v8, %v10883_v27  ;;  %v2127_v59 = vpop.permute.xlu0 %2126 }
 0x2b7   : > { %v2909_v28 = vsel %vm2716_vm1, %v2712_v22, 0  ;;  %v2956_v48 = vsel %vm2716_vm1, %v2713_v23, 0  ;;  %v1501_v6 = vcombine.high %v10888_v57, %v10893_v12  ;;  %v1974_v10 = vcombine.low %v1935_v46, %v1967_v63 }
 0x2b8   : > { %9036 = vmatpush3.bf16.xpose.msra.mxu0 %v2909_v28  ;;  %9042 = vmatpush3.bf16.xpose.msra.mxu1 %v2956_v48  ;;  %v1975_v19 = vcombine.high %v1935_v46, %v1967_v63  ;;  %v2704_v54 = vpack.c.bf16 %v1520_v39, %v1384_v30  ;;  %v2705_v25 = vpack.c.bf16 %v1521_v44, %v1385_v29 }
 0x2b9   : > { %9047 = vmatprep.subr.bf16.mxu0 %v10012_v1  ;;  %9053 = vmatprep.subr.bf16.mxu1 %v10012_v1  ;;  %v2714_v18 = vpack.c.bf16 %v2110_v53, %v1974_v10  ;;  %v1347_v9 = vrot.slane %v1333_v41, %v10573_v11  ;;  %v1379_v40 = vrot.slane %v1365_v58, %v10573_v11  ;;  %v2123_v2 = vpop.permute.xlu1 %2122 }
 0x2ba   : > { %v2715_v38 = vpack.c.bf16 %v2111_v37, %v1975_v19  ;;  %v1483_v8 = vrot.slane %v1469_v17, %v10573_v11  ;;  %v1515_v27 = vrot.slane %v1501_v6, %v10573_v11  ;;  %v2156_v3 = vcombine.low %v10535_v47, %v2121_v56 }
 0x2bb   : > { %v3003_v57 = vsel %vm2716_vm1, %v2714_v18, 0  ;;  %v1386_v60 = vcombine.low %v1347_v9, %v1379_v40  ;;  %v1387_v52 = vcombine.high %v1347_v9, %v1379_v40  ;;  %v2157_v7 = vcombine.high %v10535_v47, %v2121_v56 }
 0x2bc   : > { %v3050_v12 = vsel %vm2716_vm1, %v2715_v38, 0  ;;  %v1522_v51 = vcombine.low %v1483_v8, %v1515_v27  ;;  %v1523_v21 = vcombine.high %v1483_v8, %v1515_v27  ;;  %v2172_v26 = vcombine.low %v2115_v24, %v2127_v59 }
 0x2bd   : > { %v2129_v62 = vpop.permute.xlu1 %2128  ;;  %v2173_v5 = vcombine.high %v2115_v24, %v2127_v59  ;;  %v2292_v20 = vcombine.low %v10539_v50, %v2123_v2  ;;  %v2293_v55 = vcombine.high %v10539_v50, %v2123_v2  ;;  %v2164_v15 = vrot.slane %v2156_v3, %v10564_v61 }
 0x2be   : > { %v2706_v4 = vpack.c.bf16 %v1522_v51, %v1386_v60  ;;  %v2707_v49 = vpack.c.bf16 %v1523_v21, %v1387_v52  ;;  %v2308_v13 = vcombine.low %v2117_v42, %v2129_v62  ;;  %v2309_v14 = vcombine.high %v2117_v42, %v2129_v62 }
 0x2bf   : > { %9038 = vmatmul.mubr.msk.bf16.vlgmr.msra.gmra.mrb[4].mxu0 %vm2716_vm1, %v2704_v54  ;;  %9044 = vmatmul.mubr.msk.bf16.vlgmr.msra.gmra.mrb[20].mxu1 %vm2716_vm1, %v2705_v25  ;;  %v2171_v16 = vrot.slane %v2157_v7, %v10564_v61  ;;  %v2180_v36 = vrot.slane %v2172_v26, %v10564_v61  ;;  %v2187_v32 = vrot.slane %v2173_v5, %v10564_v61 }
 0x2c0   : > { %9048 = vmatpush3.bf16.xpose.msra.mxu0 %v3003_v57  ;;  %9054 = vmatpush3.bf16.xpose.msra.mxu1 %v3050_v12  ;;  %v2300_v45 = vrot.slane %v2292_v20, %v10564_v61  ;;  %v2307_v46 = vrot.slane %v2293_v55, %v10564_v61  ;;  %v2316_v43 = vrot.slane %v2308_v13, %v10564_v61 }
 0x2c1   : > { %9049 = vmatprep.mubr.msk.bf16.mxu0 %vm10013_vm0, %v10012_v1  ;;  %9055 = vmatprep.mubr.msk.bf16.mxu1 %vm10013_vm0, %v10012_v1  ;;  %v2323_v22 = vrot.slane %v2309_v14, %v10564_v61  ;;  %v2220_v23 = vcombine.low %v2164_v15, %v2180_v36  ;;  %v2221_v63 = vcombine.high %v2164_v15, %v2180_v36 }
 0x2c2   : > { %9059 = vmatprep.subr.bf16.mxu0 %v10012_v1  ;;  %9065 = vmatprep.subr.bf16.mxu1 %v10012_v1  ;;  %v2236_v35 = vcombine.low %v2171_v16, %v2187_v32  ;;  %v2237_v30 = vcombine.high %v2171_v16, %v2187_v32  ;;  %v2356_v39 = vcombine.low %v2300_v45, %v2316_v43 }
 0x2c3   : > { %v2357_v29 = vcombine.high %v2300_v45, %v2316_v43  ;;  %v2372_v44 = vcombine.low %v2307_v46, %v2323_v22  ;;  %v2373_v28 = vcombine.high %v2307_v46, %v2323_v22  ;;  %v2228_v48 = vrot.slane %v2220_v23, %v10573_v11 }
 0x2c4   : > { %v2235_v53 = vrot.slane %v2221_v63, %v10573_v11  ;;  %v2244_v37 = vrot.slane %v2236_v35, %v10573_v11  ;;  %v2251_v41 = vrot.slane %v2237_v30, %v10573_v11  ;;  %v2364_v58 = vrot.slane %v2356_v39, %v10573_v11 }
 0x2c5   : > { %v2371_v17 = vrot.slane %v2357_v29, %v10573_v11  ;;  %v2380_v6 = vrot.slane %v2372_v44, %v10573_v11  ;;  %v2387_v10 = vrot.slane %v2373_v28, %v10573_v11  ;;  %v11018_v29 = vld [vmem:[%s557_s1] sm:$0xff] }
 0x2c6   : > { %v8662_v19 = vcombine.low %v2228_v48, %v2235_v53  ;;  %v8664_v54 = vcombine.high %v2228_v48, %v2235_v53  ;;  %v8666_v25 = vcombine.low %v2244_v37, %v2251_v41  ;;  %v8668_v18 = vcombine.high %v2244_v37, %v2251_v41 }
 0x2c7   : > { %9050 = vmatmul.mubr.msk.bf16.vlgmr.msra.gmra.mrb[8].mxu0 %vm2716_vm1, %v2706_v4  ;;  %9056 = vmatmul.mubr.msk.bf16.vlgmr.msra.gmra.mrb[24].mxu1 %vm2716_vm1, %v2707_v49  ;;  %v8670_v38 = vcombine.low %v2364_v58, %v2371_v17  ;;  %v8672_v9 = vcombine.high %v2364_v58, %v2371_v17  ;;  %v8674_v40 = vcombine.low %v2380_v6, %v2387_v10 }
 0x2c8   : > { %9061 = vmatprep.mubr.msk.bf16.mxu0 %vm10013_vm0, %v10012_v1  ;;  %9067 = vmatprep.mubr.msk.bf16.mxu1 %vm10013_vm0, %v10012_v1  ;;  %v8676_v8 = vcombine.high %v2380_v6, %v2387_v10  ;;  %v2436_v27 = vrot.slane %v8662_v19, %v10564_v61  ;;  %v2452_v57 = vrot.slane %v8664_v54, %v10564_v61 }
 0x2c9   : > { %v2468_v12 = vrot.slane %v8666_v25, %v10564_v61  ;;  %v2484_v60 = vrot.slane %v8668_v18, %v10564_v61  ;;  %v2572_v51 = vrot.slane %v8670_v38, %v10564_v61  ;;  %v2588_v52 = vrot.slane %v8672_v9, %v10564_v61 }
 0x2ca   : > { %v2604_v21 = vrot.slane %v8674_v40, %v10564_v61  ;;  %v2620_v24 = vrot.slane %v8676_v8, %v10564_v61  ;;  %v2492_v4 = vcombine.low %v2436_v27, %v2452_v57  ;;  %v2493_v14 = vcombine.high %v2436_v27, %v2452_v57  ;;  %v650_v27 = vld [vmem:[%s557_s1 + $0x8] sm:$0xff]  ;;  %s12424_s1 = sld [smem:[#allocation31_spill]] }
 0x2cb   : > { %v2524_v49 = vcombine.low %v2468_v12, %v2484_v60  ;;  %v2628_v56 = vcombine.low %v2572_v51, %v2588_v52  ;;  %v2525_v15 = vcombine.high %v2468_v12, %v2484_v60  ;;  %v2629_v16 = vcombine.high %v2572_v51, %v2588_v52 }
 0x2cc   : > { %v2660_v42 = vcombine.low %v2604_v21, %v2620_v24  ;;  %v2500_v2 = vrot.slane %v2492_v4, %v10573_v11  ;;  %v2661_v36 = vcombine.high %v2604_v21, %v2620_v24  ;;  %v2507_v32 = vrot.slane %v2493_v14, %v10573_v11 }
 0x2cd   : > { %v2532_v59 = vrot.slane %v2524_v49, %v10573_v11  ;;  %v2636_v62 = vrot.slane %v2628_v56, %v10573_v11  ;;  %v2539_v45 = vrot.slane %v2525_v15, %v10573_v11  ;;  %v2643_v46 = vrot.slane %v2629_v16, %v10573_v11 }
 0x2ce   : > { %v2668_v3 = vrot.slane %v2660_v42, %v10573_v11  ;;  %v2675_v43 = vrot.slane %v2661_v36, %v10573_v11 }
 0x2cf   : > { %v2556_v7 = vcombine.low %v2500_v2, %v2532_v59  ;;  %v2557_v5 = vcombine.high %v2500_v2, %v2532_v59  ;;  %v2558_v22 = vcombine.low %v2507_v32, %v2539_v45  ;;  %v2559_v63 = vcombine.high %v2507_v32, %v2539_v45 }
 0x2d0   : > { %v2692_v26 = vcombine.low %v2636_v62, %v2668_v3  ;;  %v2693_v20 = vcombine.high %v2636_v62, %v2668_v3  ;;  %v2694_v23 = vcombine.low %v2643_v46, %v2675_v43  ;;  %v2695_v35 = vcombine.high %v2643_v46, %v2675_v43 }
 0x2d2   : > { %v3277_v55 = vpack.c.bf16 %v2692_v26, %v2556_v7  ;;  %v3278_v13 = vpack.c.bf16 %v2693_v20, %v2557_v5  ;;  %v11012_v30 = vpack.c.bf16 %v2694_v23, %v2558_v22  ;;  %v11014_v39 = vpack.c.bf16 %v2695_v35, %v2559_v63 }
 0x2d4   : > { %9060 = vmatpush3.bf16.msra.mxu0 %v3277_v55  ;;  %9066 = vmatpush3.bf16.msra.mxu1 %v3278_v13 }
 0x2d5   : > { %9071 = vmatprep.subr.bf16.mxu0 %v10012_v1  ;;  %9077 = vmatprep.subr.bf16.mxu1 %v10012_v1 }
 0x36c   : > { %v2757_v44 = vpop.f32.mrb[4].mxu1 }
 0x36d   : > { %v11021_v28 = vadd.f32 %v2757_v44, %v11018_v29  ;;  %v9015_v48 = vpop.f32.mrb[5].mxu1 }
 0x36e   : > { %v2760_v53 = vpop.f32.mrb[6].mxu1 }
 0x36f   : > { %v9016_v37 = vpop.f32.mrb[7].mxu1  ;;  %v3093_v41 = vsel %vm2716_vm1, %v11021_v28, -inf  ;;  %v11030_v4 = vadd.f32 %v2760_v53, %v650_v27 }
 0x370   : > { %3094 = vmax.xlane.f32.xlu0 %v3093_v41 }
 0x371   : > { %v3096_v3 = vsel %vm2716_vm1, %v11030_v4, -inf }
 0x374   : > { %v2804_v58 = vpop.f32.mrb[8].mxu1 }
 0x375   : > { %v9021_v17 = vpop.f32.mrb[9].mxu1  ;;  %v11037_v59 = vadd.f32 %v2804_v58, %v11018_v29 }
 0x376   : > { %v2807_v6 = vpop.f32.mrb[10].mxu1 }
 0x377   : > { %v9022_v10 = vpop.f32.mrb[11].mxu1  ;;  %v11043_v5 = vadd.f32 %v2807_v6, %v650_v27  ;;  %v3099_v14 = vsel %vm2716_vm1, %v11037_v59, -inf }
 0x379   : > { %v3102_v23 = vsel %vm2716_vm1, %v11043_v5, -inf }
 0x37e   : > { %v2851_v19 = vpop.f32.mrb[12].mxu1 }
 0x37f   : > { %v9027_v54 = vpop.f32.mrb[13].mxu1  ;;  %v11051_v36 = vadd.f32 %v2851_v19, %v11018_v29 }
 0x380   : > { %v2854_v25 = vpop.f32.mrb[14].mxu1 }
 0x381   : > { %v9028_v18 = vpop.f32.mrb[15].mxu1  ;;  %v3105_v35 = vsel %vm2716_vm1, %v11051_v36, -inf  ;;  %v11066_v44 = vadd.f32 %v2854_v25, %v650_v27 }
 0x382   : > { %v11098_v18 = vpop.permute.xlu0 %2134 }
 0x383   : > { %v3108_v58 = vsel %vm2716_vm1, %v11066_v44, -inf }
 0x388   : > { %v2898_v38 = vpop.f32.mrb[16].mxu1 }
 0x389   : > { %v9033_v9 = vpop.f32.mrb[17].mxu1  ;;  %v11062_v63 = vadd.f32 %v2898_v38, %v11018_v29 }
 0x38a   : > { %v2901_v40 = vpop.f32.mrb[18].mxu1 }
 0x38b   : > { %v9034_v8 = vpop.f32.mrb[19].mxu1  ;;  %v3111_v37 = vsel %vm2716_vm1, %v11062_v63, -inf  ;;  %v11075_v41 = vadd.f32 %v2901_v40, %v650_v27 }
 0x38d   : > { %v3114_v19 = vsel %vm2716_vm1, %v11075_v41, -inf }
 0x392   : > { %v2945_v57 = vpop.f32.mrb[4].mxu0  ;;  %v2992_v12 = vpop.f32.mrb[20].mxu1 }
 0x393   : > { %v11028_v60 = vadd.f32 %v2945_v57, %v11018_v29  ;;  %v9039_v51 = vpop.f32.mrb[5].mxu0  ;;  %v9045_v52 = vpop.f32.mrb[21].mxu1  ;;  %v11071_v53 = vadd.f32 %v2992_v12, %v11018_v29 }
 0x394   : > { %v2948_v21 = vpop.f32.mrb[6].mxu0  ;;  %v2995_v24 = vpop.f32.mrb[22].mxu1 }
 0x395   : > { %v11032_v49 = vadd.f32 %v2948_v21, %v650_v27  ;;  %v9040_v56 = vpop.f32.mrb[7].mxu0  ;;  %v9046_v42 = vpop.f32.mrb[23].mxu1  ;;  %v3117_v2 = vsel %vm2716_vm1, %v11028_v60, -inf  ;;  %v3123_v6 = vsel %vm2716_vm1, %v11071_v53, -inf  ;;  %v11084_v10 = vadd.f32 %v2995_v24, %v650_v27 }
 0x396   : > { %3118 = vmax.xlane.f32.xlu1 %v3117_v2  ;;  %v11107_v57 = vpop.permute.xlu1 %2132 }
 0x397   : > { %v3120_v62 = vsel %vm2716_vm1, %v11032_v49, -inf  ;;  %v3126_v25 = vsel %vm2716_vm1, %v11084_v10, -inf }
 0x398   : > { %3121 = vmax.xlane.f32.xlu0 %v3120_v62 }
 0x39a   : > { %v3039_v7 = vpop.f32.mrb[8].mxu0  ;;  %v3086_v26 = vpop.f32.mrb[24].mxu1  ;;  %3097 = vmax.xlane.f32.xlu1 %v3096_v3 }
 0x39b   : > { %v11046_v20 = vadd.f32 %v3039_v7, %v11018_v29  ;;  %v9051_v55 = vpop.f32.mrb[9].mxu0  ;;  %v9057_v13 = vpop.f32.mrb[25].mxu1  ;;  %v11080_v17 = vadd.f32 %v3086_v26, %v11018_v29 }
 0x39c   : > { %v3042_v15 = vpop.f32.mrb[10].mxu0  ;;  %v3089_v16 = vpop.f32.mrb[26].mxu1  ;;  %3100 = vmax.xlane.f32.xlu0 %v3099_v14 }
 0x39d   : > { %v11053_v32 = vadd.f32 %v3089_v16, %v650_v27  ;;  %v9052_v45 = vpop.f32.mrb[11].mxu0  ;;  %v9058_v46 = vpop.f32.mrb[27].mxu1  ;;  %v3129_v43 = vsel %vm2716_vm1, %v11046_v20, -inf  ;;  %v11057_v22 = vadd.f32 %v3042_v15, %v650_v27  ;;  %v3135_v54 = vsel %vm2716_vm1, %v11080_v17, -inf }
 0x39e   : > { %3130 = vmax.xlane.f32.xlu1 %v3129_v43  ;;  %v11109_v12 = vpop.permute.xlu1 %2138 }
 0x39f   : > { %v3132_v48 = vsel %vm2716_vm1, %v11057_v22, -inf  ;;  %v3138_v29 = vsel %vm2716_vm1, %v11053_v32, -inf }
 0x3a0   : > { %3103 = vmax.xlane.f32.xlu0 %v3102_v23 }
 0x3a2   : > { %3106 = vmax.xlane.f32.xlu1 %v3105_v35  ;;  %v11111_v51 = vpop.permute.xlu1 %2140 }
 0x3a4   : > { %3133 = vmax.xlane.f32.xlu0 %v3132_v48 }
 0x3a6   : > { %3112 = vmax.xlane.f32.xlu1 %v3111_v37 }
 0x3a8   : > { %3109 = vmax.xlane.f32.xlu0 %v3108_v58 }
 0x3aa   : > { %3124 = vmax.xlane.f32.xlu1 %v3123_v6 }
 0x3ac   : > { %3115 = vmax.xlane.f32.xlu0 %v3114_v19 }
 0x3ae   : > { %3136 = vmax.xlane.f32.xlu1 %v3135_v54 }
 0x3b0   : > { %3127 = vmax.xlane.f32.xlu0 %v3126_v25 }
 0x3bf   : > { %2146 = vrot.lane.b32.xlu1 %v10539_v50, %s10019_s15 }
 0x3c6   : > { %2144 = vrot.lane.b32.xlu0 %v10535_v47, %s10019_s15 }
 0x3e5   : > { %3139 = vmax.xlane.f32.xlu0 %v3138_v29 }
 0x3fb   : > { %2150 = vrot.lane.b32.xlu0 %v10535_v47, %s10020_s8 }
 0x3fd   : > { %v3095_v38 = vpop.xlane.xlu0 %3094 }
 0x3fe   : > { %v3141_v9 = vsub.f32 %v11021_v28, %v3095_v38 }
 0x400   : > { %v3157_v40 = vmul.f32 1.442695, %v3141_v9 }
 0x402   : > { %9562 = vpow2.f32 %v3157_v40 }
 0x40c   : > { %v11103_v8 = vpop.eup %9562 }
 0x40d   : > { %v3189_v27 = vsel %vm2716_vm1, %v11103_v8, 0.0 }
 0x40e   : > { %3190 = vadd.xlane.f32.xlu1 %v3189_v27 }
 0x423   : > { %v3119_v52 = vpop.xlane.xlu1 %3118 }
 0x424   : > { %v3149_v47 = vsub.f32 %v11028_v60, %v3119_v52 }
 0x425   : > { %v3122_v21 = vpop.xlane.xlu0 %3121 }
 0x426   : > { %v3173_v24 = vmul.f32 1.442695, %v3149_v47  ;;  %v3150_v28 = vsub.f32 %v11032_v49, %v3122_v21 }
 0x427   : > { %v3098_v56 = vpop.xlane.xlu1 %3097 }
 0x428   : > { %9564 = vpow2.f32 %v3173_v24  ;;  %v3142_v42 = vsub.f32 %v11030_v4, %v3098_v56  ;;  %v3175_v2 = vmul.f32 1.442695, %v3150_v28 }
 0x429   : > { %v3101_v62 = vpop.xlane.xlu0 %3100 }
 0x42a   : > { %v3159_v3 = vmul.f32 1.442695, %v3142_v42  ;;  %v3143_v7 = vsub.f32 %v11037_v59, %v3101_v62 }
 0x42b   : > { %v3131_v26 = vpop.xlane.xlu1 %3130 }
 0x42c   : > { %9566 = vpow2.f32 %v3159_v3  ;;  %v3161_v55 = vmul.f32 1.442695, %v3143_v7  ;;  %v3153_v29 = vsub.f32 %v11046_v20, %v3131_v26 }
 0x42d   : > { %9568 = vpow2.f32 %v3175_v2  ;;  %v3104_v13 = vpop.xlane.xlu0 %3103 }
 0x42e   : > { %9570 = vpow2.f32 %v3161_v55  ;;  %v3144_v60 = vsub.f32 %v11043_v5, %v3104_v13  ;;  %v3181_v52 = vmul.f32 1.442695, %v3153_v29 }
 0x42f   : > { %v3107_v14 = vpop.xlane.xlu1 %3106 }
 0x430   : > { %v3163_v15 = vmul.f32 1.442695, %v3144_v60  ;;  %v3145_v49 = vsub.f32 %v11051_v36, %v3107_v14 }
 0x431   : > { %v11119_v16 = vpop.xlane.xlu0 %3133 }
 0x432   : > { %v11121_v4 = vpop.eup %9564  ;;  %9572 = vpow2.f32 %v3163_v15  ;;  %v3165_v45 = vmul.f32 1.442695, %v3145_v49 }
 0x433   : > { %v3113_v46 = vpop.xlane.xlu1 %3112  ;;  %v3213_v59 = vsel %vm2716_vm1, %v11121_v4, 0.0 }
 0x434   : > { %v3147_v43 = vsub.f32 %v11062_v63, %v3113_v46  ;;  %3214 = vadd.xlane.f32.xlu1 %v3213_v59  ;;  %9574 = vpow2.f32 %v3165_v45  ;;  %v3154_v46 = vsub.f32 %v11057_v22, %v11119_v16 }
 0x435   : > { %v3110_v23 = vpop.xlane.xlu0 %3109 }
 0x436   : > { %v11126_v35 = vpop.eup %9566  ;;  %v3169_v5 = vmul.f32 1.442695, %v3147_v43  ;;  %v3146_v36 = vsub.f32 %v11066_v44, %v3110_v23  ;;  %v3183_v59 = vmul.f32 1.442695, %v3154_v46 }
 0x437   : > { %v11129_v48 = vpop.eup %9568  ;;  %v3125_v37 = vpop.xlane.xlu1 %3124  ;;  %v3192_v58 = vsel %vm2716_vm1, %v11126_v35, 0.0 }
 0x438   : > { %v11133_v6 = vpop.eup %9570  ;;  %v3167_v19 = vmul.f32 1.442695, %v3146_v36  ;;  %v3151_v54 = vsub.f32 %v11071_v53, %v3125_v37  ;;  %3193 = vadd.xlane.f32.xlu0 %v3192_v58  ;;  %9576 = vpow2.f32 %v3169_v5  ;;  %v3216_v9 = vsel %vm2716_vm1, %v11129_v48, 0.0 }
 0x439   : > { %v3116_v63 = vpop.xlane.xlu0 %3115  ;;  %v3195_v25 = vsel %vm2716_vm1, %v11133_v6, 0.0 }
 0x43a   : > { %9578 = vpow2.f32 %v3167_v19  ;;  %v3177_v44 = vmul.f32 1.442695, %v3151_v54  ;;  %v3148_v38 = vsub.f32 %v11075_v41, %v3116_v63  ;;  %3196 = vadd.xlane.f32.xlu1 %v3195_v25 }
 0x43b   : > { %v3137_v21 = vpop.xlane.xlu1 %3136 }
 0x43c   : > { %v11142_v40 = vpop.eup %9572  ;;  %9580 = vpow2.f32 %v3177_v44  ;;  %v3171_v53 = vmul.f32 1.442695, %v3148_v38  ;;  %3217 = vadd.xlane.f32.xlu0 %v3216_v9  ;;  %v3155_v41 = vsub.f32 %v11080_v17, %v3137_v21 }
 0x43d   : > { %v3128_v27 = vpop.xlane.xlu0 %3127  ;;  %v3198_v20 = vsel %vm2716_vm1, %v11142_v40, 0.0 }
 0x43e   : > { %9582 = vpow2.f32 %v3171_v53  ;;  %v3152_v47 = vsub.f32 %v11084_v10, %v3128_v27  ;;  %v11147_v24 = vpop.eup %9574  ;;  %v3185_v3 = vmul.f32 1.442695, %v3155_v41 }
 0x43f   : > { %9584 = vpow2.f32 %v3181_v52  ;;  %v3201_v42 = vsel %vm2716_vm1, %v11147_v24, 0.0  ;;  %v11193_v22 = vpop.permute.xlu1 %2146 }
 0x440   : > { %3199 = vadd.xlane.f32.xlu0 %v3198_v20  ;;  %v3179_v28 = vmul.f32 1.442695, %v3152_v47 }
 0x441   : > { %v2145_v43 = vpop.permute.xlu0 %2144 }
 0x442   : > { %v11150_v56 = vpop.eup %9576  ;;  %9586 = vpow2.f32 %v3179_v28  ;;  %v2188_v9 = vcombine.low %v11107_v57, %v2145_v43  ;;  %v2189_v53 = vcombine.high %v11107_v57, %v2145_v43 }
 0x443   : > { %v3207_v17 = vsel %vm2716_vm1, %v11150_v56, 0.0  ;;  %9588 = vpow2.f32 %v3185_v3 }
 0x444   : > { %v11154_v2 = vpop.eup %9578  ;;  %3202 = vadd.xlane.f32.xlu0 %v3201_v42  ;;  %9590 = vpow2.f32 %v3183_v59  ;;  %v2196_v20 = vrot.slane %v2188_v9, %v10564_v61  ;;  %v2203_v28 = vrot.slane %v2189_v53, %v10564_v61 }
 0x445   : > { %v3204_v10 = vsel %vm2716_vm1, %v11154_v2, 0.0 }
 0x446   : > { %v11158_v62 = vpop.eup %9580  ;;  %3205 = vadd.xlane.f32.xlu1 %v3204_v10 }
 0x447   : > { %v3219_v26 = vsel %vm2716_vm1, %v11158_v62, 0.0 }
 0x448   : > { %v11162_v7 = vpop.eup %9582  ;;  %3208 = vadd.xlane.f32.xlu0 %v3207_v17 }
 0x449   : > { %v3210_v55 = vsel %vm2716_vm1, %v11162_v7, 0.0  ;;  %v11168_v13 = vpop.eup %9584 }
 0x44a   : > { %3220 = vadd.xlane.f32.xlu1 %v3219_v26  ;;  %v3225_v60 = vsel %vm2716_vm1, %v11168_v13, 0.0 }
 0x44c   : > { %3211 = vadd.xlane.f32.xlu0 %v3210_v55  ;;  %v11172_v14 = vpop.eup %9586 }
 0x44d   : > { %v3222_v15 = vsel %vm2716_vm1, %v11172_v14, 0.0  ;;  %v11176_v49 = vpop.eup %9588 }
 0x44e   : > { %v3231_v45 = vsel %vm2716_vm1, %v11176_v49, 0.0  ;;  %v11185_v37 = vpop.eup %9590 }
 0x44f   : > { %v3228_v58 = vsel %vm2716_vm1, %v11185_v37, 0.0 }
 0x450   : > { %3226 = vadd.xlane.f32.xlu0 %v3225_v60 }
 0x454   : > { %3223 = vadd.xlane.f32.xlu0 %v3222_v15 }
 0x458   : > { %3232 = vadd.xlane.f32.xlu0 %v3231_v45 }
 0x45b   : > { %2152 = vrot.lane.b32.xlu1 %v10539_v50, %s10020_s8 }
 0x472   : > { %v3140_v23 = vpop.xlane.xlu0 %3139 }
 0x473   : > { %v3156_v5 = vsub.f32 %v11053_v32, %v3140_v23 }
 0x475   : > { %v3187_v36 = vmul.f32 1.442695, %v3156_v5  ;;  %v2324_v5 = vcombine.low %v11098_v18, %v11193_v22 }
 0x476   : > { %v2151_v16 = vpop.permute.xlu0 %2150 }
 0x477   : > { %9592 = vpow2.f32 %v3187_v36  ;;  %v2204_v25 = vcombine.low %v11109_v12, %v2151_v16  ;;  %v2205_v38 = vcombine.high %v11109_v12, %v2151_v16  ;;  %v2325_v36 = vcombine.high %v11098_v18, %v11193_v22 }
 0x478   : > { %v2332_v18 = vrot.slane %v2324_v5, %v10564_v61 }
 0x479   : > { %v2212_v27 = vrot.slane %v2204_v25, %v10564_v61  ;;  %v2219_v21 = vrot.slane %v2205_v38, %v10564_v61  ;;  %v2339_v22 = vrot.slane %v2325_v36, %v10564_v61 }
 0x47b   : > { %v2252_v42 = vcombine.low %v2196_v20, %v2212_v27  ;;  %v2253_v10 = vcombine.high %v2196_v20, %v2212_v27  ;;  %v2268_v17 = vcombine.low %v2203_v28, %v2219_v21  ;;  %v2269_v26 = vcombine.high %v2203_v28, %v2219_v21 }
 0x47d   : > { %v2260_v15 = vrot.slane %v2252_v42, %v10573_v11  ;;  %v2267_v45 = vrot.slane %v2253_v10, %v10573_v11  ;;  %v2276_v43 = vrot.slane %v2268_v17, %v10573_v11 }
 0x47f   : > { %3229 = vadd.xlane.f32.xlu1 %v3228_v58  ;;  %v8663_v58 = vcombine.low %v2260_v15, %v2267_v45 }
 0x481   : > { %v11189_v19 = vpop.eup %9592 }
 0x482   : > { %v3234_v50 = vsel %vm2716_vm1, %v11189_v19, 0.0 }
 0x483   : > { %3235 = vadd.xlane.f32.xlu0 %v3234_v50  ;;  %v8665_v50 = vcombine.high %v2260_v15, %v2267_v45 }
 0x49b   : > { %v3191_v54 = vpop.xlane.xlu1 %3190 }
 0x49c   : > { %9594 = vrcp.f32 %v3191_v54 }
 0x4a6   : > { %v9595_v47 = vpop.eup %9594 }
 0x4a7   : > { %v3253_v12 = vmul.f32 %v9595_v47, %v11103_v8  ;;  %v2283_v8 = vrot.slane %v2269_v26, %v10573_v11 }
 0x4a9   : > { %v8669_v25 = vcombine.high %v2276_v43, %v2283_v8 }
 0x4c1   : > { %v11195_v32 = vpop.xlane.xlu1 %3214 }
 0x4c5   : > { %v3194_v63 = vpop.xlane.xlu0 %3193 }
 0x4c6   : > { %9596 = vrcp.f32 %v3194_v63  ;;  %v8667_v63 = vcombine.low %v2276_v43, %v2283_v8 }
 0x4c7   : > { %v3197_v29 = vpop.xlane.xlu1 %3196 }
 0x4c8   : > { %9598 = vrcp.f32 %v3197_v29  ;;  %v2475_v21 = vrot.slane %v8667_v63, %v10564_v61 }
 0x4c9   : > { %v11198_v44 = vpop.xlane.xlu0 %3217 }
 0x4cd   : > { %v3200_v52 = vpop.xlane.xlu0 %3199 }
 0x4ce   : > { %9600 = vrcp.f32 %v3200_v52  ;;  %v11229_v52 = vrot.slane %v8663_v58, %v10564_v61 }
 0x4d0   : > { %v9597_v41 = vpop.eup %9596 }
 0x4d1   : > { %v3254_v3 = vmul.f32 %v9597_v41, %v11126_v35  ;;  %v3203_v57 = vpop.xlane.xlu0 %3202  ;;  %v2491_v41 = vrot.slane %v8669_v25, %v10564_v61 }
 0x4d2   : > { %9602 = vrcp.f32 %v3203_v57  ;;  %v9599_v59 = vpop.eup %9598 }
 0x4d3   : > { %v3206_v55 = vpop.xlane.xlu1 %3205  ;;  %v3269_v60 = vpack.c.bf16 %v3254_v3, %v3253_v12  ;;  %v3255_v16 = vmul.f32 %v9599_v59, %v11133_v6  ;;  %v2459_v6 = vrot.slane %v8665_v50, %v10564_v61  ;;  %v2541_v63 = vcombine.high %v2475_v21, %v2491_v41 }
 0x4d4   : > { %9604 = vrcp.f32 %v3206_v55 }
 0x4d5   : > { %9062 = vmatmul.mubr.msk.bf16.vlgmr.msra.gmra.mrb[12].mxu0 %vm2716_vm1, %v3269_v60  ;;  %v3209_v46 = vpop.xlane.xlu0 %3208  ;;  %v2540_v60 = vcombine.low %v2475_v21, %v2491_v41 }
 0x4d6   : > { %9072 = vmatpush3.bf16.msra.mxu0 %v11012_v30  ;;  %9073 = vmatprep.mubr.msk.bf16.mxu0 %vm10013_vm0, %v10012_v1  ;;  %9606 = vrcp.f32 %v3209_v46 }
 0x4d7   : > { %v3221_v35 = vpop.xlane.xlu1 %3220  ;;  %9083 = vmatprep.subr.bf16.mxu0 %v10012_v1 }
 0x4d8   : > { %v9601_v23 = vpop.eup %9600 }
 0x4d9   : > { %v3256_v30 = vmul.f32 %v9601_v23, %v11142_v40  ;;  %v3212_v54 = vpop.xlane.xlu0 %3211  ;;  %v2509_v23 = vcombine.high %v11229_v52, %v2459_v6 }
 0x4da   : > { %9608 = vrcp.f32 %v3212_v54  ;;  %v2548_v54 = vrot.slane %v2540_v60, %v10573_v11 }
 0x4db   : > { %v2153_v29 = vpop.permute.xlu1 %2152  ;;  %v3270_v38 = vpack.c.bf16 %v3256_v30, %v3255_v16  ;;  %9610 = vrcp.f32 %v11195_v32 }
 0x4dc   : > { %v9603_v9 = vpop.eup %9602  ;;  %v2340_v53 = vcombine.low %v11111_v51, %v2153_v29  ;;  %v2341_v27 = vcombine.high %v11111_v51, %v2153_v29  ;;  %9612 = vrcp.f32 %v11198_v44 }
 0x4dd   : > { %9068 = vmatmul.mubr.msk.bf16.vlgmr.msra.gmra.mrb[28].mxu1 %vm2716_vm1, %v3270_v38  ;;  %v11233_v40 = vpop.xlane.xlu0 %3226  ;;  %v3257_v28 = vmul.f32 %v9603_v9, %v11147_v24  ;;  %9614 = vrcp.f32 %v3221_v35 }
 0x4de   : > { %v9605_v47 = vpop.eup %9604  ;;  %v2348_v51 = vrot.slane %v2340_v53, %v10564_v61  ;;  %v2355_v20 = vrot.slane %v2341_v27, %v10564_v61  ;;  %9078 = vmatpush3.bf16.msra.mxu1 %v11014_v39  ;;  %9079 = vmatprep.mubr.msk.bf16.mxu1 %vm10013_vm0, %v10012_v1 }
 0x4df   : > { %v3258_v42 = vmul.f32 %v9605_v47, %v11154_v2  ;;  %9089 = vmatprep.subr.bf16.mxu1 %v10012_v1  ;;  %v2508_v2 = vcombine.low %v11229_v52, %v2459_v6  ;;  %v2523_v6 = vrot.slane %v2509_v23, %v10573_v11  ;;  %v2555_v47 = vrot.slane %v2541_v63, %v10573_v11 }
 0x4e0   : > { %v2388_v32 = vcombine.low %v2332_v18, %v2348_v51  ;;  %v2389_v10 = vcombine.high %v2332_v18, %v2348_v51  ;;  %v2404_v12 = vcombine.low %v2339_v22, %v2355_v20  ;;  %v2405_v3 = vcombine.high %v2339_v22, %v2355_v20  ;;  %v9607_v17 = vpop.eup %9606 }
 0x4e1   : > { %v3224_v57 = vpop.xlane.xlu0 %3223  ;;  %v3271_v39 = vpack.c.bf16 %v3258_v42, %v3257_v28  ;;  %v3259_v8 = vmul.f32 %v9607_v17, %v11150_v56  ;;  %v2516_v30 = vrot.slane %v2508_v2, %v10573_v11 }
 0x4e2   : > { %v2396_v26 = vrot.slane %v2388_v32, %v10573_v11  ;;  %v2403_v55 = vrot.slane %v2389_v10, %v10573_v11  ;;  %v2412_v44 = vrot.slane %v2404_v12, %v10573_v11  ;;  %v2419_v24 = vrot.slane %v2405_v3, %v10573_v11 }
 0x4e3   : > { %9616 = vrcp.f32 %v3224_v57  ;;  %9074 = vmatmul.mubr.msk.bf16.vlgmr.msra.gmra.mrb[16].mxu0 %vm2716_vm1, %v3271_v39  ;;  %v2560_v21 = vcombine.low %v2516_v30, %v2548_v54  ;;  %v2561_v20 = vcombine.high %v2516_v30, %v2548_v54 }
 0x4e4   : > { %v9609_v15 = vpop.eup %9608  ;;  %v8671_v45 = vcombine.low %v2396_v26, %v2403_v55  ;;  %v8673_v46 = vcombine.high %v2396_v26, %v2403_v55  ;;  %v8675_v59 = vcombine.low %v2412_v44, %v2419_v24  ;;  %v8677_v43 = vcombine.high %v2412_v44, %v2419_v24  ;;  %9085 = vmatprep.mubr.msk.bf16.mxu0 %vm10013_vm0, %v10012_v1 }
 0x4e5   : > { %v3260_v35 = vmul.f32 %v9609_v15, %v11162_v7  ;;  %v9611_v25 = vpop.eup %9610  ;;  %v2562_v26 = vcombine.low %v2523_v6, %v2555_v47  ;;  %v2563_v55 = vcombine.high %v2523_v6, %v2555_v47  ;;  %9618 = vrcp.f32 %v11233_v40 }
 0x4e6   : > { %v2579_v5 = vrot.slane %v8671_v45, %v10564_v61  ;;  %v2595_v36 = vrot.slane %v8673_v46, %v10564_v61  ;;  %v2611_v58 = vrot.slane %v8675_v59, %v10564_v61  ;;  %v2627_v50 = vrot.slane %v8677_v43, %v10564_v61  ;;  %v9613_v9 = vpop.eup %9612 }
 0x4e7   : > { %v3272_v16 = vpack.c.bf16 %v3260_v35, %v3259_v8  ;;  %v9615_v52 = vpop.eup %9614  ;;  %v3262_v42 = vmul.f32 %v9613_v9, %v11129_v48  ;;  %v3261_v39 = vmul.f32 %v9611_v25, %v11121_v4  ;;  %v3233_v4 = vpop.xlane.xlu0 %3232 }
 0x4e8   : > { %v2644_v56 = vcombine.low %v2579_v5, %v2595_v36  ;;  %v2676_v29 = vcombine.low %v2611_v58, %v2627_v50  ;;  %v2645_v7 = vcombine.high %v2579_v5, %v2595_v36  ;;  %v2677_v38 = vcombine.high %v2611_v58, %v2627_v50 }
 0x4e9   : > { %9080 = vmatmul.mubr.msk.bf16.vlgmr.msra.gmra.mrb[32].mxu1 %vm2716_vm1, %v3272_v16  ;;  %v3263_v17 = vmul.f32 %v9615_v52, %v11158_v62  ;;  %v3273_v44 = vpack.c.bf16 %v3262_v42, %v3261_v39 }
 0x4ea   : > { %v2652_v53 = vrot.slane %v2644_v56, %v10573_v11  ;;  %v2684_v27 = vrot.slane %v2676_v29, %v10573_v11  ;;  %9091 = vmatprep.mubr.msk.bf16.mxu1 %vm10013_vm0, %v10012_v1  ;;  %v2659_v18 = vrot.slane %v2645_v7, %v10573_v11  ;;  %v2691_v22 = vrot.slane %v2677_v38, %v10573_v11 }
 0x4ec   : > { %v2696_v51 = vcombine.low %v2652_v53, %v2684_v27  ;;  %v2697_v41 = vcombine.high %v2652_v53, %v2684_v27  ;;  %v2698_v32 = vcombine.low %v2659_v18, %v2691_v22  ;;  %v2699_v57 = vcombine.high %v2659_v18, %v2691_v22 }
 0x4ed   : > { %v9617_v28 = vpop.eup %9616 }
 0x4ee   : > { %v3264_v10 = vmul.f32 %v9617_v28, %v11172_v14  ;;  %v3281_v12 = vpack.c.bf16 %v2696_v51, %v2560_v21  ;;  %v3282_v3 = vpack.c.bf16 %v2697_v41, %v2561_v20  ;;  %v3283_v48 = vpack.c.bf16 %v2698_v32, %v2562_v26 }
 0x4ef   : > { %v3284_v2 = vpack.c.bf16 %v2699_v57, %v2563_v55  ;;  %v9619_v60 = vpop.eup %9618 }
 0x4f0   : > { %9084 = vmatpush3.bf16.msra.mxu0 %v3281_v12  ;;  %9090 = vmatpush3.bf16.msra.mxu1 %v3282_v3  ;;  %v3274_v24 = vpack.c.bf16 %v3264_v10, %v3263_v17  ;;  %v3265_v45 = vmul.f32 %v9619_v60, %v11168_v13 }
 0x4f1   : > { %9095 = vmatprep.subr.bf16.mxu0 %v10012_v1  ;;  %9101 = vmatprep.subr.bf16.mxu1 %v10012_v1 }
 0x4f3   : > { %9086 = vmatmul.mubr.msk.bf16.vlgmr.msra.gmra.mrb[20].mxu0 %vm2716_vm1, %v3273_v44  ;;  %9092 = vmatmul.mubr.msk.bf16.vlgmr.msra.gmra.mrb[36].mxu1 %vm2716_vm1, %v3274_v24 }
 0x4f4   : > { %9096 = vmatpush3.bf16.msra.mxu0 %v3283_v48  ;;  %9102 = vmatpush3.bf16.msra.mxu1 %v3284_v2 }
 0x4f5   : > { %9097 = vmatprep.mubr.msk.bf16.mxu0 %vm10013_vm0, %v10012_v1  ;;  %9103 = vmatprep.mubr.msk.bf16.mxu1 %vm10013_vm0, %v10012_v1 }
 0x4f6   : > { %9107 = vmatprep.subr.bf16.mxu0 %v10012_v1  ;;  %9127 = vmatprep.subr.bf16.mxu1 %v10012_v1 }
 0x50c   : > { %v3230_v62 = vpop.xlane.xlu1 %3229 }
 0x50d   : > { %9620 = vrcp.f32 %v3230_v62 }
 0x50e   : > { %9622 = vrcp.f32 %v3233_v4 }
 0x510   : > { %v3236_v14 = vpop.xlane.xlu0 %3235 }
 0x511   : > { %9624 = vrcp.f32 %v3236_v14 }
 0x517   : > { %v9621_v15 = vpop.eup %9620 }
 0x518   : > { %v3266_v46 = vmul.f32 %v9621_v15, %v11185_v37  ;;  %v9623_v59 = vpop.eup %9622 }
 0x519   : > { %v3267_v35 = vmul.f32 %v9623_v59, %v11176_v49 }
 0x51a   : > { %v3275_v43 = vpack.c.bf16 %v3266_v46, %v3265_v45 }
 0x51b   : > { %v9625_v8 = vpop.eup %9624 }
 0x51c   : > { %v3268_v23 = vmul.f32 %v9625_v8, %v11189_v19  ;;  %9098 = vmatmul.mubr.msk.bf16.vlgmr.msra.gmra.mrb[24].mxu0 %vm2716_vm1, %v3275_v43 }
 0x51d   : > { %9123 = vmatprep.mubr.msk.bf16.mxu0 %vm10013_vm0, %v10012_v1 }
 0x51e   : > { %v3276_v40 = vpack.c.bf16 %v3268_v23, %v3267_v35 }
 0x520   : > { %9104 = vmatmul.mubr.msk.bf16.vlgmr.msra.gmra.mrb[40].mxu1 %vm2716_vm1, %v3276_v40 }
 0x521   : > { %9143 = vmatprep.mubr.msk.bf16.mxu1 %vm10013_vm0, %v10012_v1 }
 0x5a8   : > { %v3322_v13 = vpop.f32.mrb[12].mxu0 }
 0x5a9   : > { %v9063_v37 = vpop.f32.mrb[13].mxu0 }
 0x5aa   : > { %v3325_v5 = vpop.f32.mrb[14].mxu0 }
 0x5ab   : > { %v9064_v36 = vpop.f32.mrb[15].mxu0 }
 0x5b0   : > { %v3366_v58 = vpop.f32.mrb[28].mxu1 }
 0x5b1   : > { %v9069_v50 = vpop.f32.mrb[29].mxu1 }
 0x5b2   : > { %v3369_v49 = vpop.f32.mrb[30].mxu1 }
 0x5b3   : > { %v9070_v16 = vpop.f32.mrb[31].mxu1 }
 0x5b6   : > { %v3410_v19 = vpop.f32.mrb[16].mxu0 }
 0x5b7   : > { %v3637_v30 = vcombine.low %v3322_v13, %v3410_v19  ;;  %v3638_v54 = vcombine.high %v3322_v13, %v3410_v19  ;;  %v9075_v63 = vpop.f32.mrb[17].mxu0 }
 0x5b8   : > { %v3413_v25 = vpop.f32.mrb[18].mxu0 }
 0x5b9   : > { %v3773_v56 = vcombine.low %v3325_v5, %v3413_v25  ;;  %v3774_v29 = vcombine.high %v3325_v5, %v3413_v25  ;;  %v9076_v7 = vpop.f32.mrb[19].mxu0  ;;  %v3645_v18 = vrot.slane %v3637_v30, %v10564_v61  ;;  %v3652_v22 = vrot.slane %v3638_v54, %v10564_v61 }
 0x5bb   : > { %v3781_v10 = vrot.slane %v3773_v56, %v10564_v61  ;;  %v3788_v12 = vrot.slane %v3774_v29, %v10564_v61 }
 0x5bc   : > { %v3454_v38 = vpop.f32.mrb[32].mxu1 }
 0x5bd   : > { %v3653_v9 = vcombine.low %v3366_v58, %v3454_v38  ;;  %v3654_v53 = vcombine.high %v3366_v58, %v3454_v38  ;;  %v9081_v27 = vpop.f32.mrb[33].mxu1 }
 0x5be   : > { %v3457_v52 = vpop.f32.mrb[34].mxu1 }
 0x5bf   : > { %v3661_v6 = vrot.slane %v3653_v9, %v10564_v61  ;;  %v3668_v47 = vrot.slane %v3654_v53, %v10564_v61  ;;  %v3789_v21 = vcombine.low %v3369_v49, %v3457_v52  ;;  %v3790_v51 = vcombine.high %v3369_v49, %v3457_v52  ;;  %v9082_v20 = vpop.f32.mrb[35].mxu1 }
 0x5c1   : > { %v3701_v41 = vcombine.low %v3645_v18, %v3661_v6  ;;  %v3702_v28 = vcombine.high %v3645_v18, %v3661_v6  ;;  %v3717_v42 = vcombine.low %v3652_v22, %v3668_v47  ;;  %v3718_v32 = vcombine.high %v3652_v22, %v3668_v47 }
 0x5c2   : > { %v3797_v3 = vrot.slane %v3789_v21, %v10564_v61  ;;  %v3804_v57 = vrot.slane %v3790_v51, %v10564_v61 }
 0x5c3   : > { %v3709_v39 = vrot.slane %v3701_v41, %v10573_v11  ;;  %v3716_v17 = vrot.slane %v3702_v28, %v10573_v11  ;;  %v3725_v26 = vrot.slane %v3717_v42, %v10573_v11  ;;  %v3732_v55 = vrot.slane %v3718_v32, %v10573_v11  ;;  %v9482_v32 = vld [vmem:[#allocation10] sm:$0xff]  }
 0x5c4   : > { %v3837_v44 = vcombine.low %v3781_v10, %v3797_v3  ;;  %v3838_v24 = vcombine.high %v3781_v10, %v3797_v3  ;;  %v3853_v48 = vcombine.low %v3788_v12, %v3804_v57  ;;  %v3854_v2 = vcombine.high %v3788_v12, %v3804_v57  ;;  %9108 = vmatpush3.bf16.msra.mxu0 %v9482_v32 }
 0x5c5   : > { %v8694_v4 = vcombine.low %v3709_v39, %v3716_v17  ;;  %v8696_v62 = vcombine.high %v3709_v39, %v3716_v17  ;;  %v8698_v14 = vcombine.low %v3725_v26, %v3732_v55  ;;  %v8700_v60 = vcombine.high %v3725_v26, %v3732_v55  ;;  %v9483_v39 = vld [vmem:[#allocation10 + $0x8] sm:$0xff]   ;;  %9109 = vmatprep.subr.bf16.mxu0 %v10012_v1 }
 0x5c6   : > { %v3845_v15 = vrot.slane %v3837_v44, %v10573_v11  ;;  %v3852_v45 = vrot.slane %v3838_v24, %v10573_v11  ;;  %v3861_v46 = vrot.slane %v3853_v48, %v10573_v11  ;;  %v3868_v59 = vrot.slane %v3854_v2, %v10573_v11  ;;  %v11314_v43 = vpop.f32.mrb[20].mxu0  ;;  %v11316_v8 = vpop.f32.mrb[36].mxu1 }
 0x5c7   : > { %v3917_v35 = vrot.slane %v8694_v4, %v10564_v61  ;;  %v3933_v23 = vrot.slane %v8696_v62, %v10564_v61  ;;  %v3949_v40 = vrot.slane %v8698_v14, %v10564_v61  ;;  %v3965_v13 = vrot.slane %v8700_v60, %v10564_v61  ;;  %v9087_v37 = vpop.f32.mrb[21].mxu0  ;;  %v9093_v5 = vpop.f32.mrb[37].mxu1  ;;  %v9484_v4 = vld [vmem:[#allocation10 + $0x10] sm:$0xff]   ;;  %v9485_v62 = vld [vmem:[#allocation10 + $0x18] sm:$0xff]   ;;  %v9486_v14 = vld [vmem:[#allocation10 + $0x20] sm:$0xff]  }
 0x5c8   : > { %v8702_v36 = vcombine.low %v3845_v15, %v3852_v45  ;;  %v8704_v58 = vcombine.high %v3845_v15, %v3852_v45  ;;  %v8706_v50 = vcombine.low %v3861_v46, %v3868_v59  ;;  %v8708_v49 = vcombine.high %v3861_v46, %v3868_v59  ;;  %v11322_v16 = vpop.f32.mrb[22].mxu0  ;;  %v11324_v19 = vpop.f32.mrb[38].mxu1  ;;  %9110 = vmatpush3.bf16.msra.mxu0 %v9483_v39  ;;  %v9487_v60 = vld [vmem:[#allocation10 + $0x28] sm:$0xff]  }
 0x5c9   : > { %v9088_v30 = vpop.f32.mrb[23].mxu0  ;;  %v9094_v54 = vpop.f32.mrb[39].mxu1  ;;  %v3974_v63 = vcombine.high %v3917_v35, %v3933_v23  ;;  %v4006_v25 = vcombine.high %v3949_v40, %v3965_v13  ;;  %v3973_v56 = vcombine.low %v3917_v35, %v3933_v23  ;;  %v4005_v29 = vcombine.low %v3949_v40, %v3965_v13  ;;  %9111 = vmatprep.subr.bf16.mxu0 %v10012_v1 }
 0x5ca   : > { %v4053_v7 = vrot.slane %v8702_v36, %v10564_v61  ;;  %v4069_v38 = vrot.slane %v8704_v58, %v10564_v61  ;;  %v4085_v9 = vrot.slane %v8706_v50, %v10564_v61  ;;  %v4101_v53 = vrot.slane %v8708_v49, %v10564_v61 }
 0x5cb   : > { %v3988_v27 = vrot.slane %v3974_v63, %v10573_v11  ;;  %v4020_v18 = vrot.slane %v4006_v25, %v10573_v11  ;;  %v11333_v22 = vrot.slane %v3973_v56, %v10573_v11  ;;  %v11336_v52 = vrot.slane %v4005_v29, %v10573_v11 }
 0x5cc   : > { %v4110_v6 = vcombine.high %v4053_v7, %v4069_v38  ;;  %v4142_v47 = vcombine.high %v4085_v9, %v4101_v53  ;;  %v4109_v21 = vcombine.low %v4053_v7, %v4069_v38  ;;  %v4141_v51 = vcombine.low %v4085_v9, %v4101_v53  ;;  %9112 = vmatpush3.bf16.msra.mxu0 %v9484_v4 }
 0x5cd   : > { %v4039_v20 = vcombine.low %v3988_v27, %v4020_v18  ;;  %v4037_v41 = vcombine.low %v11333_v22, %v11336_v52  ;;  %v4038_v28 = vcombine.high %v11333_v22, %v11336_v52  ;;  %v4040_v42 = vcombine.high %v3988_v27, %v4020_v18  ;;  %9113 = vmatprep.subr.bf16.mxu0 %v10012_v1 }
 0x5ce   : > { %v4124_v10 = vrot.slane %v4110_v6, %v10573_v11  ;;  %v4156_v12 = vrot.slane %v4142_v47, %v10573_v11  ;;  %v11345_v3 = vrot.slane %v4109_v21, %v10573_v11  ;;  %v11348_v57 = vrot.slane %v4141_v51, %v10573_v11 }
 0x5d0   : > { %v4175_v17 = vcombine.low %v4124_v10, %v4156_v12  ;;  %v4174_v26 = vcombine.high %v11345_v3, %v11348_v57  ;;  %v4173_v55 = vcombine.low %v11345_v3, %v11348_v57  ;;  %v4176_v44 = vcombine.high %v4124_v10, %v4156_v12  ;;  %9114 = vmatpush3.bf16.msra.mxu0 %v9485_v62 }
 0x5d1   : > { %9115 = vmatprep.subr.bf16.mxu0 %v10012_v1 }
 0x5d2   : > { %v9385_v24 = vpack.i.bf16 %v4175_v17, %v4039_v20  ;;  %v9380_v48 = vpack.i.bf16 %v4174_v26, %v4038_v28  ;;  %v9390_v2 = vpack.i.bf16 %v4176_v44, %v4040_v42 }
 0x5d4   : > { %9386 = vrot.lane.b32.xlu0 %v9385_v24, %s10019_s15  ;;  %9381 = vrot.lane.b32.xlu1 %v9380_v48, %s10020_s8 }
 0x5d5   : > { %9116 = vmatpush3.bf16.msra.mxu0 %v9486_v14 }
 0x5d6   : > { %9117 = vmatprep.subr.bf16.mxu0 %v10012_v1 }
 0x5d8   : > { %9391 = vrot.lane.b32.xlu1 %v9390_v2, %s10018_s14 }
 0x5d9   : > { %9118 = vmatpush3.bf16.msra.mxu0 %v9487_v60 }
 0x5da   : > { %9119 = vmatprep.subr.bf16.mxu0 %v10012_v1 }
 0x5ef   : > { %v3586_v15 = vpop.f32.mrb[24].mxu0 }
 0x5f0   : > { %v3669_v45 = vcombine.low %v11314_v43, %v3586_v15  ;;  %v3670_v46 = vcombine.high %v11314_v43, %v3586_v15  ;;  %v9099_v59 = vpop.f32.mrb[25].mxu0 }
 0x5f1   : > { %v3589_v35 = vpop.f32.mrb[26].mxu0 }
 0x5f2   : > { %v3805_v23 = vcombine.low %v11322_v16, %v3589_v35  ;;  %v3806_v40 = vcombine.high %v11322_v16, %v3589_v35  ;;  %v9100_v13 = vpop.f32.mrb[27].mxu0  ;;  %v3677_v50 = vrot.slane %v3669_v45, %v10564_v61  ;;  %v3684_v49 = vrot.slane %v3670_v46, %v10564_v61 }
 0x5f3   : > { %v3630_v37 = vpop.f32.mrb[40].mxu1 }
 0x5f4   : > { %v3685_v5 = vcombine.low %v11316_v8, %v3630_v37  ;;  %v3686_v36 = vcombine.high %v11316_v8, %v3630_v37  ;;  %v9105_v58 = vpop.f32.mrb[41].mxu1  ;;  %v3813_v8 = vrot.slane %v3805_v23, %v10564_v61  ;;  %v3820_v9 = vrot.slane %v3806_v40, %v10564_v61 }
 0x5f5   : > { %v3633_v30 = vpop.f32.mrb[42].mxu1 }
 0x5f6   : > { %v3693_v43 = vrot.slane %v3685_v5, %v10564_v61  ;;  %v3700_v54 = vrot.slane %v3686_v36, %v10564_v61  ;;  %v3821_v63 = vcombine.low %v11324_v19, %v3633_v30  ;;  %v3822_v16 = vcombine.high %v11324_v19, %v3633_v30  ;;  %v9106_v25 = vpop.f32.mrb[43].mxu1  ;;  %v9488_v5 = vld [vmem:[#allocation10 + $0x30] sm:$0xff]  }
 0x5f7   : > { %9120 = vmatpush3.bf16.msra.mxu0 %v9488_v5 }
 0x5f8   : > { %v3733_v56 = vcombine.low %v3677_v50, %v3693_v43  ;;  %v3734_v29 = vcombine.high %v3677_v50, %v3693_v43  ;;  %v3749_v7 = vcombine.low %v3684_v49, %v3700_v54  ;;  %v3750_v38 = vcombine.high %v3684_v49, %v3700_v54  ;;  %9121 = vmatprep.subr.bf16.mxu0 %v10012_v1 }
 0x5f9   : > { %v3829_v53 = vrot.slane %v3821_v63, %v10564_v61  ;;  %v3836_v27 = vrot.slane %v3822_v16, %v10564_v61 }
 0x5fa   : > { %v3741_v18 = vrot.slane %v3733_v56, %v10573_v11  ;;  %v3748_v6 = vrot.slane %v3734_v29, %v10573_v11  ;;  %v3757_v47 = vrot.slane %v3749_v7, %v10573_v11  ;;  %v3764_v19 = vrot.slane %v3750_v38, %v10573_v11 }
 0x5fb   : > { %v3869_v21 = vcombine.low %v3813_v8, %v3829_v53  ;;  %v3870_v51 = vcombine.high %v3813_v8, %v3829_v53  ;;  %v3885_v20 = vcombine.low %v3820_v9, %v3836_v27  ;;  %v3886_v28 = vcombine.high %v3820_v9, %v3836_v27  ;;  %v9489_v53 = vld [vmem:[#allocation10 + $0x38] sm:$0xff]  }
 0x5fc   : > { %v8695_v42 = vcombine.low %v3741_v18, %v3748_v6  ;;  %v8697_v32 = vcombine.high %v3741_v18, %v3748_v6  ;;  %v8699_v10 = vcombine.low %v3757_v47, %v3764_v19  ;;  %v8701_v12 = vcombine.high %v3757_v47, %v3764_v19  ;;  %9122 = vmatpush3.bf16.msra.mxu0 %v9489_v53  ;;  %v9492_v53 = vld [vmem:[#allocation8 + $0x8] ss:$12 sps:$4 sm:$0xff]  }
 0x5fd   : > { %v3877_v39 = vrot.slane %v3869_v21, %v10573_v11  ;;  %v3884_v17 = vrot.slane %v3870_v51, %v10573_v11  ;;  %v3893_v26 = vrot.slane %v3885_v20, %v10573_v11  ;;  %v3900_v44 = vrot.slane %v3886_v28, %v10573_v11  ;;  %4608 = vmatprep.subr.bf16.mxu0 %v9492_v53 }
 0x5fe   : > { %v3924_v24 = vrot.slane %v8695_v42, %v10564_v61  ;;  %v3940_v48 = vrot.slane %v8697_v32, %v10564_v61  ;;  %v3956_v2 = vrot.slane %v8699_v10, %v10564_v61  ;;  %v3972_v4 = vrot.slane %v8701_v12, %v10564_v61 }
 0x5ff   : > { %v8703_v62 = vcombine.low %v3877_v39, %v3884_v17  ;;  %v8705_v14 = vcombine.high %v3877_v39, %v3884_v17  ;;  %v8707_v60 = vcombine.low %v3893_v26, %v3900_v44  ;;  %v8709_v15 = vcombine.high %v3893_v26, %v3900_v44 }
 0x600   : > { %v3989_v45 = vcombine.low %v3924_v24, %v3940_v48  ;;  %v4021_v46 = vcombine.low %v3956_v2, %v3972_v4  ;;  %v3990_v59 = vcombine.high %v3924_v24, %v3940_v48  ;;  %v4022_v35 = vcombine.high %v3956_v2, %v3972_v4 }
 0x601   : > { %v4060_v23 = vrot.slane %v8703_v62, %v10564_v61  ;;  %v4076_v40 = vrot.slane %v8705_v14, %v10564_v61  ;;  %v4092_v13 = vrot.slane %v8707_v60, %v10564_v61  ;;  %v4108_v37 = vrot.slane %v8709_v15, %v10564_v61 }
 0x602   : > { %v3997_v36 = vrot.slane %v3989_v45, %v10573_v11  ;;  %v4029_v58 = vrot.slane %v4021_v46, %v10573_v11  ;;  %v4004_v50 = vrot.slane %v3990_v59, %v10573_v11  ;;  %v4036_v49 = vrot.slane %v4022_v35, %v10573_v11 }
 0x603   : > { %v4125_v30 = vcombine.low %v4060_v23, %v4076_v40  ;;  %v4157_v43 = vcombine.low %v4092_v13, %v4108_v37  ;;  %v4126_v54 = vcombine.high %v4060_v23, %v4076_v40  ;;  %v4158_v63 = vcombine.high %v4092_v13, %v4108_v37 }
 0x604   : > { %v4042_v16 = vcombine.high %v3997_v36, %v4029_v58  ;;  %v4041_v25 = vcombine.low %v3997_v36, %v4029_v58  ;;  %v4044_v56 = vcombine.high %v4004_v50, %v4036_v49  ;;  %v4043_v29 = vcombine.low %v4004_v50, %v4036_v49 }
 0x605   : > { %v4133_v7 = vrot.slane %v4125_v30, %v10573_v11  ;;  %v4165_v38 = vrot.slane %v4157_v43, %v10573_v11  ;;  %v4140_v8 = vrot.slane %v4126_v54, %v10573_v11  ;;  %v4172_v9 = vrot.slane %v4158_v63, %v10573_v11  ;;  %v8710_v30 = vld [vmem:[%s12423_s16] ss:$0 sm:$0xff] }
 0x607   : > { %v4178_v27 = vcombine.high %v4133_v7, %v4165_v38  ;;  %v4177_v18 = vcombine.low %v4133_v7, %v4165_v38  ;;  %v4180_v6 = vcombine.high %v4140_v8, %v4172_v9  ;;  %v4179_v47 = vcombine.low %v4140_v8, %v4172_v9  ;;  %v9703_v38 = vld [vmem:[%s10419_s23 + $0x8] sm:$0xff]  ;;  %v9490_v9 = vld [vmem:[#allocation8 + $0x4] ss:$12 sps:$4 sm:$0xff]  }
 0x609   : > { %v9400_v19 = vpack.i.bf16 %v4178_v27, %v4042_v16  ;;  %v9395_v21 = vpack.i.bf16 %v4177_v18, %v4041_v25  ;;  %v9410_v51 = vpack.i.bf16 %v4180_v6, %v4044_v56  ;;  %v9405_v20 = vpack.i.bf16 %v4179_v47, %v4043_v29  ;;  %v9702_v29 = vld [vmem:[%s10419_s23] sm:$0xff]  ;;  %v9493_v27 = vld [vmem:[#allocation8 + $0x1c] ss:$12 sps:$4 sm:$0xff]   ;;  %s12425_s23 = sld [smem:[#allocation32_spill]] }
 0x60a   : > { %v9495_v18 = vld [vmem:[#allocation8 + $0x20] ss:$12 sps:$4 sm:$0xff]   ;;  %v9498_v6 = vld [vmem:[#allocation8 + $0x38] ss:$12 sps:$4 sm:$0xff]  }
 0x60b   : > { %9401 = vrot.lane.b32.xlu0 %v9400_v19, %s10016_s10  ;;  %9396 = vrot.lane.b32.xlu1 %v9395_v21, %s10017_s25  ;;  %v9496_v47 = vld [vmem:[#allocation8 + $0x34] ss:$12 sps:$4 sm:$0xff]   ;;  %v9501_v19 = vld [vmem:[#allocation8 + $0x50] ss:$12 sps:$4 sm:$0xff]  }
 0x60c   : > { %v9514_v21 = vld [vmem:[#allocation8] ss:$12 sps:$4 sm:$0xff]  }
 0x60d   : > { %9128 = vmatpush3.bf16.msra.mxu1 %v9514_v21 }
 0x60e   : > { %9129 = vmatprep.subr.bf16.mxu1 %v10012_v1 }
 0x60f   : > { %9411 = vrot.lane.b32.xlu0 %v9410_v51, %s10014_s29  ;;  %9406 = vrot.lane.b32.xlu1 %v9405_v20, %s10015_s12  ;;  %v9499_v51 = vld [vmem:[#allocation8 + $0x4c] ss:$12 sps:$4 sm:$0xff]  }
 0x610   : > { %v9515_v20 = vld [vmem:[#allocation8 + $0x18] ss:$12 sps:$4 sm:$0xff]  }
 0x611   : > { %9130 = vmatpush3.bf16.msra.mxu1 %v9515_v20 }
 0x612   : > { %9131 = vmatprep.subr.bf16.mxu1 %v10012_v1 }
 0x646   : > { %v9382_v28 = vpop.permute.xlu1 %9381  ;;  %v9387_v10 = vpop.permute.xlu0 %9386 }
 0x647   : > { %v9384_v42 = vunpack.i.h.bf16 %v9382_v28  ;;  %v9383_v32 = vunpack.i.l.bf16 %v9382_v28  ;;  %v9389_v39 = vunpack.i.h.bf16 %v9387_v10  ;;  %v9388_v17 = vunpack.i.l.bf16 %v9387_v10  ;;  %v9504_v28 = vld [vmem:[#allocation8 + $0x68] ss:$12 sps:$4 sm:$0xff]  }
 0x648   : > { %v9505_v10 = vld [vmem:[#allocation8 + $0x7c] ss:$12 sps:$4 sm:$0xff]  }
 0x649   : > { %v4237_v26 = vsel %vm2716_vm1, %v4037_v41, %v9383_v32  ;;  %v4238_v44 = vsel %vm2716_vm1, %v4173_v55, %v9384_v42  ;;  %v9502_v42 = vld [vmem:[#allocation8 + $0x64] ss:$12 sps:$4 sm:$0xff]   ;;  %v9507_v32 = vld [vmem:[#allocation8 + $0x80] ss:$12 sps:$4 sm:$0xff]  }
 0x64a   : > { %v9392_v12 = vpop.permute.xlu1 %9391  ;;  %v4241_v62 = vsel %vm4239_vm2, %v4238_v44, %v9389_v39  ;;  %v4240_v14 = vsel %vm4239_vm2, %v4237_v26, %v9388_v17  ;;  %v9508_v39 = vld [vmem:[#allocation8 + $0x94] ss:$12 sps:$4 sm:$0xff]   ;;  %v9513_v17 = vld [vmem:[#allocation8 + $0xb0] ss:$12 sps:$4 sm:$0xff]   ;;  %v9511_v26 = vld [vmem:[#allocation8 + $0xac] ss:$12 sps:$4 sm:$0xff]  }
 0x64b   : > { %v9394_v24 = vunpack.i.h.bf16 %v9392_v12  ;;  %v9393_v48 = vunpack.i.l.bf16 %v9392_v12  ;;  %v9510_v12 = vld [vmem:[#allocation8 + $0x98] ss:$12 sps:$4 sm:$0xff]  }
 0x64c   : > { %v653_v44 = vld [vmem:[%s575_s4] sm:$0xff] }
 0x64d   : > { %v4243_v22 = vsel %vm4242_vm3, %v4240_v14, %v9393_v48  ;;  %v4244_v52 = vsel %vm4242_vm3, %v4241_v62, %v9394_v24  ;;  %v654_v24 = vld [vmem:[%s575_s4 + $0x8] sm:$0xff]  ;;  %s12430_s4 = sld [smem:[#allocation26_spill]] }
 0x64e   : > { %v4500_v48 = vpack.c.bf16 %v654_v24, %v653_v44 }
 0x653   : > { %p12432_p1 = scmp.ne.s32.totalorder %s12430_s4, 0 }
 0x67d   : > { %v9397_v2 = vpop.permute.xlu1 %9396  ;;  %v9402_v4 = vpop.permute.xlu0 %9401 }
 0x67e   : > { %v9399_v60 = vunpack.i.h.bf16 %v9397_v2  ;;  %v9398_v15 = vunpack.i.l.bf16 %v9397_v2  ;;  %v9404_v41 = vunpack.i.h.bf16 %v9402_v4  ;;  %v9403_v3 = vunpack.i.l.bf16 %v9402_v4 }
 0x680   : > { %v4246_v57 = vsel %vm4245_vm4, %v4243_v22, %v9398_v15  ;;  %v4247_v55 = vsel %vm4245_vm4, %v4244_v52, %v9399_v60 }
 0x681   : > { %v9407_v45 = vpop.permute.xlu1 %9406  ;;  %v9412_v46 = vpop.permute.xlu0 %9411  ;;  %v4249_v13 = vsel %vm4248_vm5, %v4246_v57, %v9403_v3  ;;  %v4250_v37 = vsel %vm4248_vm5, %v4247_v55, %v9404_v41  ;;  %v9516_v41 = vld [vmem:[#allocation8 + $0x30] ss:$12 sps:$4 sm:$0xff]   ;;  %v9517_v3 = vld [vmem:[#allocation8 + $0x48] ss:$12 sps:$4 sm:$0xff]   ;;  %v9518_v57 = vld [vmem:[#allocation8 + $0x60] ss:$12 sps:$4 sm:$0xff]  }
 0x682   : > { %v9409_v59 = vunpack.i.h.bf16 %v9407_v45  ;;  %v9408_v35 = vunpack.i.l.bf16 %v9407_v45  ;;  %v9414_v23 = vunpack.i.h.bf16 %v9412_v46  ;;  %v9413_v40 = vunpack.i.l.bf16 %v9412_v46  ;;  %9132 = vmatpush3.bf16.msra.mxu1 %v9516_v41  ;;  %v9519_v55 = vld [vmem:[#allocation8 + $0x78] ss:$12 sps:$4 sm:$0xff]   ;;  %v9520_v45 = vld [vmem:[#allocation8 + $0x90] ss:$12 sps:$4 sm:$0xff]   ;;  %v9521_v46 = vld [vmem:[#allocation8 + $0xa8] ss:$12 sps:$4 sm:$0xff]  }
 0x683   : > { %9133 = vmatprep.subr.bf16.mxu1 %v10012_v1 }
 0x684   : > { %v4252_v5 = vsel %vm4251_vm6, %v4249_v13, %v9408_v35  ;;  %v4253_v36 = vsel %vm4251_vm6, %v4250_v37, %v9409_v59  ;;  %v9704_v59 = vld [vmem:[%s12422_s27] sm:$0x7] }
 0x685   : > { %v4255_v58 = vsel %vm4254_vm7, %v4252_v5, %v9413_v40  ;;  %v4256_v50 = vsel %vm4254_vm7, %v4253_v36, %v9414_v23  ;;  %v4517_v35 = vrot.slane %v9704_v59, 1 }
 0x686   : > { %v4257_v49 = vpack.c.bf16 %v4256_v50, %v4255_v58  ;;  %9134 = vmatpush3.bf16.msra.mxu1 %v9517_v3 }
 0x687   : > { %9135 = vmatprep.subr.bf16.mxu1 %v10012_v1  ;;  %v4521_v23 = vrot.slane %v4517_v35, %v10456_v31  ;;  %v4525_v40 = vrot.slane %v4517_v35, %v10462_v33 }
 0x688   : > { %9124 = vmatmul.mubr.bf16.vlgmr.msra.gmra.mrb[28].mxu0 %v4257_v49 }
 0x689   : > { %4640 = vmatprep.mubr.bf16.mxu0 %v10011_v0  ;;  %4609 = vmatpush1.bf16.msra.mxu0 %v9490_v9 }
 0x68a   : > { %4610 = vmatprep.subr.bf16.mxu0 %v9495_v18  ;;  %9136 = vmatpush3.bf16.msra.mxu1 %v9518_v57 }
 0x68b   : > { %9137 = vmatprep.subr.bf16.mxu1 %v10012_v1 }
 0x68d   : > { %4611 = vmatpush1.bf16.msra.mxu0 %v9493_v27  ;;  %v8720_v27 = vld [vmem:[%s12425_s23] ss:$0 sm:$0xff] }
 0x68e   : > { %4612 = vmatprep.subr.bf16.mxu0 %v9498_v6  ;;  %9138 = vmatpush3.bf16.msra.mxu1 %v9519_v55 }
 0x68f   : > { %9139 = vmatprep.subr.bf16.mxu1 %v10012_v1 }
 0x691   : > { %4613 = vmatpush1.bf16.msra.mxu0 %v9496_v47 }
 0x692   : > { %4614 = vmatprep.subr.bf16.mxu0 %v9501_v19  ;;  %9140 = vmatpush3.bf16.msra.mxu1 %v9520_v45 }
 0x693   : > { %9141 = vmatprep.subr.bf16.mxu1 %v10012_v1 }
 0x695   : > { %4615 = vmatpush1.bf16.msra.mxu0 %v9499_v51 }
 0x696   : > { %4616 = vmatprep.subr.bf16.mxu0 %v9504_v28  ;;  %9142 = vmatpush3.bf16.msra.mxu1 %v9521_v46 }
 0x697   : > { %9147 = vmatprep.subr.bf16.mxu1 %v10012_v1 }
 0x699   : > { %4617 = vmatpush1.bf16.msra.mxu0 %v9502_v42 }
 0x69a   : > { %4618 = vmatprep.subr.bf16.mxu0 %v9507_v32 }
 0x69d   : > { %4619 = vmatpush1.bf16.msra.mxu0 %v9505_v10 }
 0x69e   : > { %4620 = vmatprep.subr.bf16.mxu0 %v9510_v12 }
 0x6a1   : > { %4621 = vmatpush1.bf16.msra.mxu0 %v9508_v39 }
 0x6a2   : > { %4622 = vmatprep.subr.bf16.mxu0 %v9513_v17 }
 0x6a5   : > { %4623 = vmatpush1.bf16.msra.mxu0 %v9511_v26 }
 0x6a6   : > { %9171 = vmatprep.subr.bf16.mxu0 %v10012_v1 }
 0x6a8   : > { %4641 = vmatmul.mubr.bf16.vlgmr.msra.gmra.mrb[32].mxu0 %v4500_v48 }
 0x6a9   : > { %9173 = vmatprep.mubr.msk.bf16.mxu0 %vm10013_vm0, %v10012_v1 }
 0x75b   : > { %v4346_v43 = vpop.f32.mrb[28].mxu0 }
 0x75c   : > { %v4347_v54 = vadd.f32 %v8710_v30, %v4346_v43  ;;  %v9125_v63 = vpop.f32.mrb[29].mxu0 }
 0x75d   : > { %v4349_v16 = vpop.f32.mrb[30].mxu0 }
 0x75e   : > { %v4350_v25 = vadd.f32 %v8710_v30, %v4349_v16  ;;  %v9126_v56 = vpop.f32.mrb[31].mxu0  ;;  %v4353_v7 = vadd.f32 %v9702_v29, %v4347_v54 }
 0x760   : > { %4355 = vadd.xlane.f32.xlu1 %v4353_v7  ;;  %v4354_v8 = vadd.f32 %v9703_v38, %v4350_v25 }
 0x762   : > { %4357 = vadd.xlane.f32.xlu0 %v4354_v8 }
 0x77b   : > { %v4642_v13 = vpop.f32.mrb[32].mxu0 }
 0x77c   : > { %v11454_v37 = vadd.f32 %v4642_v13, %v4521_v23  ;;  %v4644_v5 = vpop.f32.mrb[33].mxu0 }
 0x77d   : > { %v11456_v36 = vadd.f32 %v4644_v5, %v4525_v40  ;;  %v4646_v58 = vpop.f32.mrb[34].mxu0 }
 0x77e   : > { %v11458_v50 = vadd.f32 %v4646_v58, %v4521_v23  ;;  %v4648_v49 = vpop.f32.mrb[35].mxu0 }
 0x77f   : > { %v11462_v30 = vadd.f32 %v4648_v49, %v4525_v40 }
 0x7ed   : > { %v4356_v2 = vpop.xlane.xlu1 %4355 }
 0x7ee   : > { %v4360_v4 = vmul.f32 0.0078125, %v4356_v2 }
 0x7ef   : > { %v4358_v62 = vpop.xlane.xlu0 %4357 }
 0x7f0   : > { %v4362_v14 = vsub.f32 %v4353_v7, %v4360_v4  ;;  %v4361_v60 = vmul.f32 0.0078125, %v4358_v62  ;;  %v8719_v7 = vld [vmem:[%s12424_s1] ss:$0 sm:$0xff] }
 0x7f2   : > { %v4363_v15 = vsub.f32 %v4354_v8, %v4361_v60  ;;  %v4364_v22 = vmul.f32 %v4362_v14, %v4362_v14 }
 0x7f4   : > { %4366 = vadd.xlane.f32.xlu0 %v4364_v22  ;;  %v4365_v52 = vmul.f32 %v4363_v15, %v4363_v15 }
 0x7f6   : > { %4368 = vadd.xlane.f32.xlu1 %v4365_v52 }
 0x807   : > { %5243 = vrot.lane.b32.xlu1 %v11458_v50, %s10014_s29 }
 0x80a   : > { %5241 = vrot.lane.b32.xlu0 %v11454_v37, %s10014_s29 }
 0x80b   : > { %5247 = vrot.lane.b32.xlu1 %v11454_v37, %s10015_s12 }
 0x80e   : > { %5249 = vrot.lane.b32.xlu0 %v11458_v50, %s10015_s12 }
 0x80f   : > { %5253 = vrot.lane.b32.xlu1 %v11454_v37, %s10016_s10 }
 0x812   : > { %5255 = vrot.lane.b32.xlu0 %v11458_v50, %s10016_s10 }
 0x881   : > { %v4367_v43 = vpop.xlane.xlu0 %4366 }
 0x882   : > { %v4370_v54 = vmul.f32 0.0078125, %v4367_v43 }
 0x883   : > { %v4369_v63 = vpop.xlane.xlu1 %4368 }
 0x884   : > { %v4372_v16 = vadd.f32 1e-05, %v4370_v54  ;;  %v4371_v25 = vmul.f32 0.0078125, %v4369_v63 }
 0x885   : > { %v5242_v21 = vpop.permute.xlu0 %5241 }
 0x886   : > { %9626 = vrsqrt.f32 %v4372_v16  ;;  %v4373_v56 = vadd.f32 1e-05, %v4371_v25 }
 0x887   : > { %v5244_v51 = vpop.permute.xlu1 %5243 }
 0x888   : > { %9628 = vrsqrt.f32 %v4373_v56 }
 0x889   : > { %v5250_v20 = vpop.permute.xlu0 %5249 }
 0x88a   : > { %v5419_v42 = vcombine.low %v11458_v50, %v5250_v20  ;;  %v5420_v32 = vcombine.high %v11458_v50, %v5250_v20 }
 0x88b   : > { %v5248_v28 = vpop.permute.xlu1 %5247 }
 0x88c   : > { %v5283_v10 = vcombine.low %v11454_v37, %v5248_v28  ;;  %v5284_v12 = vcombine.high %v11454_v37, %v5248_v28  ;;  %v5427_v48 = vrot.slane %v5419_v42, %v10564_v61  ;;  %v5434_v2 = vrot.slane %v5420_v32, %v10564_v61 }
 0x88d   : > { %v5256_v39 = vpop.permute.xlu0 %5255 }
 0x88e   : > { %v5435_v17 = vcombine.low %v5244_v51, %v5256_v39  ;;  %v5436_v26 = vcombine.high %v5244_v51, %v5256_v39  ;;  %v5291_v44 = vrot.slane %v5283_v10, %v10564_v61  ;;  %v5298_v24 = vrot.slane %v5284_v12, %v10564_v61 }
 0x88f   : > { %v5254_v4 = vpop.permute.xlu1 %5253 }
 0x890   : > { %v9627_v29 = vpop.eup %9626  ;;  %v5299_v62 = vcombine.low %v5242_v21, %v5254_v4  ;;  %v5443_v60 = vrot.slane %v5435_v17, %v10564_v61 }
 0x891   : > { %v4376_v38 = vmul.f32 %v9627_v29, %v4362_v14  ;;  %v5300_v14 = vcombine.high %v5242_v21, %v5254_v4 }
 0x892   : > { %v9629_v8 = vpop.eup %9628  ;;  %v5307_v22 = vrot.slane %v5299_v62, %v10564_v61  ;;  %v5483_v41 = vcombine.low %v5427_v48, %v5443_v60  ;;  %v5484_v3 = vcombine.high %v5427_v48, %v5443_v60 }
 0x893   : > { %v4377_v9 = vmul.f32 %v9629_v8, %v4363_v15  ;;  %v4384_v53 = vmul.f32 %v8719_v7, %v4376_v38  ;;  %v5450_v15 = vrot.slane %v5436_v26, %v10564_v61  ;;  %v5314_v52 = vrot.slane %v5300_v14, %v10564_v61 }
 0x894   : > { %v5347_v45 = vcombine.low %v5291_v44, %v5307_v22  ;;  %v5348_v46 = vcombine.high %v5291_v44, %v5307_v22  ;;  %v5491_v23 = vrot.slane %v5483_v41, %v10573_v11  ;;  %v5498_v40 = vrot.slane %v5484_v3, %v10573_v11 }
 0x895   : > { %v4385_v18 = vmul.f32 %v8719_v7, %v4377_v9  ;;  %v11480_v6 = vadd.f32 %v8720_v27, %v4384_v53  ;;  %v5499_v57 = vcombine.low %v5434_v2, %v5450_v15  ;;  %v5500_v55 = vcombine.high %v5434_v2, %v5450_v15 }
 0x896   : > { %v5363_v59 = vcombine.low %v5298_v24, %v5314_v52  ;;  %v5364_v35 = vcombine.high %v5298_v24, %v5314_v52  ;;  %v5355_v58 = vrot.slane %v5347_v45, %v10573_v11  ;;  %v5362_v49 = vrot.slane %v5348_v46, %v10573_v11 }
 0x897   : > { %v11482_v47 = vadd.f32 %v8720_v27, %v4385_v18  ;;  %v5507_v13 = vrot.slane %v5499_v57, %v10573_v11  ;;  %v5514_v5 = vrot.slane %v5500_v55, %v10573_v11  ;;  %v8769_v63 = vcombine.low %v5491_v23, %v5498_v40 }
 0x898   : > { %v5371_v43 = vrot.slane %v5363_v59, %v10573_v11  ;;  %v5378_v54 = vrot.slane %v5364_v35, %v10573_v11  ;;  %v8771_v16 = vcombine.high %v5491_v23, %v5498_v40  ;;  %v8761_v29 = vcombine.low %v5355_v58, %v5362_v49 }
 0x899   : > { %v4394_v19 = vpack.c.bf16 %v11482_v47, %v11480_v6  ;;  %v8773_v25 = vcombine.low %v5507_v13, %v5514_v5  ;;  %v8775_v56 = vcombine.high %v5507_v13, %v5514_v5  ;;  %v8763_v7 = vcombine.high %v5355_v58, %v5362_v49 }
 0x89a   : > { %v8765_v38 = vcombine.low %v5371_v43, %v5378_v54  ;;  %v8767_v8 = vcombine.high %v5371_v43, %v5378_v54  ;;  %v5699_v9 = vrot.slane %v8769_v63, %v10564_v61  ;;  %v5715_v53 = vrot.slane %v8771_v16, %v10564_v61 }
 0x89b   : > { %9144 = vmatmul.mubr.bf16.vlgmr.msra.gmra.mrb[44].mxu1 %v4394_v19  ;;  %v5731_v27 = vrot.slane %v8773_v25, %v10564_v61  ;;  %v5747_v18 = vrot.slane %v8775_v56, %v10564_v61  ;;  %v5563_v19 = vrot.slane %v8761_v29, %v10564_v61  ;;  %v5579_v21 = vrot.slane %v8763_v7, %v10564_v61 }
 0x89c   : > { %9149 = vmatprep.mubr.msk.bf16.mxu1 %vm10013_vm0, %v10012_v1  ;;  %v5595_v51 = vrot.slane %v8765_v38, %v10564_v61  ;;  %v5611_v20 = vrot.slane %v8767_v8, %v10564_v61  ;;  %v5755_v32 = vcombine.low %v5699_v9, %v5715_v53  ;;  %v5756_v14 = vcombine.high %v5699_v9, %v5715_v53 }
 0x89d   : > { %v5619_v28 = vcombine.low %v5563_v19, %v5579_v21  ;;  %v5787_v10 = vcombine.low %v5731_v27, %v5747_v18  ;;  %v5620_v4 = vcombine.high %v5563_v19, %v5579_v21  ;;  %v5788_v60 = vcombine.high %v5731_v27, %v5747_v18 }
 0x89e   : > { %v5651_v42 = vcombine.low %v5595_v51, %v5611_v20  ;;  %v5763_v17 = vrot.slane %v5755_v32, %v10573_v11  ;;  %v5652_v62 = vcombine.high %v5595_v51, %v5611_v20  ;;  %v5770_v52 = vrot.slane %v5756_v14, %v10573_v11 }
 0x89f   : > { %v5627_v12 = vrot.slane %v5619_v28, %v10573_v11  ;;  %v5795_v26 = vrot.slane %v5787_v10, %v10573_v11  ;;  %v5634_v15 = vrot.slane %v5620_v4, %v10573_v11  ;;  %v5802_v41 = vrot.slane %v5788_v60, %v10573_v11 }
 0x8a0   : > { %v5659_v39 = vrot.slane %v5651_v42, %v10573_v11  ;;  %v5666_v22 = vrot.slane %v5652_v62, %v10573_v11 }
 0x8a1   : > { %v5819_v24 = vcombine.low %v5763_v17, %v5795_v26  ;;  %v5820_v57 = vcombine.high %v5763_v17, %v5795_v26  ;;  %v5821_v45 = vcombine.low %v5770_v52, %v5802_v41  ;;  %v5822_v59 = vcombine.high %v5770_v52, %v5802_v41 }
 0x8a2   : > { %v5683_v44 = vcombine.low %v5627_v12, %v5659_v39  ;;  %v5684_v3 = vcombine.high %v5627_v12, %v5659_v39  ;;  %v5685_v55 = vcombine.low %v5634_v15, %v5666_v22  ;;  %v5686_v46 = vcombine.high %v5634_v15, %v5666_v22 }
 0x8a4   : > { %v6423_v48 = vpack.c.bf16 %v5819_v24, %v5683_v44  ;;  %v6424_v35 = vpack.c.bf16 %v5820_v57, %v5684_v3  ;;  %v6425_v23 = vpack.c.bf16 %v5821_v45, %v5685_v55  ;;  %v11526_v40 = vpack.c.bf16 %v5822_v59, %v5686_v46 }
 0x8a6   : > { %v6435_v2 = vsel %vm2716_vm1, %v6423_v48, 0  ;;  %v11587_v28 = vsel %vm2716_vm1, %v6424_v35, 0  ;;  %v11590_v42 = vsel %vm2716_vm1, %v6425_v23, 0 }
 0x8a7   : > { %9148 = vmatpush3.bf16.xpose.msra.mxu1 %v6435_v2 }
 0x8a8   : > { %9153 = vmatprep.subr.bf16.mxu1 %v10012_v1 }
 0x96e   : > { %v4493_v13 = vpop.f32.mrb[44].mxu1 }
 0x96f   : > { %v4494_v5 = vadd.f32 %v4493_v13, %v10465_v34  ;;  %v9145_v58 = vpop.f32.mrb[45].mxu1 }
 0x970   : > { %v4496_v49 = vpop.f32.mrb[46].mxu1 }
 0x971   : > { %v4497_v43 = vadd.f32 %v4496_v49, %v10465_v34  ;;  %v9146_v54 = vpop.f32.mrb[47].mxu1  ;;  %4653 = vrot.lane.b32.xlu1 %v4494_v5, %s10014_s29 }
 0x973   : > { %4655 = vrot.lane.b32.xlu0 %v4497_v43, %s10014_s29 }
 0x975   : > { %4659 = vrot.lane.b32.xlu1 %v4494_v5, %s10015_s12 }
 0x977   : > { %4661 = vrot.lane.b32.xlu0 %v4497_v43, %s10015_s12 }
 0x979   : > { %4665 = vrot.lane.b32.xlu1 %v4494_v5, %s10016_s10 }
 0x97b   : > { %4667 = vrot.lane.b32.xlu0 %v4497_v43, %s10016_s10 }
 0x97d   : > { %5259 = vrot.lane.b32.xlu1 %v11454_v37, %s10017_s25 }
 0x97f   : > { %5261 = vrot.lane.b32.xlu0 %v11458_v50, %s10017_s25 }
 0x981   : > { %5265 = vrot.lane.b32.xlu1 %v11454_v37, %s10018_s14 }
 0x983   : > { %5267 = vrot.lane.b32.xlu0 %v11458_v50, %s10018_s14 }
 0x985   : > { %5271 = vrot.lane.b32.xlu1 %v11454_v37, %s10019_s15 }
 0x987   : > { %5273 = vrot.lane.b32.xlu0 %v11458_v50, %s10019_s15 }
 0x989   : > { %5277 = vrot.lane.b32.xlu1 %v11454_v37, %s10020_s8 }
 0x98b   : > { %5279 = vrot.lane.b32.xlu0 %v11458_v50, %s10020_s8 }
 0x98d   : > { %4671 = vrot.lane.b32.xlu1 %v4494_v5, %s10017_s25 }
 0x98f   : > { %4673 = vrot.lane.b32.xlu0 %v4497_v43, %s10017_s25 }
 0x991   : > { %4677 = vrot.lane.b32.xlu1 %v4494_v5, %s10018_s14 }
 0x993   : > { %4679 = vrot.lane.b32.xlu0 %v4497_v43, %s10018_s14 }
 0x995   : > { %4683 = vrot.lane.b32.xlu1 %v4494_v5, %s10019_s15 }
 0x997   : > { %4685 = vrot.lane.b32.xlu0 %v4497_v43, %s10019_s15 }
 0x999   : > { %4689 = vrot.lane.b32.xlu1 %v4494_v5, %s10020_s8 }
 0x99b   : > { %4691 = vrot.lane.b32.xlu0 %v4497_v43, %s10020_s8 }
 0x99d   : > { %5831 = vrot.lane.b32.xlu1 %v11462_v30, %s10014_s29 }
 0x99f   : > { %5829 = vrot.lane.b32.xlu0 %v11456_v36, %s10014_s29 }
 0x9a1   : > { %5835 = vrot.lane.b32.xlu1 %v11456_v36, %s10015_s12 }
 0x9a3   : > { %5837 = vrot.lane.b32.xlu0 %v11462_v30, %s10015_s12 }
 0x9a5   : > { %5841 = vrot.lane.b32.xlu1 %v11456_v36, %s10016_s10 }
 0x9a7   : > { %5843 = vrot.lane.b32.xlu0 %v11462_v30, %s10016_s10 }
 0x9a9   : > { %5849 = vrot.lane.b32.xlu1 %v11462_v30, %s10017_s25 }
 0x9ab   : > { %5847 = vrot.lane.b32.xlu0 %v11456_v36, %s10017_s25 }
 0x9ad   : > { %5853 = vrot.lane.b32.xlu1 %v11456_v36, %s10018_s14 }
 0x9af   : > { %5855 = vrot.lane.b32.xlu0 %v11462_v30, %s10018_s14 }
 0x9e3   : > { %v4654_v34 = vpop.permute.xlu1 %4653 }
 0x9e5   : > { %v4656_v37 = vpop.permute.xlu0 %4655 }
 0x9e7   : > { %v4660_v50 = vpop.permute.xlu1 %4659 }
 0x9e8   : > { %v4695_v63 = vcombine.low %v4494_v5, %v4660_v50  ;;  %v4696_v16 = vcombine.high %v4494_v5, %v4660_v50 }
 0x9e9   : > { %v4662_v25 = vpop.permute.xlu0 %4661 }
 0x9ea   : > { %v4703_v38 = vrot.slane %v4695_v63, %v10564_v61  ;;  %v4710_v8 = vrot.slane %v4696_v16, %v10564_v61  ;;  %v4831_v9 = vcombine.low %v4497_v43, %v4662_v25  ;;  %v4832_v53 = vcombine.high %v4497_v43, %v4662_v25 }
 0x9eb   : > { %v4666_v56 = vpop.permute.xlu1 %4665 }
 0x9ec   : > { %v4711_v29 = vcombine.low %v4654_v34, %v4666_v56  ;;  %v4712_v7 = vcombine.high %v4654_v34, %v4666_v56  ;;  %v4839_v17 = vrot.slane %v4831_v9, %v10564_v61  ;;  %v4846_v26 = vrot.slane %v4832_v53, %v10564_v61 }
 0x9ed   : > { %v4668_v27 = vpop.permute.xlu0 %4667 }
 0x9ee   : > { %v4719_v18 = vrot.slane %v4711_v29, %v10564_v61  ;;  %v4726_v19 = vrot.slane %v4712_v7, %v10564_v61  ;;  %v4847_v21 = vcombine.low %v4656_v37, %v4668_v27  ;;  %v4848_v51 = vcombine.high %v4656_v37, %v4668_v27 }
 0x9ef   : > { %v11584_v20 = vpop.permute.xlu1 %5259 }
 0x9f0   : > { %v4759_v32 = vcombine.low %v4703_v38, %v4719_v18  ;;  %v4760_v10 = vcombine.high %v4703_v38, %v4719_v18  ;;  %v4775_v12 = vcombine.low %v4710_v8, %v4726_v19  ;;  %v4776_v39 = vcombine.high %v4710_v8, %v4726_v19 }
 0x9f1   : > { %v4855_v44 = vrot.slane %v4847_v21, %v10564_v61  ;;  %v4862_v24 = vrot.slane %v4848_v51, %v10564_v61  ;;  %v11596_v48 = vpop.permute.xlu0 %5261  ;;  %v11621_v21 = vsel %vm2716_vm1, %v11526_v40, 0 }
 0x9f2   : > { %v4767_v2 = vrot.slane %v4759_v32, %v10573_v11  ;;  %v4774_v4 = vrot.slane %v4760_v10, %v10573_v11  ;;  %v4783_v62 = vrot.slane %v4775_v12, %v10573_v11  ;;  %v4790_v14 = vrot.slane %v4776_v39, %v10573_v11 }
 0x9f3   : > { %v4895_v60 = vcombine.low %v4839_v17, %v4855_v44  ;;  %v4896_v15 = vcombine.high %v4839_v17, %v4855_v44  ;;  %v4911_v22 = vcombine.low %v4846_v26, %v4862_v24  ;;  %v4912_v52 = vcombine.high %v4846_v26, %v4862_v24  ;;  %v5266_v41 = vpop.permute.xlu1 %5265 }
 0x9f4   : > { %v8745_v3 = vcombine.low %v4767_v2, %v4774_v4  ;;  %v8747_v57 = vcombine.high %v4767_v2, %v4774_v4  ;;  %v8749_v55 = vcombine.low %v4783_v62, %v4790_v14  ;;  %v8751_v45 = vcombine.high %v4783_v62, %v4790_v14 }
 0x9f5   : > { %v4903_v46 = vrot.slane %v4895_v60, %v10573_v11  ;;  %v4910_v59 = vrot.slane %v4896_v15, %v10573_v11  ;;  %v4919_v35 = vrot.slane %v4911_v22, %v10573_v11  ;;  %v4926_v23 = vrot.slane %v4912_v52, %v10573_v11  ;;  %v5268_v13 = vpop.permute.xlu0 %5267 }
 0x9f6   : > { %v4975_v5 = vrot.slane %v8745_v3, %v10564_v61  ;;  %v4991_v58 = vrot.slane %v8747_v57, %v10564_v61  ;;  %v5007_v49 = vrot.slane %v8749_v55, %v10564_v61  ;;  %v5023_v43 = vrot.slane %v8751_v45, %v10564_v61 }
 0x9f7   : > { %v8753_v54 = vcombine.low %v4903_v46, %v4910_v59  ;;  %v8755_v34 = vcombine.high %v4903_v46, %v4910_v59  ;;  %v8757_v37 = vcombine.low %v4919_v35, %v4926_v23  ;;  %v8759_v50 = vcombine.high %v4919_v35, %v4926_v23  ;;  %v5272_v63 = vpop.permute.xlu1 %5271 }
 0x9f8   : > { %v5031_v16 = vcombine.low %v4975_v5, %v4991_v58  ;;  %v5032_v25 = vcombine.high %v4975_v5, %v4991_v58  ;;  %v5063_v56 = vcombine.low %v5007_v49, %v5023_v43  ;;  %v5064_v29 = vcombine.high %v5007_v49, %v5023_v43 }
 0x9f9   : > { %v5111_v7 = vrot.slane %v8753_v54, %v10564_v61  ;;  %v5127_v38 = vrot.slane %v8755_v34, %v10564_v61  ;;  %v5143_v8 = vrot.slane %v8757_v37, %v10564_v61  ;;  %v5159_v9 = vrot.slane %v8759_v50, %v10564_v61  ;;  %v5274_v53 = vpop.permute.xlu0 %5273 }
 0x9fa   : > { %v5039_v27 = vrot.slane %v5031_v16, %v10573_v11  ;;  %v11616_v18 = vrot.slane %v5032_v25, %v10573_v11  ;;  %v5071_v19 = vrot.slane %v5063_v56, %v10573_v11  ;;  %v11624_v17 = vrot.slane %v5064_v29, %v10573_v11 }
 0x9fb   : > { %v5167_v51 = vcombine.low %v5111_v7, %v5127_v38  ;;  %v5168_v32 = vcombine.high %v5111_v7, %v5127_v38  ;;  %v5199_v10 = vcombine.low %v5143_v8, %v5159_v9  ;;  %v5200_v12 = vcombine.high %v5143_v8, %v5159_v9  ;;  %v5278_v39 = vpop.permute.xlu1 %5277 }
 0x9fc   : > { %v5315_v26 = vcombine.low %v11584_v20, %v5272_v63  ;;  %v5316_v44 = vcombine.high %v11584_v20, %v5272_v63  ;;  %v5451_v24 = vcombine.low %v11596_v48, %v5274_v53  ;;  %v5452_v62 = vcombine.high %v11596_v48, %v5274_v53 }
 0x9fd   : > { %v5175_v2 = vrot.slane %v5167_v51, %v10573_v11  ;;  %v11631_v4 = vrot.slane %v5168_v32, %v10573_v11  ;;  %v5207_v40 = vrot.slane %v5199_v10, %v10573_v11  ;;  %v5280_v14 = vpop.permute.xlu0 %5279  ;;  %v11636_v60 = vrot.slane %v5200_v12, %v10573_v11 }
 0x9fe   : > { %v5323_v15 = vrot.slane %v5315_v26, %v10564_v61  ;;  %v5330_v22 = vrot.slane %v5316_v44, %v10564_v61  ;;  %v5459_v20 = vrot.slane %v5451_v24, %v10564_v61  ;;  %v5331_v52 = vcombine.low %v5266_v41, %v5278_v39 }
 0x9ff   : > { %v5332_v3 = vcombine.high %v5266_v41, %v5278_v39  ;;  %v5467_v57 = vcombine.low %v5268_v13, %v5280_v14  ;;  %v5468_v55 = vcombine.high %v5268_v13, %v5280_v14  ;;  %v11641_v45 = vpop.permute.xlu1 %4671  ;;  %v5095_v46 = vcombine.low %v5039_v27, %v5071_v19 }
 0xa00   : > { %v5231_v59 = vcombine.low %v5175_v2, %v5207_v40  ;;  %v5096_v35 = vcombine.high %v5039_v27, %v5071_v19  ;;  %v5232_v48 = vcombine.high %v5175_v2, %v5207_v40  ;;  %v5339_v23 = vrot.slane %v5331_v52, %v10564_v61 }
 0xa01   : > { %v5346_v5 = vrot.slane %v5332_v3, %v10564_v61  ;;  %v5475_v58 = vrot.slane %v5467_v57, %v10564_v61  ;;  %v5482_v49 = vrot.slane %v5468_v55, %v10564_v61  ;;  %v11647_v43 = vpop.permute.xlu0 %4673  ;;  %v5466_v41 = vrot.slane %v5452_v62, %v10564_v61 }
 0xa02   : > { %v6415_v54 = vpack.c.bf16 %v5231_v59, %v5095_v46  ;;  %v6416_v13 = vpack.c.bf16 %v5232_v48, %v5096_v35  ;;  %v5097_v34 = vcombine.low %v11616_v18, %v11624_v17  ;;  %v5379_v37 = vcombine.low %v5323_v15, %v5339_v23 }
 0xa03   : > { %v5380_v50 = vcombine.high %v5323_v15, %v5339_v23  ;;  %v5395_v63 = vcombine.low %v5330_v22, %v5346_v5  ;;  %v5396_v16 = vcombine.high %v5330_v22, %v5346_v5  ;;  %v4678_v25 = vpop.permute.xlu1 %4677  ;;  %v5515_v56 = vcombine.low %v5459_v20, %v5475_v58 }
 0xa04   : > { %v5516_v29 = vcombine.high %v5459_v20, %v5475_v58  ;;  %v5531_v7 = vcombine.low %v5466_v41, %v5482_v49  ;;  %v5532_v38 = vcombine.high %v5466_v41, %v5482_v49  ;;  %9150 = vmatmul.mubr.msk.bf16.vlgmr.msra.gmra.mrb[48].mxu1 %vm2716_vm1, %v6415_v54  ;;  %v5387_v8 = vrot.slane %v5379_v37, %v10573_v11 }
 0xa05   : > { %v5394_v9 = vrot.slane %v5380_v50, %v10573_v11  ;;  %v5403_v53 = vrot.slane %v5395_v63, %v10573_v11  ;;  %v5410_v27 = vrot.slane %v5396_v16, %v10573_v11  ;;  %9154 = vmatpush3.bf16.xpose.msra.mxu1 %v11587_v28  ;;  %v4680_v19 = vpop.permute.xlu0 %4679  ;;  %v5523_v51 = vrot.slane %v5515_v56, %v10573_v11 }
 0xa06   : > { %v5530_v32 = vrot.slane %v5516_v29, %v10573_v11  ;;  %v5539_v10 = vrot.slane %v5531_v7, %v10573_v11  ;;  %v5546_v12 = vrot.slane %v5532_v38, %v10573_v11  ;;  %9155 = vmatprep.mubr.msk.bf16.mxu1 %vm10013_vm0, %v10012_v1  ;;  %9159 = vmatprep.subr.bf16.mxu1 %v10012_v1 }
 0xa07   : > { %v8762_v39 = vcombine.low %v5387_v8, %v5394_v9  ;;  %v8764_v26 = vcombine.high %v5387_v8, %v5394_v9  ;;  %v8766_v44 = vcombine.low %v5403_v53, %v5410_v27  ;;  %v8768_v24 = vcombine.high %v5403_v53, %v5410_v27  ;;  %v4684_v2 = vpop.permute.xlu1 %4683 }
 0xa08   : > { %v8770_v28 = vcombine.low %v5523_v51, %v5530_v32  ;;  %v8772_v40 = vcombine.high %v5523_v51, %v5530_v32  ;;  %v8774_v62 = vcombine.low %v5539_v10, %v5546_v12  ;;  %v8776_v14 = vcombine.high %v5539_v10, %v5546_v12 }
 0xa09   : > { %v11666_v15 = vrot.slane %v8762_v39, %v10564_v61  ;;  %v11669_v22 = vrot.slane %v8764_v26, %v10564_v61  ;;  %v11672_v20 = vrot.slane %v8766_v44, %v10564_v61  ;;  %v4686_v52 = vpop.permute.xlu0 %4685  ;;  %v5233_v3 = vcombine.low %v11631_v4, %v11636_v60 }
 0xa0a   : > { %v11677_v57 = vrot.slane %v8768_v24, %v10564_v61  ;;  %v11680_v55 = vrot.slane %v8770_v28, %v10564_v61  ;;  %v11683_v46 = vrot.slane %v8772_v40, %v10564_v61  ;;  %v11686_v59 = vrot.slane %v8774_v62, %v10564_v61 }
 0xa0b   : > { %v4727_v35 = vcombine.low %v11641_v45, %v4684_v2  ;;  %v4728_v48 = vcombine.high %v11641_v45, %v4684_v2  ;;  %v4863_v23 = vcombine.low %v11647_v43, %v4686_v52  ;;  %v4864_v5 = vcombine.high %v11647_v43, %v4686_v52  ;;  %v4690_v58 = vpop.permute.xlu1 %4689 }
 0xa0c   : > { %v11693_v49 = vrot.slane %v8776_v14, %v10564_v61  ;;  %9156 = vmatmul.mubr.msk.bf16.vlgmr.msra.gmra.mrb[52].mxu1 %vm2716_vm1, %v6416_v13  ;;  %v4743_v41 = vcombine.low %v4678_v25, %v4690_v58  ;;  %v4744_v54 = vcombine.high %v4678_v25, %v4690_v58  ;;  %v5635_v37 = vcombine.low %v11666_v15, %v11669_v22 }
 0xa0d   : > { %v4735_v50 = vrot.slane %v4727_v35, %v10564_v61  ;;  %v4742_v63 = vrot.slane %v4728_v48, %v10564_v61  ;;  %v4871_v45 = vrot.slane %v4863_v23, %v10564_v61  ;;  %9160 = vmatpush3.bf16.xpose.msra.mxu1 %v11590_v42  ;;  %v4692_v43 = vpop.permute.xlu0 %4691  ;;  %v6417_v16 = vpack.c.bf16 %v5233_v3, %v5097_v34 }
 0xa0e   : > { %v4751_v56 = vrot.slane %v4743_v41, %v10564_v61  ;;  %v4758_v29 = vrot.slane %v4744_v54, %v10564_v61  ;;  %v4879_v13 = vcombine.low %v4680_v19, %v4692_v43  ;;  %v4880_v7 = vcombine.high %v4680_v19, %v4692_v43  ;;  %9161 = vmatprep.mubr.msk.bf16.mxu1 %vm10013_vm0, %v10012_v1 }
 0xa0f   : > { %v4878_v25 = vrot.slane %v4864_v5, %v10564_v61  ;;  %9165 = vmatprep.subr.bf16.mxu1 %v10012_v1  ;;  %v11709_v38 = vrot.slane %v5635_v37, %v10573_v11  ;;  %v5667_v42 = vcombine.low %v11672_v20, %v11677_v57  ;;  %v5771_v34 = vcombine.low %v11680_v55, %v11683_v46  ;;  %v11715_v19 = vpop.permute.xlu1 %5831 }
 0xa10   : > { %v4791_v8 = vcombine.low %v4735_v50, %v4751_v56  ;;  %v4792_v9 = vcombine.high %v4735_v50, %v4751_v56  ;;  %v4807_v53 = vcombine.low %v4742_v63, %v4758_v29  ;;  %v4808_v27 = vcombine.high %v4742_v63, %v4758_v29 }
 0xa11   : > { %v4887_v51 = vrot.slane %v4879_v13, %v10564_v61  ;;  %v4894_v32 = vrot.slane %v4880_v7, %v10564_v61  ;;  %v11719_v10 = vpop.permute.xlu0 %5829  ;;  %v11722_v12 = vrot.slane %v5667_v42, %v10573_v11  ;;  %v5803_v39 = vcombine.low %v11686_v59, %v11693_v49 }
 0xa12   : > { %v4799_v26 = vrot.slane %v4791_v8, %v10573_v11  ;;  %v4806_v44 = vrot.slane %v4792_v9, %v10573_v11  ;;  %v4815_v24 = vrot.slane %v4807_v53, %v10573_v11  ;;  %v4822_v2 = vrot.slane %v4808_v27, %v10573_v11 }
 0xa13   : > { %v4927_v28 = vcombine.low %v4871_v45, %v4887_v51  ;;  %v4928_v40 = vcombine.high %v4871_v45, %v4887_v51  ;;  %v4943_v62 = vcombine.low %v4878_v25, %v4894_v32  ;;  %v4944_v14 = vcombine.high %v4878_v25, %v4894_v32  ;;  %v5836_v45 = vpop.permute.xlu1 %5835 }
 0xa14   : > { %v8746_v52 = vcombine.low %v4799_v26, %v4806_v44  ;;  %v8748_v3 = vcombine.high %v4799_v26, %v4806_v44  ;;  %v8750_v35 = vcombine.low %v4815_v24, %v4822_v2  ;;  %v8752_v48 = vcombine.high %v4815_v24, %v4822_v2  ;;  %9162 = vmatmul.mubr.msk.bf16.vlgmr.msra.gmra.mrb[56].mxu1 %vm2716_vm1, %v6417_v16 }
 0xa15   : > { %v4935_v23 = vrot.slane %v4927_v28, %v10573_v11  ;;  %v4942_v5 = vrot.slane %v4928_v40, %v10573_v11  ;;  %v4951_v58 = vrot.slane %v4943_v62, %v10573_v11  ;;  %v4958_v41 = vrot.slane %v4944_v14, %v10573_v11  ;;  %9166 = vmatpush3.bf16.xpose.msra.mxu1 %v11621_v21  ;;  %v5838_v43 = vpop.permute.xlu0 %5837 }
 0xa16   : > { %v4982_v54 = vrot.slane %v8746_v52, %v10564_v61  ;;  %v4998_v37 = vrot.slane %v8748_v3, %v10564_v61  ;;  %v5014_v50 = vrot.slane %v8750_v35, %v10564_v61  ;;  %v5030_v63 = vrot.slane %v8752_v48, %v10564_v61  ;;  %9167 = vmatprep.mubr.msk.bf16.mxu1 %vm10013_vm0, %v10012_v1 }
 0xa17   : > { %v8754_v16 = vcombine.low %v4935_v23, %v4942_v5  ;;  %v8756_v56 = vcombine.high %v4935_v23, %v4942_v5  ;;  %v8758_v29 = vcombine.low %v4951_v58, %v4958_v41  ;;  %v8760_v13 = vcombine.high %v4951_v58, %v4958_v41  ;;  %9177 = vmatprep.subr.bf16.mxu1 %v10012_v1  ;;  %v5842_v40 = vpop.permute.xlu1 %5841 }
 0xa18   : > { %v5047_v21 = vcombine.low %v4982_v54, %v4998_v37  ;;  %v5048_v7 = vcombine.high %v4982_v54, %v4998_v37  ;;  %v5079_v25 = vcombine.low %v5014_v50, %v5030_v63  ;;  %v5080_v42 = vcombine.high %v5014_v50, %v5030_v63 }
 0xa19   : > { %v11744_v8 = vrot.slane %v8754_v16, %v10564_v61  ;;  %v11747_v9 = vrot.slane %v8756_v56, %v10564_v61  ;;  %v11750_v53 = vrot.slane %v8758_v29, %v10564_v61  ;;  %v11753_v27 = vrot.slane %v8760_v13, %v10564_v61  ;;  %v5844_v62 = vpop.permute.xlu0 %5843 }
 0xa1a   : > { %v11756_v51 = vrot.slane %v5771_v34, %v10573_v11  ;;  %v11763_v44 = vrot.slane %v5047_v21, %v10573_v11  ;;  %v5871_v24 = vcombine.low %v11456_v36, %v5836_v45  ;;  %v5872_v2 = vcombine.high %v11456_v36, %v5836_v45 }
 0xa1b   : > { %v5183_v32 = vcombine.low %v11744_v8, %v11747_v9  ;;  %v5215_v26 = vcombine.low %v11750_v53, %v11753_v27  ;;  %v11768_v28 = vrot.slane %v5803_v39, %v10573_v11  ;;  %v11771_v34 = vrot.slane %v5048_v7, %v10573_v11 }
 0xa1c   : > { %v11774_v14 = vrot.slane %v5079_v25, %v10573_v11  ;;  %v11777_v52 = vrot.slane %v5080_v42, %v10573_v11  ;;  %v5687_v3 = vcombine.low %v11709_v38, %v11722_v12  ;;  %v6007_v23 = vcombine.low %v11462_v30, %v5838_v43 }
 0xa1d   : > { %v11782_v35 = vrot.slane %v5183_v32, %v10573_v11  ;;  %v11785_v39 = vrot.slane %v5215_v26, %v10573_v11  ;;  %v5823_v48 = vcombine.low %v11756_v51, %v11768_v28  ;;  %v6008_v5 = vcombine.high %v11462_v30, %v5838_v43 }
 0xa1e   : > { %v5887_v58 = vcombine.low %v11719_v10, %v5842_v40  ;;  %v5888_v41 = vcombine.high %v11719_v10, %v5842_v40  ;;  %v6023_v54 = vcombine.low %v11715_v19, %v5844_v62  ;;  %v5879_v37 = vrot.slane %v5871_v24, %v10564_v61 }
 0xa1f   : > { %v5886_v50 = vrot.slane %v5872_v2, %v10564_v61  ;;  %v6427_v63 = vpack.c.bf16 %v5823_v48, %v5687_v3  ;;  %v6024_v45 = vcombine.high %v11715_v19, %v5844_v62  ;;  %v6015_v16 = vrot.slane %v6007_v23, %v10564_v61 }
 0xa20   : > { %v5895_v56 = vrot.slane %v5887_v58, %v10564_v61  ;;  %v5902_v29 = vrot.slane %v5888_v41, %v10564_v61  ;;  %v6031_v43 = vrot.slane %v6023_v54, %v10564_v61  ;;  %v6022_v10 = vrot.slane %v6008_v5, %v10564_v61 }
 0xa21   : > { %v6623_v13 = vsel %vm2716_vm1, %v6427_v63, 0  ;;  %v6038_v21 = vrot.slane %v6024_v45, %v10564_v61  ;;  %v5234_v7 = vcombine.high %v11631_v4, %v11636_v60  ;;  %v5184_v63 = vcombine.high %v11744_v8, %v11747_v9 }
 0xa22   : > { %9172 = vmatpush3.bf16.xpose.msra.mxu0 %v6623_v13  ;;  %v5935_v25 = vcombine.low %v5879_v37, %v5895_v56  ;;  %v5936_v19 = vcombine.high %v5879_v37, %v5895_v56  ;;  %v5951_v42 = vcombine.low %v5886_v50, %v5902_v29  ;;  %v5952_v32 = vcombine.high %v5886_v50, %v5902_v29 }
 0xa23   : > { %v6071_v26 = vcombine.low %v6015_v16, %v6031_v43  ;;  %v6072_v24 = vcombine.high %v6015_v16, %v6031_v43  ;;  %v6087_v2 = vcombine.low %v6022_v10, %v6038_v21  ;;  %v6088_v40 = vcombine.high %v6022_v10, %v6038_v21  ;;  %9183 = vmatprep.subr.bf16.mxu0 %v10012_v1 }
 0xa24   : > { %v5943_v62 = vrot.slane %v5935_v25, %v10573_v11  ;;  %v5950_v3 = vrot.slane %v5936_v19, %v10573_v11  ;;  %v5959_v48 = vrot.slane %v5951_v42, %v10573_v11  ;;  %v5966_v23 = vrot.slane %v5952_v32, %v10573_v11 }
 0xa25   : > { %v6079_v4 = vrot.slane %v6071_v26, %v10573_v11  ;;  %v6086_v60 = vrot.slane %v6072_v24, %v10573_v11  ;;  %v6095_v5 = vrot.slane %v6087_v2, %v10573_v11  ;;  %v6102_v58 = vrot.slane %v6088_v40, %v10573_v11 }
 0xa26   : > { %v8777_v41 = vcombine.low %v5943_v62, %v5950_v3  ;;  %v8779_v54 = vcombine.high %v5943_v62, %v5950_v3  ;;  %v8781_v37 = vcombine.low %v5959_v48, %v5966_v23  ;;  %v8783_v50 = vcombine.high %v5959_v48, %v5966_v23 }
 0xa27   : > { %v5216_v45 = vcombine.high %v11750_v53, %v11753_v27  ;;  %v8785_v16 = vcombine.low %v6079_v4, %v6086_v60  ;;  %v8787_v56 = vcombine.high %v6079_v4, %v6086_v60  ;;  %v8789_v29 = vcombine.low %v6095_v5, %v6102_v58 }
 0xa28   : > { %v8791_v43 = vcombine.high %v6095_v5, %v6102_v58  ;;  %v5098_v13 = vcombine.high %v11616_v18, %v11624_v17  ;;  %v5688_v10 = vcombine.high %v11709_v38, %v11722_v12  ;;  %v6151_v21 = vrot.slane %v8777_v41, %v10564_v61 }
 0xa29   : > { %v6167_v25 = vrot.slane %v8779_v54, %v10564_v61  ;;  %v6183_v19 = vrot.slane %v8781_v37, %v10564_v61  ;;  %v6199_v8 = vrot.slane %v8783_v50, %v10564_v61  ;;  %v5824_v53 = vcombine.high %v11756_v51, %v11768_v28 }
 0xa2a   : > { %v6418_v9 = vpack.c.bf16 %v5234_v7, %v5098_v13  ;;  %v5099_v27 = vcombine.low %v11763_v44, %v11774_v14  ;;  %v5235_v18 = vcombine.low %v11782_v35, %v11785_v39  ;;  %v6287_v17 = vrot.slane %v8785_v16, %v10564_v61 }
 0xa2b   : > { %v6303_v38 = vrot.slane %v8787_v56, %v10564_v61  ;;  %v5636_v12 = vcombine.high %v11666_v15, %v11669_v22  ;;  %v5668_v42 = vcombine.high %v11672_v20, %v11677_v57  ;;  %v6428_v7 = vpack.c.bf16 %v5824_v53, %v5688_v10 }
 0xa2c   : > { %9168 = vmatmul.mubr.msk.bf16.vlgmr.msra.gmra.mrb[60].mxu1 %vm2716_vm1, %v6418_v9  ;;  %v6419_v51 = vpack.c.bf16 %v5235_v18, %v5099_v27  ;;  %v5772_v28 = vcombine.high %v11680_v55, %v11683_v46  ;;  %v5804_v32 = vcombine.high %v11686_v59, %v11693_v49  ;;  %v6319_v26 = vrot.slane %v8789_v29, %v10564_v61 }
 0xa2d   : > { %v6335_v24 = vrot.slane %v8791_v43, %v10564_v61  ;;  %9179 = vmatprep.mubr.msk.bf16.mxu1 %vm10013_vm0, %v10012_v1  ;;  %v5650_v15 = vrot.slane %v5636_v12, %v10573_v11  ;;  %v5682_v22 = vrot.slane %v5668_v42, %v10573_v11  ;;  %v6670_v20 = vsel %vm2716_vm1, %v6428_v7, 0 }
 0xa2e   : > { %9174 = vmatmul.mubr.msk.bf16.vlgmr.msra.gmra.mrb[36].mxu0 %vm2716_vm1, %v6419_v51  ;;  %v5236_v57 = vcombine.high %v11782_v35, %v11785_v39  ;;  %v5786_v55 = vrot.slane %v5772_v28, %v10573_v11  ;;  %v5818_v46 = vrot.slane %v5804_v32, %v10573_v11  ;;  %v5198_v59 = vrot.slane %v5184_v63, %v10573_v11 }
 0xa2f   : > { %v5230_v49 = vrot.slane %v5216_v45, %v10573_v11  ;;  %9178 = vmatpush3.bf16.xpose.msra.mxu1 %v6670_v20  ;;  %v5100_v2 = vcombine.high %v11763_v44, %v11774_v14  ;;  %9185 = vmatprep.mubr.msk.bf16.mxu0 %vm10013_vm0, %v10012_v1  ;;  %v5689_v40 = vcombine.low %v5650_v15, %v5682_v22 }
 0xa30   : > { %9189 = vmatprep.subr.bf16.mxu1 %v10012_v1  ;;  %v5825_v62 = vcombine.low %v5786_v55, %v5818_v46  ;;  %v5690_v35 = vcombine.high %v5650_v15, %v5682_v22  ;;  %v5826_v39 = vcombine.high %v5786_v55, %v5818_v46  ;;  %v6207_v3 = vcombine.low %v6151_v21, %v6167_v25 }
 0xa31   : > { %v6239_v48 = vcombine.low %v6183_v19, %v6199_v8  ;;  %v6343_v23 = vcombine.low %v6287_v17, %v6303_v38  ;;  %v6375_v4 = vcombine.low %v6319_v26, %v6335_v24  ;;  %v6420_v60 = vpack.c.bf16 %v5236_v57, %v5100_v2 }
 0xa32   : > { %v6429_v5 = vpack.c.bf16 %v5825_v62, %v5689_v40  ;;  %v6430_v58 = vpack.c.bf16 %v5826_v39, %v5690_v35  ;;  %v6208_v41 = vcombine.high %v6151_v21, %v6167_v25  ;;  %v6215_v54 = vrot.slane %v6207_v3, %v10573_v11 }
 0xa33   : > { %v6247_v44 = vrot.slane %v6239_v48, %v10573_v11  ;;  %v6351_v14 = vrot.slane %v6343_v23, %v10573_v11  ;;  %v6383_v37 = vrot.slane %v6375_v4, %v10573_v11  ;;  %v6240_v45 = vcombine.high %v6183_v19, %v6199_v8 }
 0xa34   : > { %v6717_v50 = vsel %vm2716_vm1, %v6429_v5, 0  ;;  %v6222_v63 = vrot.slane %v6208_v41, %v10573_v11  ;;  %v5101_v16 = vcombine.low %v11771_v34, %v11777_v52  ;;  %v5237_v56 = vcombine.low %v5198_v59, %v5230_v49 }
 0xa35   : > { %9184 = vmatpush3.bf16.xpose.msra.mxu0 %v6717_v50  ;;  %v6407_v29 = vcombine.low %v6351_v14, %v6383_v37  ;;  %v6764_v43 = vsel %vm2716_vm1, %v6430_v58, 0  ;;  %v6254_v13 = vrot.slane %v6240_v45, %v10573_v11  ;;  %v6344_v10 = vcombine.high %v6287_v17, %v6303_v38 }
 0xa36   : > { %9180 = vmatmul.mubr.msk.bf16.vlgmr.msra.gmra.mrb[64].mxu1 %vm2716_vm1, %v6420_v60  ;;  %9195 = vmatprep.subr.bf16.mxu0 %v10012_v1  ;;  %v6376_v21 = vcombine.high %v6319_v26, %v6335_v24  ;;  %v5238_v25 = vcombine.high %v5198_v59, %v5230_v49  ;;  %v6271_v19 = vcombine.low %v6215_v54, %v6247_v44 }
 0xa37   : > { %9190 = vmatpush3.bf16.xpose.msra.mxu1 %v6764_v43  ;;  %9191 = vmatprep.mubr.msk.bf16.mxu1 %vm10013_vm0, %v10012_v1  ;;  %v6408_v8 = vcombine.high %v6351_v14, %v6383_v37  ;;  %v6273_v9 = vcombine.low %v6222_v63, %v6254_v13  ;;  %v6358_v53 = vrot.slane %v6344_v10, %v10573_v11 }
 0xa38   : > { %9201 = vmatprep.subr.bf16.mxu1 %v10012_v1  ;;  %v6390_v27 = vrot.slane %v6376_v21, %v10573_v11  ;;  %v6274_v18 = vcombine.high %v6222_v63, %v6254_v13  ;;  %v6991_v12 = vpack.c.bf16 %v6407_v29, %v6271_v19  ;;  %v6272_v42 = vcombine.high %v6215_v54, %v6247_v44 }
 0xa39   : > { %v6421_v7 = vpack.c.bf16 %v5237_v56, %v5101_v16  ;;  %v5102_v17 = vcombine.high %v11771_v34, %v11777_v52 }
 0xa3a   : > { %v6409_v38 = vcombine.low %v6358_v53, %v6390_v27  ;;  %v6410_v51 = vcombine.high %v6358_v53, %v6390_v27  ;;  %v6992_v28 = vpack.c.bf16 %v6408_v8, %v6272_v42 }
 0xa3b   : > { %v6422_v32 = vpack.c.bf16 %v5238_v25, %v5102_v17 }
 0xa3c   : > { %9186 = vmatmul.mubr.msk.bf16.vlgmr.msra.gmra.mrb[40].mxu0 %vm2716_vm1, %v6421_v7  ;;  %v11883_v26 = vpack.c.bf16 %v6409_v38, %v6273_v9  ;;  %v11885_v24 = vpack.c.bf16 %v6410_v51, %v6274_v18  ;;  %v11962_v38 = vpop.permute.xlu1 %5849 }
 0xa3d   : > { %9196 = vmatpush3.bf16.msra.mxu0 %v6991_v12  ;;  %9197 = vmatprep.mubr.msk.bf16.mxu0 %vm10013_vm0, %v10012_v1 }
 0xa3e   : > { %9192 = vmatmul.mubr.msk.bf16.vlgmr.msra.gmra.mrb[68].mxu1 %vm2716_vm1, %v6422_v32  ;;  %9207 = vmatprep.subr.bf16.mxu0 %v10012_v1 }
 0xa3f   : > { %9202 = vmatpush3.bf16.msra.mxu1 %v6992_v28  ;;  %9203 = vmatprep.mubr.msk.bf16.mxu1 %vm10013_vm0, %v10012_v1 }
 0xa40   : > { %9213 = vmatprep.subr.bf16.mxu1 %v10012_v1  ;;  %v11964_v51 = vpop.permute.xlu1 %5853 }
 0xad7   : > { %v11894_v34 = vpop.f32.mrb[48].mxu1 }
 0xad8   : > { %v9151_v52 = vpop.f32.mrb[49].mxu1  ;;  %v6807_v15 = vsel %vm2716_vm1, %v11894_v34, -inf }
 0xad9   : > { %6808 = vmax.xlane.f32.xlu1 %v6807_v15  ;;  %v11898_v22 = vpop.f32.mrb[50].mxu1 }
 0xada   : > { %v9152_v20 = vpop.f32.mrb[51].mxu1  ;;  %v6810_v54 = vsel %vm2716_vm1, %v11898_v22, -inf }
 0xadf   : > { %v11900_v57 = vpop.f32.mrb[52].mxu1 }
 0xae0   : > { %v9157_v55 = vpop.f32.mrb[53].mxu1  ;;  %v6813_v50 = vsel %vm2716_vm1, %v11900_v57, -inf }
 0xae1   : > { %v11902_v46 = vpop.f32.mrb[54].mxu1  ;;  %v11971_v55 = vpop.permute.xlu0 %5847 }
 0xae2   : > { %v9158_v59 = vpop.f32.mrb[55].mxu1  ;;  %v6816_v44 = vsel %vm2716_vm1, %v11902_v46, -inf }
 0xae5   : > { %v11973_v59 = vpop.permute.xlu0 %5855 }
 0xae7   : > { %v11904_v49 = vpop.f32.mrb[56].mxu1 }
 0xae8   : > { %v9163_v2 = vpop.f32.mrb[57].mxu1  ;;  %v6819_v9 = vsel %vm2716_vm1, %v11904_v49, -inf }
 0xae9   : > { %v11906_v40 = vpop.f32.mrb[58].mxu1 }
 0xaea   : > { %v9164_v62 = vpop.f32.mrb[59].mxu1  ;;  %v6822_v53 = vsel %vm2716_vm1, %v11906_v40, -inf }
 0xaff   : > { %v11908_v35 = vpop.f32.mrb[60].mxu1 }
 0xb00   : > { %v9169_v39 = vpop.f32.mrb[61].mxu1  ;;  %v6825_v27 = vsel %vm2716_vm1, %v11908_v35, -inf }
 0xb01   : > { %v11910_v3 = vpop.f32.mrb[62].mxu1  ;;  %v11912_v48 = vpop.f32.mrb[36].mxu0 }
 0xb02   : > { %v9170_v23 = vpop.f32.mrb[63].mxu1  ;;  %v9175_v4 = vpop.f32.mrb[37].mxu0  ;;  %v6831_v60 = vsel %vm2716_vm1, %v11912_v48, -inf  ;;  %v6828_v18 = vsel %vm2716_vm1, %v11910_v3, -inf }
 0xb03   : > { %6832 = vmax.xlane.f32.xlu0 %v6831_v60  ;;  %v11916_v5 = vpop.f32.mrb[38].mxu0 }
 0xb04   : > { %v9176_v58 = vpop.f32.mrb[39].mxu0  ;;  %v6834_v41 = vsel %vm2716_vm1, %v11916_v5, -inf }
 0xb05   : > { %6835 = vmax.xlane.f32.xlu1 %v6834_v41 }
 0xb07   : > { %6811 = vmax.xlane.f32.xlu0 %v6810_v54 }
 0xb09   : > { %v11924_v14 = vpop.f32.mrb[64].mxu1  ;;  %6817 = vmax.xlane.f32.xlu1 %v6816_v44 }
 0xb0a   : > { %v9181_v37 = vpop.f32.mrb[65].mxu1  ;;  %v6837_v12 = vsel %vm2716_vm1, %v11924_v14, -inf }
 0xb0b   : > { %v11928_v63 = vpop.f32.mrb[66].mxu1  ;;  %6814 = vmax.xlane.f32.xlu0 %v6813_v50 }
 0xb0c   : > { %v9182_v45 = vpop.f32.mrb[67].mxu1  ;;  %v6840_v42 = vsel %vm2716_vm1, %v11928_v63, -inf }
 0xb0f   : > { %v11930_v16 = vpop.f32.mrb[40].mxu0 }
 0xb10   : > { %v9187_v56 = vpop.f32.mrb[41].mxu0  ;;  %v6843_v29 = vsel %vm2716_vm1, %v11930_v16, -inf }
 0xb11   : > { %v11934_v43 = vpop.f32.mrb[68].mxu1  ;;  %v11936_v13 = vpop.f32.mrb[42].mxu0  ;;  %6844 = vmax.xlane.f32.xlu0 %v6843_v29 }
 0xb12   : > { %v9193_v10 = vpop.f32.mrb[69].mxu1  ;;  %v9188_v21 = vpop.f32.mrb[43].mxu0  ;;  %v6846_v25 = vsel %vm2716_vm1, %v11936_v13, -inf  ;;  %v6849_v7 = vsel %vm2716_vm1, %v11934_v43, -inf }
 0xb13   : > { %v11940_v19 = vpop.f32.mrb[70].mxu1  ;;  %6847 = vmax.xlane.f32.xlu1 %v6846_v25 }
 0xb14   : > { %v9194_v8 = vpop.f32.mrb[71].mxu1  ;;  %v6852_v17 = vsel %vm2716_vm1, %v11940_v19, -inf }
 0xb15   : > { %6820 = vmax.xlane.f32.xlu0 %v6819_v9 }
 0xb17   : > { %6823 = vmax.xlane.f32.xlu1 %v6822_v53 }
 0xb19   : > { %6826 = vmax.xlane.f32.xlu0 %v6825_v27 }
 0xb1b   : > { %6829 = vmax.xlane.f32.xlu1 %v6828_v18 }
 0xb1d   : > { %6838 = vmax.xlane.f32.xlu0 %v6837_v12 }
 0xb1f   : > { %6841 = vmax.xlane.f32.xlu1 %v6840_v42 }
 0xb21   : > { %6850 = vmax.xlane.f32.xlu0 %v6849_v7 }
 0xb23   : > { %6853 = vmax.xlane.f32.xlu1 %v6852_v17 }
 0xb34   : > { %5859 = vrot.lane.b32.xlu1 %v11456_v36, %s10019_s15 }
 0xb37   : > { %5861 = vrot.lane.b32.xlu0 %v11462_v30, %s10019_s15 }
 0xb66   : > { %v6809_v28 = vpop.xlane.xlu1 %6808 }
 0xb67   : > { %v6855_v32 = vsub.f32 %v11894_v34, %v6809_v28 }
 0xb69   : > { %v6871_v52 = vmul.f32 1.442695, %v6855_v32 }
 0xb6b   : > { %9630 = vpow2.f32 %v6871_v52 }
 0xb75   : > { %v11967_v15 = vpop.eup %9630 }
 0xb76   : > { %v6903_v20 = vsel %vm2716_vm1, %v11967_v15, 0.0 }
 0xb77   : > { %6904 = vadd.xlane.f32.xlu0 %v6903_v20 }
 0xb90   : > { %v6833_v2 = vpop.xlane.xlu0 %6832 }
 0xb91   : > { %v6863_v62 = vsub.f32 %v11912_v48, %v6833_v2 }
 0xb92   : > { %v6836_v39 = vpop.xlane.xlu1 %6835 }
 0xb93   : > { %v6887_v23 = vmul.f32 1.442695, %v6863_v62  ;;  %v6864_v4 = vsub.f32 %v11916_v5, %v6836_v39 }
 0xb94   : > { %v6812_v34 = vpop.xlane.xlu0 %6811 }
 0xb95   : > { %9632 = vpow2.f32 %v6887_v23  ;;  %v6856_v60 = vsub.f32 %v11898_v22, %v6812_v34  ;;  %v6889_v41 = vmul.f32 1.442695, %v6864_v4 }
 0xb96   : > { %v6818_v58 = vpop.xlane.xlu1 %6817 }
 0xb97   : > { %v6873_v54 = vmul.f32 1.442695, %v6856_v60  ;;  %v6858_v44 = vsub.f32 %v11902_v46, %v6818_v58 }
 0xb98   : > { %v6815_v37 = vpop.xlane.xlu0 %6814 }
 0xb99   : > { %9634 = vpow2.f32 %v6873_v54  ;;  %v6857_v50 = vsub.f32 %v11900_v57, %v6815_v37  ;;  %v6877_v45 = vmul.f32 1.442695, %v6858_v44 }
 0xb9a   : > { %9636 = vpow2.f32 %v6889_v41 }
 0xb9b   : > { %v6875_v48 = vmul.f32 1.442695, %v6857_v50 }
 0xb9d   : > { %9638 = vpow2.f32 %v6875_v48 }
 0xb9e   : > { %v6845_v56 = vpop.xlane.xlu0 %6844  ;;  %9640 = vpow2.f32 %v6877_v45 }
 0xb9f   : > { %v11980_v29 = vpop.eup %9632  ;;  %v6867_v5 = vsub.f32 %v11930_v16, %v6845_v56 }
 0xba0   : > { %v6848_v22 = vpop.xlane.xlu1 %6847  ;;  %v6927_v10 = vsel %vm2716_vm1, %v11980_v29, 0.0 }
 0xba1   : > { %v6868_v46 = vsub.f32 %v11936_v13, %v6848_v22  ;;  %6928 = vadd.xlane.f32.xlu0 %v6927_v10  ;;  %v6895_v48 = vmul.f32 1.442695, %v6867_v5 }
 0xba2   : > { %v6821_v21 = vpop.xlane.xlu0 %6820 }
 0xba3   : > { %v11986_v25 = vpop.eup %9634  ;;  %v6859_v57 = vsub.f32 %v11904_v49, %v6821_v21  ;;  %v6897_v22 = vmul.f32 1.442695, %v6868_v46 }
 0xba4   : > { %v6824_v8 = vpop.xlane.xlu1 %6823  ;;  %v6906_v9 = vsel %vm2716_vm1, %v11986_v25, 0.0  ;;  %v11991_v53 = vpop.eup %9636 }
 0xba5   : > { %v6860_v16 = vsub.f32 %v11906_v40, %v6824_v8  ;;  %v6879_v27 = vmul.f32 1.442695, %v6859_v57  ;;  %6907 = vadd.xlane.f32.xlu1 %v6906_v9  ;;  %v6930_v49 = vsel %vm2716_vm1, %v11991_v53, 0.0 }
 0xba6   : > { %v6827_v18 = vpop.xlane.xlu0 %6826 }
 0xba7   : > { %v11994_v12 = vpop.eup %9638  ;;  %v6881_v13 = vmul.f32 1.442695, %v6860_v16  ;;  %9642 = vpow2.f32 %v6879_v27  ;;  %v6861_v42 = vsub.f32 %v11908_v35, %v6827_v18 }
 0xba8   : > { %v6830_v7 = vpop.xlane.xlu1 %6829  ;;  %v6909_v17 = vsel %vm2716_vm1, %v11994_v12, 0.0  ;;  %v12001_v28 = vpop.eup %9640 }
 0xba9   : > { %9644 = vpow2.f32 %v6881_v13  ;;  %v6862_v40 = vsub.f32 %v11910_v3, %v6830_v7  ;;  %v6883_v32 = vmul.f32 1.442695, %v6861_v42  ;;  %6931 = vadd.xlane.f32.xlu1 %v6930_v49  ;;  %6910 = vadd.xlane.f32.xlu0 %v6909_v17  ;;  %v6912_v35 = vsel %vm2716_vm1, %v12001_v28, 0.0 }
 0xbaa   : > { %v6839_v60 = vpop.xlane.xlu0 %6838 }
 0xbab   : > { %v6885_v52 = vmul.f32 1.442695, %v6862_v40  ;;  %9646 = vpow2.f32 %v6883_v32  ;;  %v6865_v41 = vsub.f32 %v11924_v14, %v6839_v60 }
 0xbac   : > { %v6842_v58 = vpop.xlane.xlu1 %6841 }
 0xbad   : > { %9648 = vpow2.f32 %v6885_v52  ;;  %6913 = vadd.xlane.f32.xlu1 %v6912_v35  ;;  %v6866_v54 = vsub.f32 %v11928_v63, %v6842_v58  ;;  %v6891_v44 = vmul.f32 1.442695, %v6865_v41 }
 0xbae   : > { %v6851_v50 = vpop.xlane.xlu0 %6850 }
 0xbaf   : > { %v6893_v37 = vmul.f32 1.442695, %v6866_v54  ;;  %9650 = vpow2.f32 %v6891_v44  ;;  %v6869_v56 = vsub.f32 %v11934_v43, %v6851_v50 }
 0xbb0   : > { %v6854_v45 = vpop.xlane.xlu1 %6853 }
 0xbb1   : > { %v12006_v20 = vpop.eup %9642  ;;  %9652 = vpow2.f32 %v6893_v37 }
 0xbb2   : > { %v6915_v2 = vsel %vm2716_vm1, %v12006_v20, 0.0  ;;  %9654 = vpow2.f32 %v6895_v48  ;;  %v5862_v18 = vpop.permute.xlu0 %5861 }
 0xbb3   : > { %v12010_v62 = vpop.eup %9644  ;;  %6916 = vadd.xlane.f32.xlu1 %v6915_v2  ;;  %9656 = vpow2.f32 %v6897_v22  ;;  %v6039_v37 = vcombine.low %v11962_v38, %v5862_v18  ;;  %v6040_v48 = vcombine.high %v11962_v38, %v5862_v18 }
 0xbb4   : > { %v6918_v3 = vsel %vm2716_vm1, %v12010_v62, 0.0  ;;  %v5860_v13 = vpop.permute.xlu1 %5859 }
 0xbb5   : > { %v12014_v39 = vpop.eup %9646  ;;  %6919 = vadd.xlane.f32.xlu0 %v6918_v3  ;;  %v5903_v50 = vcombine.low %v11971_v55, %v5860_v13  ;;  %v6047_v38 = vrot.slane %v6039_v37, %v10564_v61 }
 0xbb6   : > { %v6921_v23 = vsel %vm2716_vm1, %v12014_v39, 0.0 }
 0xbb7   : > { %v12018_v4 = vpop.eup %9648 }
 0xbb8   : > { %v6924_v34 = vsel %vm2716_vm1, %v12018_v4, 0.0 }
 0xbb9   : > { %6925 = vadd.xlane.f32.xlu1 %v6924_v34  ;;  %6922 = vadd.xlane.f32.xlu0 %v6921_v23  ;;  %v12030_v14 = vpop.eup %9650 }
 0xbba   : > { %v6933_v43 = vsel %vm2716_vm1, %v12030_v14, 0.0 }
 0xbbb   : > { %v12032_v63 = vpop.eup %9652 }
 0xbbc   : > { %v12034_v21 = vpop.eup %9654  ;;  %v6936_v5 = vsel %vm2716_vm1, %v12032_v63, 0.0 }
 0xbbd   : > { %v12040_v46 = vpop.eup %9656  ;;  %v6939_v57 = vsel %vm2716_vm1, %v12034_v21, 0.0 }
 0xbbe   : > { %v6942_v8 = vsel %vm2716_vm1, %v12040_v46, 0.0 }
 0xbca   : > { %5865 = vrot.lane.b32.xlu1 %v11456_v36, %s10020_s8  ;;  %v6870_v36 = vsub.f32 %v11940_v19, %v6854_v45  ;;  %v5904_v45 = vcombine.high %v11971_v55, %v5860_v13  ;;  %v5911_v55 = vrot.slane %v5903_v50, %v10564_v61 }
 0xbcc   : > { %v6901_v10 = vmul.f32 1.442695, %v6870_v36 }
 0xbcf   : > { %5867 = vrot.lane.b32.xlu0 %v11462_v30, %s10020_s8  ;;  %v6899_v30 = vmul.f32 1.442695, %v6869_v56 }
 0xbd1   : > { %9658 = vpow2.f32 %v6899_v30 }
 0xbd2   : > { %9660 = vpow2.f32 %v6901_v10 }
 0xbdb   : > { %v12042_v19 = vpop.eup %9658 }
 0xbdc   : > { %v12048_v9 = vpop.eup %9660  ;;  %v6945_v27 = vsel %vm2716_vm1, %v12042_v19, 0.0 }
 0xbdd   : > { %v6948_v16 = vsel %vm2716_vm1, %v12048_v9, 0.0 }
 0xbee   : > { %6937 = vadd.xlane.f32.xlu1 %v6936_v5  ;;  %6934 = vadd.xlane.f32.xlu0 %v6933_v43  ;;  %v5918_v5 = vrot.slane %v5904_v45, %v10564_v61 }
 0xbf2   : > { %6940 = vadd.xlane.f32.xlu1 %v6939_v57  ;;  %6943 = vadd.xlane.f32.xlu0 %v6942_v8  ;;  %v6054_v8 = vrot.slane %v6040_v48, %v10564_v61 }
 0xbf6   : > { %6949 = vadd.xlane.f32.xlu1 %v6948_v16  ;;  %6946 = vadd.xlane.f32.xlu0 %v6945_v27 }
 0xc04   : > { %v6905_v42 = vpop.xlane.xlu0 %6904 }
 0xc05   : > { %9662 = vrcp.f32 %v6905_v42 }
 0xc0f   : > { %v9663_v52 = vpop.eup %9662 }
 0xc10   : > { %v6967_v2 = vmul.f32 %v9663_v52, %v11967_v15 }
 0xc2e   : > { %v6929_v7 = vpop.xlane.xlu0 %6928 }
 0xc32   : > { %v6908_v49 = vpop.xlane.xlu1 %6907 }
 0xc33   : > { %9664 = vrcp.f32 %v6908_v49 }
 0xc36   : > { %v6932_v17 = vpop.xlane.xlu1 %6931  ;;  %v6911_v40 = vpop.xlane.xlu0 %6910 }
 0xc37   : > { %9666 = vrcp.f32 %v6911_v40 }
 0xc3a   : > { %v6914_v32 = vpop.xlane.xlu1 %6913 }
 0xc3b   : > { %9668 = vrcp.f32 %v6914_v32 }
 0xc3d   : > { %v9665_v35 = vpop.eup %9664 }
 0xc3e   : > { %v6968_v3 = vmul.f32 %v9665_v35, %v11986_v25 }
 0xc40   : > { %v6917_v23 = vpop.xlane.xlu1 %6916  ;;  %v6983_v34 = vpack.c.bf16 %v6968_v3, %v6967_v2 }
 0xc41   : > { %9670 = vrcp.f32 %v6917_v23  ;;  %v9667_v58 = vpop.eup %9666 }
 0xc42   : > { %v6920_v60 = vpop.xlane.xlu0 %6919  ;;  %9198 = vmatmul.mubr.msk.bf16.vlgmr.msra.gmra.mrb[44].mxu0 %vm2716_vm1, %v6983_v34  ;;  %v6969_v15 = vmul.f32 %v9667_v58, %v11994_v12 }
 0xc43   : > { %9672 = vrcp.f32 %v6920_v60  ;;  %9208 = vmatpush3.bf16.msra.mxu0 %v11883_v26  ;;  %9209 = vmatprep.mubr.msk.bf16.mxu0 %vm10013_vm0, %v10012_v1 }
 0xc44   : > { %9219 = vmatprep.subr.bf16.mxu0 %v10012_v1 }
 0xc45   : > { %v9669_v41 = vpop.eup %9668 }
 0xc46   : > { %v6970_v25 = vmul.f32 %v9669_v41, %v12001_v28  ;;  %v6926_v54 = vpop.xlane.xlu1 %6925  ;;  %v6923_v44 = vpop.xlane.xlu0 %6922 }
 0xc47   : > { %9674 = vrcp.f32 %v6926_v54 }
 0xc48   : > { %9676 = vrcp.f32 %v6923_v44  ;;  %v6984_v26 = vpack.c.bf16 %v6970_v25, %v6969_v15 }
 0xc49   : > { %9678 = vrcp.f32 %v6929_v7 }
 0xc4a   : > { %v5866_v56 = vpop.permute.xlu1 %5865  ;;  %v5868_v22 = vpop.permute.xlu0 %5867  ;;  %9204 = vmatmul.mubr.msk.bf16.vlgmr.msra.gmra.mrb[72].mxu1 %vm2716_vm1, %v6984_v26  ;;  %9680 = vrcp.f32 %v6932_v17 }
 0xc4b   : > { %v9671_v12 = vpop.eup %9670  ;;  %v5919_v28 = vcombine.low %v11964_v51, %v5866_v56  ;;  %v5920_v36 = vcombine.high %v11964_v51, %v5866_v56  ;;  %v6055_v30 = vcombine.low %v11973_v59, %v5868_v22  ;;  %v6056_v10 = vcombine.high %v11973_v59, %v5868_v22  ;;  %9214 = vmatpush3.bf16.msra.mxu1 %v11885_v24 }
 0xc4c   : > { %9215 = vmatprep.mubr.msk.bf16.mxu1 %vm10013_vm0, %v10012_v1  ;;  %9225 = vmatprep.subr.bf16.mxu1 %v10012_v1  ;;  %v6971_v27 = vmul.f32 %v9671_v12, %v12006_v20 }
 0xc4d   : > { %v9673_v43 = vpop.eup %9672  ;;  %v5927_v51 = vrot.slane %v5919_v28, %v10564_v61  ;;  %v5934_v57 = vrot.slane %v5920_v36, %v10564_v61  ;;  %v6063_v59 = vrot.slane %v6055_v30, %v10564_v61  ;;  %v6070_v24 = vrot.slane %v6056_v10, %v10564_v61 }
 0xc4e   : > { %v6972_v16 = vmul.f32 %v9673_v43, %v12010_v62 }
 0xc4f   : > { %v5967_v18 = vcombine.low %v5911_v55, %v5927_v51  ;;  %v5968_v13 = vcombine.high %v5911_v55, %v5927_v51  ;;  %v5983_v42 = vcombine.low %v5918_v5, %v5934_v57  ;;  %v5984_v7 = vcombine.high %v5918_v5, %v5934_v57 }
 0xc50   : > { %v6103_v49 = vcombine.low %v6047_v38, %v6063_v59  ;;  %v6104_v40 = vcombine.high %v6047_v38, %v6063_v59  ;;  %v6119_v32 = vcombine.low %v6054_v8, %v6070_v24  ;;  %v6120_v52 = vcombine.high %v6054_v8, %v6070_v24 }
 0xc51   : > { %v9675_v35 = vpop.eup %9674  ;;  %v5975_v2 = vrot.slane %v5967_v18, %v10573_v11  ;;  %v5982_v3 = vrot.slane %v5968_v13, %v10573_v11  ;;  %v5991_v23 = vrot.slane %v5983_v42, %v10573_v11  ;;  %v5998_v17 = vrot.slane %v5984_v7, %v10573_v11 }
 0xc52   : > { %v9677_v62 = vpop.eup %9676  ;;  %v6974_v20 = vmul.f32 %v9675_v35, %v12018_v4  ;;  %v6111_v34 = vrot.slane %v6103_v49, %v10573_v11  ;;  %v6118_v60 = vrot.slane %v6104_v40, %v10573_v11  ;;  %v6127_v58 = vrot.slane %v6119_v32, %v10573_v11 }
 0xc53   : > { %v6973_v41 = vmul.f32 %v9677_v62, %v12014_v39  ;;  %v8778_v15 = vcombine.low %v5975_v2, %v5982_v3  ;;  %v8780_v25 = vcombine.high %v5975_v2, %v5982_v3  ;;  %v8782_v54 = vcombine.low %v5991_v23, %v5998_v17  ;;  %v9679_v22 = vpop.eup %9678 }
 0xc54   : > { %v8784_v44 = vcombine.high %v5991_v23, %v5998_v17  ;;  %v6134_v37 = vrot.slane %v6120_v52, %v10573_v11  ;;  %v8786_v50 = vcombine.low %v6111_v34, %v6118_v60  ;;  %v8788_v45 = vcombine.high %v6111_v34, %v6118_v60  ;;  %v9681_v38 = vpop.eup %9680 }
 0xc55   : > { %v6158_v26 = vrot.slane %v8778_v15, %v10564_v61  ;;  %v6174_v4 = vrot.slane %v8780_v25, %v10564_v61  ;;  %v6190_v48 = vrot.slane %v8782_v54, %v10564_v61  ;;  %v6985_v56 = vpack.c.bf16 %v6972_v16, %v6971_v27 }
 0xc56   : > { %v6206_v12 = vrot.slane %v8784_v44, %v10564_v61  ;;  %v6294_v39 = vrot.slane %v8786_v50, %v10564_v61  ;;  %v6310_v28 = vrot.slane %v8788_v45, %v10564_v61  ;;  %v8790_v36 = vcombine.low %v6127_v58, %v6134_v37 }
 0xc57   : > { %v8792_v30 = vcombine.high %v6127_v58, %v6134_v37  ;;  %9210 = vmatmul.mubr.msk.bf16.vlgmr.msra.gmra.mrb[48].mxu0 %vm2716_vm1, %v6985_v56  ;;  %v6986_v10 = vpack.c.bf16 %v6974_v20, %v6973_v41  ;;  %v6223_v55 = vcombine.low %v6158_v26, %v6174_v4  ;;  %v6224_v5 = vcombine.high %v6158_v26, %v6174_v4 }
 0xc58   : > { %v6326_v43 = vrot.slane %v8790_v36, %v10564_v61  ;;  %v6255_v51 = vcombine.low %v6190_v48, %v6206_v12  ;;  %v6359_v57 = vcombine.low %v6294_v39, %v6310_v28  ;;  %9221 = vmatprep.mubr.msk.bf16.mxu0 %vm10013_vm0, %v10012_v1  ;;  %v6256_v59 = vcombine.high %v6190_v48, %v6206_v12 }
 0xc59   : > { %v6342_v24 = vrot.slane %v8792_v30, %v10564_v61  ;;  %9216 = vmatmul.mubr.msk.bf16.vlgmr.msra.gmra.mrb[76].mxu1 %vm2716_vm1, %v6986_v10  ;;  %v6231_v8 = vrot.slane %v6223_v55, %v10573_v11  ;;  %v6360_v16 = vcombine.high %v6294_v39, %v6310_v28  ;;  %v6238_v7 = vrot.slane %v6224_v5, %v10573_v11 }
 0xc5a   : > { %v6263_v27 = vrot.slane %v6255_v51, %v10573_v11  ;;  %9227 = vmatprep.mubr.msk.bf16.mxu1 %vm10013_vm0, %v10012_v1  ;;  %v6367_v18 = vrot.slane %v6359_v57, %v10573_v11  ;;  %v6270_v49 = vrot.slane %v6256_v59, %v10573_v11  ;;  %v6976_v17 = vmul.f32 %v9681_v38, %v11991_v53  ;;  %v9705_v38 = vld [vmem:[#allocation10] sm:$0xff]   ;;  %v9710_v51 = vld [vmem:[#allocation10 + $0x28] sm:$0xff]   ;;  %v9711_v57 = vld [vmem:[#allocation10 + $0x30] sm:$0xff]  }
 0xc5b   : > { %v6391_v13 = vcombine.low %v6326_v43, %v6342_v24  ;;  %v6392_v42 = vcombine.high %v6326_v43, %v6342_v24  ;;  %v6374_v40 = vrot.slane %v6360_v16, %v10573_v11  ;;  %v6975_v58 = vmul.f32 %v9679_v22, %v11980_v29  ;;  %v9709_v43 = vld [vmem:[#allocation10 + $0x20] sm:$0xff]  }
 0xc5c   : > { %v6275_v32 = vcombine.low %v6231_v8, %v6263_v27  ;;  %v6276_v35 = vcombine.high %v6231_v8, %v6263_v27  ;;  %v6277_v34 = vcombine.low %v6238_v7, %v6270_v49  ;;  %v6278_v4 = vcombine.high %v6238_v7, %v6270_v49 }
 0xc5d   : > { %v6399_v52 = vrot.slane %v6391_v13, %v10573_v11  ;;  %v6406_v2 = vrot.slane %v6392_v42, %v10573_v11  ;;  %v6987_v41 = vpack.c.bf16 %v6976_v17, %v6975_v58 }
 0xc5f   : > { %v6411_v3 = vcombine.low %v6367_v18, %v6399_v52  ;;  %v6412_v23 = vcombine.high %v6367_v18, %v6399_v52  ;;  %v6413_v60 = vcombine.low %v6374_v40, %v6406_v2  ;;  %v6414_v48 = vcombine.high %v6374_v40, %v6406_v2 }
 0xc61   : > { %v6995_v62 = vpack.c.bf16 %v6411_v3, %v6275_v32  ;;  %v6996_v20 = vpack.c.bf16 %v6412_v23, %v6276_v35  ;;  %v6997_v15 = vpack.c.bf16 %v6413_v60, %v6277_v34  ;;  %v6998_v36 = vpack.c.bf16 %v6414_v48, %v6278_v4 }
 0xc63   : > { %9220 = vmatpush3.bf16.msra.mxu0 %v6995_v62  ;;  %9226 = vmatpush3.bf16.msra.mxu1 %v6996_v20 }
 0xc64   : > { %9231 = vmatprep.subr.bf16.mxu0 %v10012_v1  ;;  %9237 = vmatprep.subr.bf16.mxu1 %v10012_v1 }
 0xc66   : > { %9222 = vmatmul.mubr.msk.bf16.vlgmr.msra.gmra.mrb[52].mxu0 %vm2716_vm1, %v6987_v41 }
 0xc67   : > { %9232 = vmatpush3.bf16.msra.mxu0 %v6997_v15  ;;  %9233 = vmatprep.mubr.msk.bf16.mxu0 %vm10013_vm0, %v10012_v1 }
 0xc68   : > { %9243 = vmatprep.subr.bf16.mxu0 %v10012_v1 }
 0xc7b   : > { %v6938_v53 = vpop.xlane.xlu1 %6937  ;;  %v6935_v25 = vpop.xlane.xlu0 %6934 }
 0xc7c   : > { %9682 = vrcp.f32 %v6938_v53 }
 0xc7d   : > { %9684 = vrcp.f32 %v6935_v25 }
 0xc7f   : > { %v6941_v29 = vpop.xlane.xlu1 %6940  ;;  %v6944_v54 = vpop.xlane.xlu0 %6943 }
 0xc80   : > { %9686 = vrcp.f32 %v6941_v29 }
 0xc81   : > { %9688 = vrcp.f32 %v6944_v54 }
 0xc83   : > { %v6950_v44 = vpop.xlane.xlu1 %6949  ;;  %v6947_v37 = vpop.xlane.xlu0 %6946 }
 0xc84   : > { %9690 = vrcp.f32 %v6950_v44 }
 0xc85   : > { %9692 = vrcp.f32 %v6947_v37 }
 0xc86   : > { %v9683_v50 = vpop.eup %9682 }
 0xc87   : > { %v9685_v45 = vpop.eup %9684  ;;  %v6978_v26 = vmul.f32 %v9683_v50, %v12032_v63 }
 0xc88   : > { %v6977_v56 = vmul.f32 %v9685_v45, %v12030_v14 }
 0xc8a   : > { %v9687_v22 = vpop.eup %9686  ;;  %v6988_v12 = vpack.c.bf16 %v6978_v26, %v6977_v56 }
 0xc8b   : > { %v9689_v39 = vpop.eup %9688  ;;  %v6979_v28 = vmul.f32 %v9687_v22, %v12034_v21 }
 0xc8c   : > { %v6980_v30 = vmul.f32 %v9689_v39, %v12040_v46  ;;  %9228 = vmatmul.mubr.msk.bf16.vlgmr.msra.gmra.mrb[80].mxu1 %vm2716_vm1, %v6988_v12  ;;  %v9706_v46 = vld [vmem:[#allocation10 + $0x8] sm:$0xff]  }
 0xc8d   : > { %9238 = vmatpush3.bf16.msra.mxu1 %v6998_v36  ;;  %9239 = vmatprep.mubr.msk.bf16.mxu1 %vm10013_vm0, %v10012_v1 }
 0xc8e   : > { %v9691_v10 = vpop.eup %9690  ;;  %v6989_v63 = vpack.c.bf16 %v6980_v30, %v6979_v28 }
 0xc8f   : > { %v9693_v55 = vpop.eup %9692  ;;  %v6982_v5 = vmul.f32 %v9691_v10, %v12048_v9  ;;  %v9707_v9 = vld [vmem:[#allocation10 + $0x10] sm:$0xff]  }
 0xc90   : > { %v6981_v14 = vmul.f32 %v9693_v55, %v12042_v19  ;;  %9234 = vmatmul.mubr.msk.bf16.vlgmr.msra.gmra.mrb[56].mxu0 %vm2716_vm1, %v6989_v63  ;;  %v9708_v19 = vld [vmem:[#allocation10 + $0x18] sm:$0xff]  }
 0xc91   : > { %9244 = vmatpush3.bf16.msra.mxu0 %v9705_v38  ;;  %9259 = vmatprep.mubr.msk.bf16.mxu0 %vm10013_vm0, %v10012_v1 }
 0xc92   : > { %v6990_v21 = vpack.c.bf16 %v6982_v5, %v6981_v14  ;;  %9245 = vmatprep.subr.bf16.mxu0 %v10012_v1 }
 0xc94   : > { %9240 = vmatmul.mubr.msk.bf16.vlgmr.msra.gmra.mrb[84].mxu1 %vm2716_vm1, %v6990_v21 }
 0xc95   : > { %9246 = vmatpush3.bf16.msra.mxu0 %v9706_v46  ;;  %8176 = vmatprep.mubr.bf16.mxu1 %v10011_v0  ;;  %v9712_v0 = vld [vmem:[#allocation10 + $0x38] sm:$0xff]  }
 0xc96   : > { %9247 = vmatprep.subr.bf16.mxu0 %v10012_v1 }
 0xc99   : > { %9248 = vmatpush3.bf16.msra.mxu0 %v9707_v9 }
 0xc9a   : > { %9249 = vmatprep.subr.bf16.mxu0 %v10012_v1 }
 0xc9d   : > { %9250 = vmatpush3.bf16.msra.mxu0 %v9708_v19 }
 0xc9e   : > { %9251 = vmatprep.subr.bf16.mxu0 %v10012_v1 }
 0xca1   : > { %9252 = vmatpush3.bf16.msra.mxu0 %v9709_v43 }
 0xca2   : > { %9253 = vmatprep.subr.bf16.mxu0 %v10012_v1 }
 0xca5   : > { %9254 = vmatpush3.bf16.msra.mxu0 %v9710_v51 }
 0xca6   : > { %9255 = vmatprep.subr.bf16.mxu0 %v10012_v1 }
 0xca9   : > { %9256 = vmatpush3.bf16.msra.mxu0 %v9711_v57 }
 0xcaa   : > { %9257 = vmatprep.subr.bf16.mxu0 %v10012_v1 }
 0xcad   : > { %9258 = vmatpush3.bf16.msra.mxu0 %v9712_v0 }
 0xd15   : > { %v7036_v59 = vpop.f32.mrb[44].mxu0 }
 0xd16   : > { %v9199_v24 = vpop.f32.mrb[45].mxu0 }
 0xd17   : > { %v7039_v8 = vpop.f32.mrb[46].mxu0 }
 0xd18   : > { %v9200_v16 = vpop.f32.mrb[47].mxu0 }
 0xd1d   : > { %v7080_v27 = vpop.f32.mrb[72].mxu1 }
 0xd1e   : > { %v9205_v18 = vpop.f32.mrb[73].mxu1 }
 0xd1f   : > { %v7083_v13 = vpop.f32.mrb[74].mxu1 }
 0xd20   : > { %v9206_v42 = vpop.f32.mrb[75].mxu1 }
 0xd2a   : > { %v7124_v7 = vpop.f32.mrb[48].mxu0 }
 0xd2b   : > { %v7351_v49 = vcombine.low %v7036_v59, %v7124_v7  ;;  %v7352_v40 = vcombine.high %v7036_v59, %v7124_v7  ;;  %v9211_v32 = vpop.f32.mrb[49].mxu0 }
 0xd2c   : > { %v7127_v52 = vpop.f32.mrb[50].mxu0  ;;  %v7168_v35 = vpop.f32.mrb[76].mxu1 }
 0xd2d   : > { %v7487_v2 = vcombine.low %v7039_v8, %v7127_v52  ;;  %v7488_v3 = vcombine.high %v7039_v8, %v7127_v52  ;;  %v9212_v23 = vpop.f32.mrb[51].mxu0  ;;  %v9217_v1 = vpop.f32.mrb[77].mxu1  ;;  %v7367_v17 = vcombine.low %v7080_v27, %v7168_v35  ;;  %v7368_v62 = vcombine.high %v7080_v27, %v7168_v35 }
 0xd2e   : > { %v7171_v20 = vpop.f32.mrb[78].mxu1  ;;  %v7359_v41 = vrot.slane %v7351_v49, %v10564_v61  ;;  %v7366_v15 = vrot.slane %v7352_v40, %v10564_v61 }
 0xd2f   : > { %v7503_v34 = vcombine.low %v7083_v13, %v7171_v20  ;;  %v7504_v60 = vcombine.high %v7083_v13, %v7171_v20  ;;  %v9218_v58 = vpop.f32.mrb[79].mxu1  ;;  %v7375_v53 = vrot.slane %v7367_v17, %v10564_v61  ;;  %v7382_v25 = vrot.slane %v7368_v62, %v10564_v61 }
 0xd30   : > { %v7495_v29 = vrot.slane %v7487_v2, %v10564_v61  ;;  %v7502_v54 = vrot.slane %v7488_v3, %v10564_v61 }
 0xd31   : > { %v7511_v44 = vrot.slane %v7503_v34, %v10564_v61  ;;  %v7518_v37 = vrot.slane %v7504_v60, %v10564_v61  ;;  %v7415_v50 = vcombine.low %v7359_v41, %v7375_v53  ;;  %v7416_v45 = vcombine.high %v7359_v41, %v7375_v53 }
 0xd32   : > { %v7431_v26 = vcombine.low %v7366_v15, %v7382_v25  ;;  %v7432_v4 = vcombine.high %v7366_v15, %v7382_v25 }
 0xd33   : > { %v7551_v48 = vcombine.low %v7495_v29, %v7511_v44  ;;  %v7552_v56 = vcombine.high %v7495_v29, %v7511_v44  ;;  %v7567_v22 = vcombine.low %v7502_v54, %v7518_v37  ;;  %v7568_v12 = vcombine.high %v7502_v54, %v7518_v37 }
 0xd34   : > { %v7423_v39 = vrot.slane %v7415_v50, %v10573_v11  ;;  %v7430_v28 = vrot.slane %v7416_v45, %v10573_v11  ;;  %v7439_v36 = vrot.slane %v7431_v26, %v10573_v11  ;;  %v7446_v30 = vrot.slane %v7432_v4, %v10573_v11 }
 0xd35   : > { %v7559_v10 = vrot.slane %v7551_v48, %v10573_v11  ;;  %v7566_v63 = vrot.slane %v7552_v56, %v10573_v11  ;;  %v7575_v55 = vrot.slane %v7567_v22, %v10573_v11  ;;  %v7582_v5 = vrot.slane %v7568_v12, %v10573_v11 }
 0xd36   : > { %v8809_v14 = vcombine.low %v7423_v39, %v7430_v28  ;;  %v8811_v38 = vcombine.high %v7423_v39, %v7430_v28  ;;  %v8813_v21 = vcombine.low %v7439_v36, %v7446_v30  ;;  %v8815_v46 = vcombine.high %v7439_v36, %v7446_v30 }
 0xd37   : > { %v8817_v9 = vcombine.low %v7559_v10, %v7566_v63  ;;  %v8819_v19 = vcombine.high %v7559_v10, %v7566_v63  ;;  %v8821_v43 = vcombine.low %v7575_v55, %v7582_v5  ;;  %v8823_v51 = vcombine.high %v7575_v55, %v7582_v5 }
 0xd38   : > { %v7631_v57 = vrot.slane %v8809_v14, %v10564_v61  ;;  %v7647_v0 = vrot.slane %v8811_v38, %v10564_v61  ;;  %v7663_v59 = vrot.slane %v8813_v21, %v10564_v61  ;;  %v7679_v24 = vrot.slane %v8815_v46, %v10564_v61 }
 0xd39   : > { %v7767_v8 = vrot.slane %v8817_v9, %v10564_v61  ;;  %v7783_v16 = vrot.slane %v8819_v19, %v10564_v61  ;;  %v7799_v27 = vrot.slane %v8821_v43, %v10564_v61  ;;  %v7815_v18 = vrot.slane %v8823_v51, %v10564_v61  ;;  %v7212_v13 = vpop.f32.mrb[52].mxu0 }
 0xd3a   : > { %v9223_v42 = vpop.f32.mrb[53].mxu0  ;;  %v7688_v7 = vcombine.high %v7631_v57, %v7647_v0  ;;  %v7720_v49 = vcombine.high %v7663_v59, %v7679_v24  ;;  %v7687_v40 = vcombine.low %v7631_v57, %v7647_v0  ;;  %v7719_v32 = vcombine.low %v7663_v59, %v7679_v24 }
 0xd3b   : > { %v7215_v52 = vpop.f32.mrb[54].mxu0  ;;  %v7824_v35 = vcombine.high %v7767_v8, %v7783_v16  ;;  %v7856_v2 = vcombine.high %v7799_v27, %v7815_v18  ;;  %v7823_v3 = vcombine.low %v7767_v8, %v7783_v16  ;;  %v7855_v23 = vcombine.low %v7799_v27, %v7815_v18 }
 0xd3c   : > { %v9224_v1 = vpop.f32.mrb[55].mxu0  ;;  %v7702_v17 = vrot.slane %v7688_v7, %v10573_v11  ;;  %v7734_v62 = vrot.slane %v7720_v49, %v10573_v11  ;;  %v12174_v20 = vrot.slane %v7687_v40, %v10573_v11  ;;  %v12177_v34 = vrot.slane %v7719_v32, %v10573_v11 }
 0xd3d   : > { %v7838_v60 = vrot.slane %v7824_v35, %v10573_v11  ;;  %v7870_v58 = vrot.slane %v7856_v2, %v10573_v11  ;;  %v12182_v41 = vrot.slane %v7823_v3, %v10573_v11  ;;  %v12185_v15 = vrot.slane %v7855_v23, %v10573_v11 }
 0xd3e   : > { %v7753_v53 = vcombine.low %v7702_v17, %v7734_v62  ;;  %v7752_v25 = vcombine.high %v12174_v20, %v12177_v34  ;;  %v7754_v29 = vcombine.high %v7702_v17, %v7734_v62  ;;  %v7751_v54 = vcombine.low %v12174_v20, %v12177_v34 }
 0xd3f   : > { %v7889_v44 = vcombine.low %v7838_v60, %v7870_v58  ;;  %v7888_v37 = vcombine.high %v12182_v41, %v12185_v15  ;;  %v7890_v50 = vcombine.high %v7838_v60, %v7870_v58  ;;  %v7887_v45 = vcombine.low %v12182_v41, %v12185_v15 }
 0xd41   : > { %v9420_v26 = vpack.i.bf16 %v7889_v44, %v7753_v53  ;;  %v9415_v4 = vpack.i.bf16 %v7888_v37, %v7752_v25  ;;  %v9425_v48 = vpack.i.bf16 %v7890_v50, %v7754_v29 }
 0xd43   : > { %9421 = vrot.lane.b32.xlu1 %v9420_v26, %s10019_s15  ;;  %9416 = vrot.lane.b32.xlu0 %v9415_v4, %s10020_s8  ;;  %s12426_s15 = sld [smem:[#allocation34_spill]] }
 0xd47   : > { %9426 = vrot.lane.b32.xlu1 %v9425_v48, %s10018_s14 }
 0xd5f   : > { %v7256_v56 = vpop.f32.mrb[80].mxu1 }
 0xd60   : > { %v9229_v22 = vpop.f32.mrb[81].mxu1 }
 0xd61   : > { %v7259_v12 = vpop.f32.mrb[82].mxu1 }
 0xd62   : > { %v9230_v39 = vpop.f32.mrb[83].mxu1 }
 0xd63   : > { %v7300_v28 = vpop.f32.mrb[56].mxu0 }
 0xd64   : > { %v7383_v36 = vcombine.low %v7212_v13, %v7300_v28  ;;  %v7384_v30 = vcombine.high %v7212_v13, %v7300_v28  ;;  %v9235_v10 = vpop.f32.mrb[57].mxu0 }
 0xd65   : > { %v7303_v63 = vpop.f32.mrb[58].mxu0 }
 0xd66   : > { %v7519_v55 = vcombine.low %v7215_v52, %v7303_v63  ;;  %v7520_v5 = vcombine.high %v7215_v52, %v7303_v63  ;;  %v9236_v14 = vpop.f32.mrb[59].mxu0  ;;  %v7391_v19 = vrot.slane %v7383_v36, %v10564_v61  ;;  %v7398_v43 = vrot.slane %v7384_v30, %v10564_v61 }
 0xd67   : > { %v7344_v38 = vpop.f32.mrb[84].mxu1 }
 0xd68   : > { %v7399_v21 = vcombine.low %v7256_v56, %v7344_v38  ;;  %v7400_v46 = vcombine.high %v7256_v56, %v7344_v38  ;;  %v9241_v9 = vpop.f32.mrb[85].mxu1  ;;  %v7527_v42 = vrot.slane %v7519_v55, %v10564_v61  ;;  %v7534_v7 = vrot.slane %v7520_v5, %v10564_v61 }
 0xd69   : > { %v7347_v51 = vpop.f32.mrb[86].mxu1 }
 0xd6a   : > { %v7407_v57 = vrot.slane %v7399_v21, %v10564_v61  ;;  %v7414_v0 = vrot.slane %v7400_v46, %v10564_v61  ;;  %v7535_v59 = vcombine.low %v7259_v12, %v7347_v51  ;;  %v7536_v24 = vcombine.high %v7259_v12, %v7347_v51  ;;  %v9242_v8 = vpop.f32.mrb[87].mxu1 }
 0xd6c   : > { %v7447_v16 = vcombine.low %v7391_v19, %v7407_v57  ;;  %v7448_v27 = vcombine.high %v7391_v19, %v7407_v57  ;;  %v7463_v18 = vcombine.low %v7398_v43, %v7414_v0  ;;  %v7464_v13 = vcombine.high %v7398_v43, %v7414_v0 }
 0xd6d   : > { %v7543_v49 = vrot.slane %v7535_v59, %v10564_v61  ;;  %v7550_v40 = vrot.slane %v7536_v24, %v10564_v61 }
 0xd6e   : > { %v7455_v32 = vrot.slane %v7447_v16, %v10573_v11  ;;  %v7462_v52 = vrot.slane %v7448_v27, %v10573_v11  ;;  %v7471_v35 = vrot.slane %v7463_v18, %v10573_v11  ;;  %v7478_v2 = vrot.slane %v7464_v13, %v10573_v11 }
 0xd6f   : > { %v7583_v3 = vcombine.low %v7527_v42, %v7543_v49  ;;  %v7584_v23 = vcombine.high %v7527_v42, %v7543_v49  ;;  %v7599_v1 = vcombine.low %v7534_v7, %v7550_v40  ;;  %v7600_v17 = vcombine.high %v7534_v7, %v7550_v40 }
 0xd70   : > { %v8810_v62 = vcombine.low %v7455_v32, %v7462_v52  ;;  %v8812_v60 = vcombine.high %v7455_v32, %v7462_v52  ;;  %v8814_v58 = vcombine.low %v7471_v35, %v7478_v2  ;;  %v8816_v53 = vcombine.high %v7471_v35, %v7478_v2 }
 0xd71   : > { %v7591_v25 = vrot.slane %v7583_v3, %v10573_v11  ;;  %v7598_v29 = vrot.slane %v7584_v23, %v10573_v11  ;;  %v7607_v44 = vrot.slane %v7599_v1, %v10573_v11  ;;  %v7614_v37 = vrot.slane %v7600_v17, %v10573_v11 }
 0xd72   : > { %v7638_v50 = vrot.slane %v8810_v62, %v10564_v61  ;;  %v7654_v26 = vrot.slane %v8812_v60, %v10564_v61  ;;  %v7670_v4 = vrot.slane %v8814_v58, %v10564_v61  ;;  %v7686_v48 = vrot.slane %v8816_v53, %v10564_v61 }
 0xd73   : > { %v8818_v56 = vcombine.low %v7591_v25, %v7598_v29  ;;  %v8820_v22 = vcombine.high %v7591_v25, %v7598_v29  ;;  %v8822_v12 = vcombine.low %v7607_v44, %v7614_v37  ;;  %v8824_v39 = vcombine.high %v7607_v44, %v7614_v37 }
 0xd74   : > { %v7703_v28 = vcombine.low %v7638_v50, %v7654_v26  ;;  %v7735_v36 = vcombine.low %v7670_v4, %v7686_v48  ;;  %v7704_v30 = vcombine.high %v7638_v50, %v7654_v26  ;;  %v7736_v10 = vcombine.high %v7670_v4, %v7686_v48 }
 0xd75   : > { %v7774_v63 = vrot.slane %v8818_v56, %v10564_v61  ;;  %v7790_v55 = vrot.slane %v8820_v22, %v10564_v61  ;;  %v7806_v5 = vrot.slane %v8822_v12, %v10564_v61  ;;  %v7822_v14 = vrot.slane %v8824_v39, %v10564_v61 }
 0xd76   : > { %v7711_v38 = vrot.slane %v7703_v28, %v10573_v11  ;;  %v7743_v21 = vrot.slane %v7735_v36, %v10573_v11  ;;  %v7718_v46 = vrot.slane %v7704_v30, %v10573_v11  ;;  %v7750_v9 = vrot.slane %v7736_v10, %v10573_v11 }
 0xd77   : > { %v7839_v19 = vcombine.low %v7774_v63, %v7790_v55  ;;  %v7871_v43 = vcombine.low %v7806_v5, %v7822_v14  ;;  %v7840_v51 = vcombine.high %v7774_v63, %v7790_v55  ;;  %v7872_v57 = vcombine.high %v7806_v5, %v7822_v14 }
 0xd78   : > { %v7756_v0 = vcombine.high %v7711_v38, %v7743_v21  ;;  %v7755_v59 = vcombine.low %v7711_v38, %v7743_v21  ;;  %v7758_v24 = vcombine.high %v7718_v46, %v7750_v9  ;;  %v7757_v8 = vcombine.low %v7718_v46, %v7750_v9  ;;  %v9713_v21 = vld [vmem:[%s12423_s16] ss:$0 sm:$0xff] }
 0xd79   : > { %v7847_v16 = vrot.slane %v7839_v19, %v10573_v11  ;;  %v7879_v61 = vrot.slane %v7871_v43, %v10573_v11  ;;  %v7854_v27 = vrot.slane %v7840_v51, %v10573_v11  ;;  %v7886_v18 = vrot.slane %v7872_v57, %v10573_v11 }
 0xd7b   : > { %v7892_v13 = vcombine.high %v7847_v16, %v7879_v61  ;;  %v7891_v42 = vcombine.low %v7847_v16, %v7879_v61  ;;  %v7894_v7 = vcombine.high %v7854_v27, %v7886_v18  ;;  %v7893_v49 = vcombine.low %v7854_v27, %v7886_v18  ;;  %v9525_v16 = vld [vmem:[#allocation11 + $0x10] ss:$8 sps:$4 sm:$0xff]  }
 0xd7d   : > { %v9435_v40 = vpack.i.bf16 %v7892_v13, %v7756_v0  ;;  %v9430_v32 = vpack.i.bf16 %v7891_v42, %v7755_v59  ;;  %v9445_v52 = vpack.i.bf16 %v7894_v7, %v7758_v24  ;;  %v9440_v35 = vpack.i.bf16 %v7893_v49, %v7757_v8  ;;  %v9522_v59 = vld [vmem:[#allocation11] ss:$8 sps:$4 sm:$0xff]   ;;  %v9524_v24 = vld [vmem:[#allocation11 + $0x4] ss:$8 sps:$4 sm:$0xff]   ;;  %v9527_v8 = vld [vmem:[#allocation11 + $0x14] ss:$8 sps:$4 sm:$0xff]  }
 0xd7e   : > { %8144 = vmatprep.subr.bf16.mxu1 %v9524_v24 }
 0xd7f   : > { %9436 = vrot.lane.b32.xlu1 %v9435_v40, %s10016_s10  ;;  %9431 = vrot.lane.b32.xlu0 %v9430_v32, %s10017_s25  ;;  %v9530_v40 = vld [vmem:[#allocation11 + $0x24] ss:$8 sps:$4 sm:$0xff]   ;;  %v9531_v32 = vld [vmem:[#allocation11 + $0x30] ss:$8 sps:$4 sm:$0xff]   ;;  %s12431_s25 = sld [smem:[#allocation38_spill]] }
 0xd80   : > { %8145 = vmatpush1.bf16.msra.mxu1 %v9522_v59 }
 0xd81   : > { %8146 = vmatprep.subr.bf16.mxu1 %v9527_v8 }
 0xd83   : > { %9446 = vrot.lane.b32.xlu1 %v9445_v52, %s10014_s29  ;;  %9441 = vrot.lane.b32.xlu0 %v9440_v35, %s10015_s12  ;;  %v9533_v52 = vld [vmem:[#allocation11 + $0x34] ss:$8 sps:$4 sm:$0xff]   ;;  %v9536_v35 = vld [vmem:[#allocation11 + $0x44] ss:$8 sps:$4 sm:$0xff]   ;;  %s8427_s29 = sshll.u32 %s647_s22, 4  ;;  %s12286_s29 = int_to_ptr.vmem [resolvable:$true] %s8427_s29 }
 0xd84   : > { %8147 = vmatpush1.bf16.msra.mxu1 %v9525_v16  ;;  %s9918_s8 = scalar_lea.vmem %s12286_s29, 256  ;;  %p9925_p13 = scmp.lt.s32.totalorder %s12286_s29, %s9923_s9 }
 0xd85   : > { %8148 = vmatprep.subr.bf16.mxu1 %v9530_v40  ;;  %s12284_s14 = scalar_lea.hbm %s12431_s25, %s8868_s24  ;;  %p9919_p5 = scmp.ne.s32.totalorder %s12286_s29, %s9918_s8 }
 0xd86   : > { %p9926_p9 = scmp.lt.s32.totalorder %s9924_s30, %s9918_s8 }
 0xd87   : > { %p9920_p4 = pnand %p9919_p5, %p12432_p1 }
 0xd88   : > { %p9927_p7 = por %p9926_p9, %p9925_p13 }
 0xd89   : > { %p9921_p11 = pneg %p9920_p4 }
 0xd8b   : > { %p9928_p12 = pnand %p9927_p7, %p9921_p11 }
 0xdb5   : > { %v9422_v2 = vpop.permute.xlu1 %9421  ;;  %v9417_v3 = vpop.permute.xlu0 %9416 }
 0xdb6   : > { %v9419_v23 = vunpack.i.h.bf16 %v9417_v3  ;;  %v9418_v11 = vunpack.i.l.bf16 %v9417_v3  ;;  %v9424_v17 = vunpack.i.h.bf16 %v9422_v2  ;;  %v9423_v62 = vunpack.i.l.bf16 %v9422_v2  ;;  %v9534_v2 = vld [vmem:[#allocation11 + $0x40] ss:$8 sps:$4 sm:$0xff]   ;;  %v9539_v3 = vld [vmem:[#allocation11 + $0x54] ss:$8 sps:$4 sm:$0xff]  }
 0xdb8   : > { %v7952_v60 = vsel %vm2716_vm1, %v7887_v45, %v9419_v23  ;;  %v7951_v58 = vsel %vm2716_vm1, %v7751_v54, %v9418_v11  ;;  %v9537_v23 = vld [vmem:[#allocation11 + $0x50] ss:$8 sps:$4 sm:$0xff]   ;;  %v9542_v11 = vld [vmem:[#allocation11 + $0x64] ss:$8 sps:$4 sm:$0xff]  }
 0xdb9   : > { %v9427_v1 = vpop.permute.xlu1 %9426  ;;  %v7953_v37 = vsel %vm4239_vm2, %v7951_v58, %v9423_v62  ;;  %v7954_v50 = vsel %vm4239_vm2, %v7952_v60, %v9424_v17  ;;  %v9547_v17 = vld [vmem:[#allocation13] sm:$0xff]   ;;  %v9548_v62 = vld [vmem:[#allocation13 + $0x48] sm:$0xff]  }
 0xdba   : > { %v9429_v53 = vunpack.i.h.bf16 %v9427_v1  ;;  %v9428_v25 = vunpack.i.l.bf16 %v9427_v1  ;;  %v9546_v1 = vld [vmem:[#allocation13 + $0x40] sm:$0xff]   ;;  %v9549_v58 = vld [vmem:[#allocation13 + $0x8] sm:$0xff]  }
 0xdbb   : > { %8969 = vmatprep.subr.bf16.mxu0 %v9546_v1  ;;  %v9540_v60 = vld [vmem:[#allocation11 + $0x60] ss:$8 sps:$4 sm:$0xff]  }
 0xdbc   : > { %v7955_v48 = vsel %vm4242_vm3, %v7953_v37, %v9428_v25  ;;  %v7956_v41 = vsel %vm4242_vm3, %v7954_v50, %v9429_v53  ;;  %v9545_v53 = vld [vmem:[#allocation11 + $0x74] ss:$8 sps:$4 sm:$0xff]  }
 0xdbd   : > { %v9550_v25 = vld [vmem:[#allocation13 + $0x50] sm:$0xff]   ;;  %v9552_v37 = vld [vmem:[#allocation13 + $0x58] sm:$0xff]  }
 0xdbe   : > { %v9553_v50 = vld [vmem:[#allocation13 + $0x18] sm:$0xff]  }
 0xdf1   : > { %v9437_v29 = vpop.permute.xlu1 %9436  ;;  %v9432_v44 = vpop.permute.xlu0 %9431 }
 0xdf2   : > { %v9434_v26 = vunpack.i.h.bf16 %v9432_v44  ;;  %v9433_v4 = vunpack.i.l.bf16 %v9432_v44  ;;  %v9439_v15 = vunpack.i.h.bf16 %v9437_v29  ;;  %v9438_v45 = vunpack.i.l.bf16 %v9437_v29  ;;  %v9543_v29 = vld [vmem:[#allocation11 + $0x70] ss:$8 sps:$4 sm:$0xff]  }
 0xdf3   : > { %v9551_v44 = vld [vmem:[#allocation13 + $0x10] sm:$0xff]  }
 0xdf4   : > { %v7957_v20 = vsel %vm4245_vm4, %v7955_v48, %v9433_v4  ;;  %v7958_v34 = vsel %vm4245_vm4, %v7956_v41, %v9434_v26  ;;  %v9554_v26 = vld [vmem:[#allocation13 + $0x60] sm:$0xff]   ;;  %v9556_v48 = vld [vmem:[#allocation13 + $0x68] sm:$0xff]  }
 0xdf5   : > { %v9447_v54 = vpop.permute.xlu1 %9446  ;;  %v9442_v56 = vpop.permute.xlu0 %9441  ;;  %v7959_v36 = vsel %vm4248_vm5, %v7957_v20, %v9438_v45  ;;  %v7960_v30 = vsel %vm4248_vm5, %v7958_v34, %v9439_v15  ;;  %v9555_v4 = vld [vmem:[#allocation13 + $0x20] sm:$0xff]  }
 0xdf6   : > { %v9449_v22 = vunpack.i.h.bf16 %v9447_v54  ;;  %v9448_v12 = vunpack.i.l.bf16 %v9447_v54  ;;  %v9444_v39 = vunpack.i.h.bf16 %v9442_v56  ;;  %v9443_v28 = vunpack.i.l.bf16 %v9442_v56 }
 0xdf8   : > { %v7961_v10 = vsel %vm4251_vm6, %v7959_v36, %v9443_v28  ;;  %v7962_v63 = vsel %vm4251_vm6, %v7960_v30, %v9444_v39  ;;  %v9714_v28 = vld [vmem:[%s12424_s1] ss:$0 sm:$0xff] }
 0xdf9   : > { %v7963_v55 = vsel %vm4254_vm7, %v7961_v10, %v9448_v12  ;;  %v7964_v5 = vsel %vm4254_vm7, %v7962_v63, %v9449_v22  ;;  %v9715_v10 = vld [vmem:[%s12425_s23] ss:$0 sm:$0xff] }
 0xdfa   : > { %v7965_v14 = vpack.c.bf16 %v7964_v5, %v7963_v55 }
 0xdfc   : > { %9260 = vmatmul.mubr.bf16.vlgmr.msra.gmra.mrb[60].mxu0 %v7965_v14  ;;  %v9557_v14 = vld [vmem:[#allocation13 + $0x28] sm:$0xff]  }
 0xdfd   : > { %8970 = vmatpush3.bf16.msra.mxu0 %v9547_v17 }
 0xdfe   : > { %8971 = vmatprep.subr.bf16.mxu0 %v9548_v62 }
 0xe01   : > { %8972 = vmatpush3.bf16.msra.mxu0 %v9549_v58 }
 0xe02   : > { %8973 = vmatprep.subr.bf16.mxu0 %v9550_v25 }
 0xe05   : > { %8974 = vmatpush3.bf16.msra.mxu0 %v9551_v44 }
 0xe06   : > { %8975 = vmatprep.subr.bf16.mxu0 %v9552_v37 }
 0xe09   : > { %8976 = vmatpush3.bf16.msra.mxu0 %v9553_v50 }
 0xe0a   : > { %8977 = vmatprep.subr.bf16.mxu0 %v9554_v26 }
 0xe0d   : > { %8978 = vmatpush3.bf16.msra.mxu0 %v9555_v4 }
 0xe0e   : > { %8979 = vmatprep.subr.bf16.mxu0 %v9556_v48 }
 0xe11   : > { %8980 = vmatpush3.bf16.msra.mxu0 %v9557_v14 }
 0xecf   : > { %v8000_v38 = vpop.f32.mrb[60].mxu0 }
 0xed0   : > { %v8001_v46 = vadd.f32 %v9713_v21, %v8000_v38  ;;  %v9261_v9 = vpop.f32.mrb[61].mxu0  ;;  %v9558_v38 = vld [vmem:[#allocation13 + $0x70] sm:$0xff]  }
 0xed1   : > { %v8003_v19 = vpop.f32.mrb[62].mxu0  ;;  %8981 = vmatprep.subr.bf16.mxu0 %v9558_v38  ;;  %v9561_v9 = vld [vmem:[#allocation13 + $0x38] sm:$0xff]  }
 0xed2   : > { %v8007_v43 = vadd.f32 %v8001_v46, %v11480_v6  ;;  %v8004_v51 = vadd.f32 %v9713_v21, %v8003_v19  ;;  %v9262_v57 = vpop.f32.mrb[63].mxu0  ;;  %v9559_v21 = vld [vmem:[#allocation13 + $0x30] sm:$0xff]   ;;  %v9560_v46 = vld [vmem:[#allocation13 + $0x78] sm:$0xff]   ;;  %v8052_v19 = vld [vmem:[%s12426_s15] sm:$0x3]  ;;  %s8414_s15 = scalar_lea.sflag [#allocation4], %s10406_s13 }
 0xed3   : > { %8982 = vmatpush3.bf16.msra.mxu0 %v9559_v21 }
 0xed4   : > { %v8008_v0 = vadd.f32 %v8004_v51, %v11482_v47  ;;  %8009 = vadd.xlane.f32.xlu0 %v8007_v43  ;;  %v9528_v47 = vld [vmem:[#allocation11 + $0x20] ss:$8 sps:$4 sm:$0xff]   ;;  %8983 = vmatprep.subr.bf16.mxu0 %v9560_v46  ;;  %v8061_v51 = vrot.slane %v8052_v19, %v10462_v33 }
 0xed5   : > { %8149 = vmatpush1.bf16.msra.mxu1 %v9528_v47 }
 0xed6   : > { %8011 = vadd.xlane.f32.xlu1 %v8008_v0  ;;  %8150 = vmatprep.subr.bf16.mxu1 %v9533_v52 }
 0xed7   : > { %8984 = vmatpush3.bf16.msra.mxu0 %v9561_v9 }
 0xed9   : > { %8151 = vmatpush1.bf16.msra.mxu1 %v9531_v32 }
 0xeda   : > { %8152 = vmatprep.subr.bf16.mxu1 %v9536_v35 }
 0xedd   : > { %8153 = vmatpush1.bf16.msra.mxu1 %v9534_v2 }
 0xede   : > { %8154 = vmatprep.subr.bf16.mxu1 %v9539_v3 }
 0xee1   : > { %8155 = vmatpush1.bf16.msra.mxu1 %v9537_v23 }
 0xee2   : > { %8156 = vmatprep.subr.bf16.mxu1 %v9542_v11 }
 0xee5   : > { %8157 = vmatpush1.bf16.msra.mxu1 %v9540_v60 }
 0xee6   : > { %8158 = vmatprep.subr.bf16.mxu1 %v9545_v53 }
 0xee9   : > { %8159 = vmatpush1.bf16.msra.mxu1 %v9543_v29 }
 0xf61   : > { %v8010_v61 = vpop.xlane.xlu0 %8009 }
 0xf62   : > { %v8013_v27 = vmul.f32 0.0078125, %v8010_v61 }
 0xf63   : > { %v8012_v18 = vpop.xlane.xlu1 %8011 }
 0xf64   : > { %v8015_v13 = vsub.f32 %v8007_v43, %v8013_v27  ;;  %v8014_v42 = vmul.f32 0.0078125, %v8012_v18  ;;  %v8057_v43 = vrot.slane %v8052_v19, %v10456_v31  ;;  %v8841_v31 = vld [vmem:[%s12427_s18] ss:$0 sm:$0xff] }
 0xf66   : > { %v8016_v6 = vsub.f32 %v8008_v0, %v8014_v42  ;;  %v8017_v7 = vmul.f32 %v8015_v13, %v8015_v13 }
 0xf68   : > { %8019 = vadd.xlane.f32.xlu0 %v8017_v7  ;;  %v8018_v49 = vmul.f32 %v8016_v6, %v8016_v6 }
 0xf6c   : > { %8021 = vadd.xlane.f32.xlu0 %v8018_v49 }
 0xff5   : > { %v8020_v41 = vpop.xlane.xlu0 %8019 }
 0xff6   : > { %v8023_v15 = vmul.f32 0.0078125, %v8020_v41 }
 0xff8   : > { %v8025_v45 = vadd.f32 1e-05, %v8023_v15  ;;  %v8858_v15 = vld [vmem:[%s12428_s3] ss:$0 sm:$0xff] }
 0xff9   : > { %v8022_v20 = vpop.xlane.xlu0 %8021 }
 0xffa   : > { %9694 = vrsqrt.f32 %v8025_v45  ;;  %v8024_v34 = vmul.f32 0.0078125, %v8022_v20 }
 0xffc   : > { %v8026_v54 = vadd.f32 1e-05, %v8024_v34  ;;  %v8859_v34 = vld [vmem:[%s12429_s17] ss:$0 sm:$0xff] }
 0xffe   : > { %9696 = vrsqrt.f32 %v8026_v54 }
0x1004   : > { %v9695_v56 = vpop.eup %9694 }
0x1005   : > { %v8029_v22 = vmul.f32 %v9695_v56, %v8015_v13 }
0x1007   : > { %v8031_v36 = vmul.f32 %v9714_v28, %v8029_v22 }
0x1008   : > { %v9697_v12 = vpop.eup %9696 }
0x1009   : > { %v8030_v39 = vmul.f32 %v9697_v12, %v8016_v6  ;;  %v8033_v63 = vadd.f32 %v9715_v10, %v8031_v36 }
0x100b   : > { %v8032_v30 = vmul.f32 %v9714_v28, %v8030_v39 }
0x100d   : > { %v8034_v55 = vadd.f32 %v9715_v10, %v8032_v30 }
0x100f   : > { %v8035_v5 = vpack.c.bf16 %v8034_v55, %v8033_v63 }
0x1011   : > { %8177 = vmatmul.mubr.bf16.vlgmr.msra.gmra.mrb[88].mxu1 %v8035_v5 }
0x10e4   : > { %v8178_v57 = vpop.f32.mrb[88].mxu1 }
0x10e5   : > { %v8179_v0 = vadd.f32 %v8178_v57, %v8057_v43  ;;  %v8180_v59 = vpop.f32.mrb[89].mxu1 }
0x10e6   : > { %v8181_v24 = vadd.f32 %v8180_v59, %v8061_v51  ;;  %v8182_v8 = vpop.f32.mrb[90].mxu1 }
0x10e7   : > { %v8183_v16 = vadd.f32 %v8182_v8, %v8057_v43  ;;  %v8184_v61 = vpop.f32.mrb[91].mxu1  ;;  %v8187_v18 = vmax.f32 %v8179_v0, 0.0 }
0x10e8   : > { %v8185_v27 = vadd.f32 %v8184_v61, %v8061_v51  ;;  %v8188_v42 = vmax.f32 %v8181_v24, 0.0 }
0x10e9   : > { %v8189_v13 = vmax.f32 %v8183_v16, 0.0 }
0x10ea   : > { %v8190_v6 = vmax.f32 %v8185_v27, 0.0 }
0x10eb   : > { %v8191_v7 = vpack.c.bf16 %v8189_v13, %v8187_v18 }
0x10ec   : > { %v8192_v49 = vpack.c.bf16 %v8190_v6, %v8188_v42 }
0x10ee   : > { %8360 = vmatprep.mubr.bf16.mxu0 %v8192_v49 }
0x10ef   : > { %8361 = vmatmul.mubr.bf16.vlgmr.msra.gmra.mrb[64].mxu0 %v8191_v7 }
0x11c2   : > { %v8985_v47 = vpop.f32.mrb[64].mxu0 }
0x11c3   : > { %v8986_v33 = vpop.f32.mrb[65].mxu0 }
0x11c4   : > { %v8987_v40 = vadd.f32 %v8986_v33, %v8985_v47  ;;  %v8988_v32 = vpop.f32.mrb[66].mxu0 }
0x11c5   : > { %v8989_v52 = vpop.f32.mrb[67].mxu0 }
0x11c6   : > { %v8363_v35 = vadd.f32 %v8987_v40, %v8841_v31  ;;  %v8990_v2 = vadd.f32 %v8989_v52, %v8988_v32 }
0x11c8   : > { %v8366_v3 = vadd.f32 %v8990_v2, %v8841_v31  ;;  %v8369_v23 = vadd.f32 %v8363_v35, %v8033_v63 }
0x11ca   : > { %8373 = vadd.xlane.f32.xlu1 %v8369_v23  ;;  %v8370_v11 = vadd.f32 %v8366_v3, %v8034_v55 }
0x11cc   : > { %8375 = vadd.xlane.f32.xlu0 %v8370_v11 }
0x1257   : > { %v8374_v1 = vpop.xlane.xlu1 %8373 }
0x1258   : > { %v8377_v17 = vmul.f32 0.0078125, %v8374_v1 }
0x1259   : > { %v8376_v62 = vpop.xlane.xlu0 %8375 }
0x125a   : > { %v8379_v60 = vsub.f32 %v8369_v23, %v8377_v17  ;;  %v8378_v58 = vmul.f32 0.0078125, %v8376_v62 }
0x125c   : > { %v8380_v53 = vsub.f32 %v8370_v11, %v8378_v58  ;;  %v8381_v25 = vmul.f32 %v8379_v60, %v8379_v60 }
0x125e   : > { %8383 = vadd.xlane.f32.xlu1 %v8381_v25  ;;  %v8382_v29 = vmul.f32 %v8380_v53, %v8380_v53 }
0x1260   : > { %8385 = vadd.xlane.f32.xlu0 %v8382_v29 }
0x12eb   : > { %v8384_v44 = vpop.xlane.xlu1 %8383 }
0x12ec   : > { %v8387_v37 = vmul.f32 0.0078125, %v8384_v44 }
0x12ed   : > { %v8386_v50 = vpop.xlane.xlu0 %8385 }
0x12ee   : > { %v8389_v26 = vadd.f32 1e-05, %v8387_v37  ;;  %v8388_v4 = vmul.f32 0.0078125, %v8386_v50 }
0x12f0   : > { %9698 = vrsqrt.f32 %v8389_v26  ;;  %v8390_v48 = vadd.f32 1e-05, %v8388_v4 }
0x12f2   : > { %9700 = vrsqrt.f32 %v8390_v48 }
0x12fa   : > { %v9699_v41 = vpop.eup %9698 }
0x12fb   : > { %v8393_v45 = vmul.f32 %v9699_v41, %v8379_v60 }
0x12fc   : > { %v9701_v20 = vpop.eup %9700 }
0x12fd   : > { %v8401_v54 = vmul.f32 %v8858_v15, %v8393_v45  ;;  %v8394_v56 = vmul.f32 %v9701_v20, %v8380_v53 }
0x12ff   : > { %v8409_v22 = vadd.f32 %v8859_v34, %v8401_v54  ;;  %v8402_v12 = vmul.f32 %v8858_v15, %v8394_v56 }
0x1301   : > { %v8410_v39 = vadd.f32 %v8859_v34, %v8402_v12  ;;  %8411 = vst [vmem:[%s647_s22] sm:$0xff] %v8409_v22 }
0x1303   : > { %8412 = vst [vmem:[%s647_s22 + $0x8] sm:$0xff] %v8410_v39 }
0x1304   : > { %9931 = shalt.err (!%p9928_p12)
}
0x1305   : > { %s9932_s18 = scalar_lea.hbm %s12284_s14, 256  ;;  %s9936_s3 = scalar_lea.hbm %s12431_s25, 512 }
0x1306   : > { %p9933_p8 = scmp.ne.s32.totalorder %s12284_s14, %s9932_s18  ;;  %p9937_p2 = scmp.lt.u32.totalorder %s12284_s14, %s12431_s25 }
0x1307   : > { %p9938_p6 = scmp.lt.u32.totalorder %s9936_s3, %s9932_s18  ;;  %p9940_p5 = scmp.lt.u32.totalorder %s9932_s18, %s12284_s14 }
0x1308   : > { %p9934_p10 = pnand %p9933_p8, %p12432_p1 }
0x1309   : > { %p9939_p3 = por %p9938_p6, %p9937_p2 }
0x130a   : > { %p9935_p0 = pneg %p9934_p10 }
0x130b   : > { %p9941_p4 = por %p9940_p5, %p9939_p3 }
0x130d   : > { %p9942_p11 = pnand %p9941_p4, %p9935_p0 }
0x130f   : > { %9945 = shalt.err (!%p9942_p11)
}
0x1310   : > { %s10024_s17 = smov 128   ;;  %s10025_s24 = smov 8  }
0x1311   : > { %9285 = dma.vmem_to_hbm [thread:$0]  (%p12432_p1), %s12286_s29, 256, %s12284_s14, %s8414_s15, %s10024_s17, %s10024_s17, %s10025_s24  }
0x1312 PF: > { %s12433_s22 = sld [smem:[#allocation20_spill]]  ;;  %s12434_s12 = sld [smem:[#allocation23_spill]] }
0x1313   : > { %s12435_s10 = sld [smem:[#allocation21_spill]] }
0x1318   : > { %s8442_s8 = sand.u32 1, %s12433_s22   ;;  %p12436_p13 = scmp.ne.s32.totalorder %s12434_s12, 0 }
0x1319   : > { %p12437_p9 = scmp.ge.s32.totalorder %s12435_s10, 2  ;;  %s8443_s6 = scalar_lea.sflag [#allocation4], %s8442_s8 }
0x131b   : > { %p9311_p7 = pnand %p12437_p9, %p12436_p13 }
0x131d   : > { %9979 = dma.done.wait (!%p9311_p7), %s8443_s6, 256  }
0x131e   : > { %9981 = vsyncadd (!%p9311_p7), %s8443_s6, 4294967040  ;;  %s12438_s21 = sld [smem:[#allocation24_spill]]  ;;  %s12439_s9 = sld [smem:[#allocation25_spill]] }
0x131f   : > { %s12440_s18 = smov %s9988_s19  ;;  %s12441_s19 = smov %s9992_s20 }
0x1324   : > { %p33_p12 = scmp.ge.s32.totalorder %s12438_s21, 4   ;;  %s12442_s20 = smov %s12439_s9 }
0x1326   :  { %35 = sbr.rel (!%p33_p12) target bundleno = 22 (0x16), region = 165 }
0x132d   :  { %8448 = vsyncpa [#allocation3], 1 }
0x132e   :  { %8450 = vsyncpa [#allocation3 + $0x1], 1 }
0x132f   :  { %8451 = vsyncpa [#allocation6], 1 }
0x1330   :  { %8453 = vsyncpa [#allocation6 + $0x1], 1 }
0x1331   :  { %8454 = vsyncpa [#allocation9], 1 }
0x1332   :  { %8455 = vsyncpa [#allocation12], 1 }
0x1333   :  { %8456 = vsyncpa [#allocation4], 1 }
0x1334   :  { %8458 = vsyncpa [#allocation4 + $0x1], 1 }

</bundles_post_ra>
